<compile_context>
chip_gen: v7x
topology: tpu7x:2x2x1
jax: 0.10.0
libtpu: 0.0.40
codegen_flags: <defaults>
</compile_context>

<pallas_src>
import functools

import jax
import jax.numpy as jnp
from jax.experimental import pallas as pl
from jax.experimental.pallas import tpu as pltpu

LN_EPS = 1e-5


def _fused_st_attn_kernel(x_ref,
                          g_t_ref, b_t_ref, wqkv_t_ref, wo_t_ref, bo_t_ref,
                          g_s_ref, b_s_ref, wqkv_s_ref, wo_s_ref, bo_s_ref,
                          o_ref, *, T, C, D, inner, compute_dtype, approx_recip):
    """Fused temporal+spatial attention for one (T, C, D) batch slab held in VMEM."""
    f32 = jnp.float32

    def layernorm(h, g_ref, b_ref):                       # h: (N, D) f32
        mu = jnp.mean(h, axis=-1, keepdims=True)
        var = jnp.mean((h - mu) * (h - mu), axis=-1, keepdims=True)
        hn = (h - mu) * jax.lax.rsqrt(var + LN_EPS)
        return hn * g_ref[...].astype(f32) + b_ref[...].astype(f32)

    def attention(tokens, n_seq, seq_len, g_ref, b_ref, wqkv_ref, wo_ref, bo_ref):
        """tokens: (n_seq * seq_len, D) f32, sequences contiguous along axis 0."""
        xn = layernorm(tokens, g_ref, b_ref).astype(compute_dtype)
        # qkv projections as big (n_seq*seq_len, D) @ (D, inner) matmuls.
        # Scale is already folded into the q weights; weights are indexed on the
        # leading dim of the (3, D, inner) stack (no mid-tile lane slicing).
        q = jnp.dot(xn, wqkv_ref[0], preferred_element_type=f32)
        k = jnp.dot(xn, wqkv_ref[1], preferred_element_type=f32)
        v = jnp.dot(xn, wqkv_ref[2], preferred_element_type=f32)
        q = q.reshape(n_seq, seq_len, inner).astype(compute_dtype)
        k = k.reshape(n_seq, seq_len, inner).astype(compute_dtype)
        v = v.reshape(n_seq, seq_len, inner).astype(compute_dtype)
        # q @ k^T without materializing k^T: contract the feature dim directly.
        dots = jax.lax.dot_general(q, k, (((2,), (2,)), ((0,), (0,))),
                                   preferred_element_type=f32)       # (n, L, L)
        # Softmax in f32 (row-max subtracted); denominator via EUP reciprocal.
        m = jnp.max(dots, axis=-1, keepdims=True)
        p = jnp.exp(dots - m)
        attn = p * pl.reciprocal(jnp.sum(p, axis=-1, keepdims=True), approx=approx_recip)
        ctx = jax.lax.dot_general(attn.astype(compute_dtype), v,
                                  (((2,), (1,)), ((0,), (0,))),
                                  preferred_element_type=f32)        # (n, L, inner)
        ctx = ctx.reshape(n_seq * seq_len, inner).astype(compute_dtype)
        return (jnp.dot(ctx, wo_ref[...], preferred_element_type=f32)
                + bo_ref[...].astype(f32))                           # (n*L, D) f32

    x = x_ref[0].astype(f32)                               # (T, C, D)

    # ---- stage 1: temporal attention -- 'b t c d -> b c t d' grouping ----
    x_ct = pltpu.einshape("tcd->ctd", x)                   # (C, T, D)
    out_t = attention(x_ct.reshape(C * T, D), C, T,
                      g_t_ref, b_t_ref, wqkv_t_ref, wo_t_ref, bo_t_ref)   # 'b c t d'

    # ---- stage 2: spatial attention -- 'b c t d -> b t c d' grouping ----
    y_tc = pltpu.einshape("ctd->tcd", out_t.reshape(C, T, D))             # (T, C, D)
    out_s = attention(y_tc.reshape(T * C, D), T, C,
                      g_s_ref, b_s_ref, wqkv_s_ref, wo_s_ref, bo_s_ref)   # (T*C, D)

    o_ref[0] = out_s.reshape(T, C, D).astype(o_ref.dtype)


def init_params(key, dim, heads, dim_head, dtype=jnp.float32):
    inner = heads * dim_head
    ks = jax.random.split(key, 6)
    s_qkv = 1.0 / jnp.sqrt(dim)
    s_out = 1.0 / jnp.sqrt(inner)
    return {
        # LayerNorm params
        "g_t": jnp.ones((1, dim), dtype), "b_t": jnp.zeros((1, dim), dtype),
        "g_s": jnp.ones((1, dim), dtype), "b_s": jnp.zeros((1, dim), dtype),
        # Linear weights stored pre-transposed: y = x @ W  (W == torch_weight.T)
        "w_qkv_t": (jax.random.uniform(ks[0], (dim, 3 * inner), dtype) * 2 - 1) * s_qkv,
        "w_qkv_s": (jax.random.uniform(ks[1], (dim, 3 * inner), dtype) * 2 - 1) * s_qkv,
        "w_out_t": (jax.random.uniform(ks[2], (inner, dim), dtype) * 2 - 1) * s_out,
        "bo_t":    (jax.random.uniform(ks[3], (1, dim), dtype) * 2 - 1) * s_out,
        "w_out_s": (jax.random.uniform(ks[4], (inner, dim), dtype) * 2 - 1) * s_out,
        "bo_s":    (jax.random.uniform(ks[5], (1, dim), dtype) * 2 - 1) * s_out,
    }


@functools.partial(jax.jit, static_argnames=("heads", "dim_head", "compute_dtype"))
def spatio_temporal_attention(x, params, *, heads, dim_head,
                              compute_dtype=jnp.bfloat16):
    """Pallas implementation of SpatioTemporalAttention.vanilla_forward.  x: (B,T,C,D)."""
    B, T, C, D = x.shape
    inner = heads * dim_head
    scale = float(dim_head) ** -0.5

    def prep_qkv(w):          # (D, 3*inner) -> (3, D, inner), scale folded into q
        wq, wk, wv = jnp.split(w, 3, axis=1)
        return jnp.stack([wq * scale, wk, wv]).astype(compute_dtype)

    wqkv_t = prep_qkv(params["w_qkv_t"])
    wqkv_s = prep_qkv(params["w_qkv_s"])
    wo_t = params["w_out_t"].astype(compute_dtype)
    wo_s = params["w_out_s"].astype(compute_dtype)

    kernel = functools.partial(
        _fused_st_attn_kernel, T=T, C=C, D=D, inner=inner,
        compute_dtype=compute_dtype,
        approx_recip=(compute_dtype != jnp.float32))

    # Explicit VMEM budget with headroom; kept <= 32 MiB so the same tiling also fits
    # v7x (64 MiB physical / 32 MiB default scoped VMEM) without re-deriving tiles.
    itemsize = jnp.dtype(compute_dtype).itemsize
    slab_bytes = T * C * max(D, inner) * 4
    param_bytes = 2 * (3 * D * inner + inner * D) * itemsize + 6 * D * 4
    vmem_limit = int(min(max(16 * slab_bytes + 4 * param_bytes, 16 << 20), 32 << 20))

    const2 = lambda b: (0, 0)
    const3 = lambda b: (0, 0, 0)
    # NOTE: all parameter specs have constant index maps, so Pallas does not re-DMA
    # them across grid steps.  For large dim/inner_dim they could additionally be
    # single-buffered (pipeline_mode=pl.Buffered(1)) to halve their VMEM footprint.
    return pl.pallas_call(
        kernel,
        out_shape=jax.ShapeDtypeStruct((B, T, C, D), x.dtype),
        grid=(B,),
        in_specs=[
            pl.BlockSpec((1, T, C, D), lambda b: (b, 0, 0, 0)),
            pl.BlockSpec((1, D), const2), pl.BlockSpec((1, D), const2),
            pl.BlockSpec((3, D, inner), const3),
            pl.BlockSpec((inner, D), const2), pl.BlockSpec((1, D), const2),
            pl.BlockSpec((1, D), const2), pl.BlockSpec((1, D), const2),
            pl.BlockSpec((3, D, inner), const3),
            pl.BlockSpec((inner, D), const2), pl.BlockSpec((1, D), const2),
        ],
        out_specs=pl.BlockSpec((1, T, C, D), lambda b: (b, 0, 0, 0)),
        compiler_params=pltpu.CompilerParams(
            dimension_semantics=("parallel",),
            vmem_limit_bytes=vmem_limit),
    )(x, params["g_t"], params["b_t"], wqkv_t, wo_t, params["bo_t"],
      params["g_s"], params["b_s"], wqkv_s, wo_s, params["bo_s"])


# ----------------------------- pure-JAX reference -----------------------------
def _layernorm(x, g, b):
    mu = jnp.mean(x, axis=-1, keepdims=True)
    var = jnp.mean((x - mu) ** 2, axis=-1, keepdims=True)
    return (x - mu) * jax.lax.rsqrt(var + LN_EPS) * g + b


def _ref_forward(x, p, *, heads, dim_head):
    scale = float(dim_head) ** -0.5
    inner = heads * dim_head
    # temporal
    xn = _layernorm(x, p["g_t"][0], p["b_t"][0])
    qkv = xn @ p["w_qkv_t"]
    q, k, v = qkv[..., :inner], qkv[..., inner:2 * inner], qkv[..., 2 * inner:]
    q, k, v = (jnp.transpose(t, (0, 2, 1, 3)) for t in (q, k, v))      # b c t d
    attn = jax.nn.softmax(jnp.einsum("bcid,bcjd->bcij", q, k) * scale, axis=-1)
    out = jnp.einsum("bcij,bcjd->bcid", attn, v) @ p["w_out_t"] + p["bo_t"][0]
    # spatial
    out = _layernorm(out, p["g_s"][0], p["b_s"][0])
    qkv = out @ p["w_qkv_s"]
    q, k, v = qkv[..., :inner], qkv[..., inner:2 * inner], qkv[..., 2 * inner:]
    q, k, v = (jnp.transpose(t, (0, 2, 1, 3)) for t in (q, k, v))      # b t c d
    attn = jax.nn.softmax(jnp.einsum("btid,btjd->btij", q, k) * scale, axis=-1)
    out = jnp.einsum("btij,btjd->btid", attn, v) @ p["w_out_s"] + p["bo_s"][0]
    return out


if __name__ == "__main__":
    B, T, C, D = 2, 8, 16, 32          # batch, temporal, spatial tokens, dim
    heads, dim_head = 2, 16            # inner_dim = 32

    key = jax.random.PRNGKey(0)
    kx, kp = jax.random.split(key)
    x = jax.random.normal(kx, (B, T, C, D), jnp.float32)
    params = init_params(kp, D, heads, dim_head)

    ref = _ref_forward(x, params, heads=heads, dim_head=dim_head)

    # Exact path: f32 MXU operands + exact reciprocal -> tight tolerance.
    out_f32 = jax.block_until_ready(
        spatio_temporal_attention(x, params, heads=heads, dim_head=dim_head,
                                  compute_dtype=jnp.float32))
    assert out_f32.shape == (B, T, C, D)
    assert jnp.allclose(out_f32, ref, atol=1e-4, rtol=1e-4), "f32 path mismatch vs reference"

    # Fast path: bf16 MXU operands (f32 accumulation / LayerNorm / softmax) + approx
    # reciprocal.  bf16 operand rounding across two attention stages bounds accuracy
    # to roughly 1e-2, so the f32 path above carries the strict correctness check.
    out_bf16 = jax.block_until_ready(
        spatio_temporal_attention(x, params, heads=heads, dim_head=dim_head,
                                  compute_dtype=jnp.bfloat16))
    assert out_bf16.shape == (B, T, C, D)
    assert jnp.allclose(out_bf16, ref, atol=1e-1, rtol=1e-1), "bf16 path mismatch vs reference"

    print("KERNEL_OK")
</pallas_src>

<mosaic_0001>
module attributes {stable_mosaic.version = 11 : i64} {
  func.func @_fused_st_attn_kernel(%arg0: i32, %arg1: memref<1x8x16x32xf32, #tpu.memory_space<vmem>>, %arg2: memref<1x32xf32, #tpu.memory_space<vmem>>, %arg3: memref<1x32xf32, #tpu.memory_space<vmem>>, %arg4: memref<3x32x32xf32, #tpu.memory_space<vmem>>, %arg5: memref<32x32xf32, #tpu.memory_space<vmem>>, %arg6: memref<1x32xf32, #tpu.memory_space<vmem>>, %arg7: memref<1x32xf32, #tpu.memory_space<vmem>>, %arg8: memref<1x32xf32, #tpu.memory_space<vmem>>, %arg9: memref<3x32x32xf32, #tpu.memory_space<vmem>>, %arg10: memref<32x32xf32, #tpu.memory_space<vmem>>, %arg11: memref<1x32xf32, #tpu.memory_space<vmem>>, %arg12: memref<1x8x16x32xf32, #tpu.memory_space<vmem>>) attributes {dimension_semantics = [#tpu.dimension_semantics<parallel>], iteration_bounds = array<i64: 2>, scalar_prefetch = 0 : i64, scratch_operands = 0 : i64, tpu.core_type = #tpu.core_type<tc>, window_params = [{transform_indices = @transform_0, window_bounds = array<i64: 1, 8, 16, 32>}, {pipeline_mode = #tpu.pipeline_mode<synchronous>, transform_indices = @transform_1, window_bounds = array<i64: 1, 32>}, {pipeline_mode = #tpu.pipeline_mode<synchronous>, transform_indices = @transform_2, window_bounds = array<i64: 1, 32>}, {pipeline_mode = #tpu.pipeline_mode<synchronous>, transform_indices = @transform_3, window_bounds = array<i64: 3, 32, 32>}, {pipeline_mode = #tpu.pipeline_mode<synchronous>, transform_indices = @transform_4, window_bounds = array<i64: 32, 32>}, {pipeline_mode = #tpu.pipeline_mode<synchronous>, transform_indices = @transform_5, window_bounds = array<i64: 1, 32>}, {pipeline_mode = #tpu.pipeline_mode<synchronous>, transform_indices = @transform_6, window_bounds = array<i64: 1, 32>}, {pipeline_mode = #tpu.pipeline_mode<synchronous>, transform_indices = @transform_7, window_bounds = array<i64: 1, 32>}, {pipeline_mode = #tpu.pipeline_mode<synchronous>, transform_indices = @transform_8, window_bounds = array<i64: 3, 32, 32>}, {pipeline_mode = #tpu.pipeline_mode<synchronous>, transform_indices = @transform_9, window_bounds = array<i64: 32, 32>}, {pipeline_mode = #tpu.pipeline_mode<synchronous>, transform_indices = @transform_10, window_bounds = array<i64: 1, 32>}, {transform_indices = @transform_11, window_bounds = array<i64: 1, 8, 16, 32>}]} {
    %c0 = arith.constant 0 : index
    %c0_0 = arith.constant 0 : index
    %c0_1 = arith.constant 0 : index
    %c0_2 = arith.constant 0 : index
    %0 = vector.load %arg1[%c0, %c0_0, %c0_1, %c0_2] : memref<1x8x16x32xf32, #tpu.memory_space<vmem>>, vector<1x8x16x32xf32>
    %1 = vector.shape_cast %0 : vector<1x8x16x32xf32> to vector<8x16x32xf32>
    %2 = tpu.transpose %1, [1, 0, 2] : vector<8x16x32xf32> -> vector<16x8x32xf32>
    %3 = vector.shape_cast %2 : vector<16x8x32xf32> to vector<128x32xf32>
    %cst = arith.constant dense<0.000000e+00> : vector<128xf32>
    %4 = vector.multi_reduction <add>, %3, %cst [1] : vector<128x32xf32> to vector<128xf32>
    %5 = vector.shape_cast %4 : vector<128xf32> to vector<128x1xf32>
    %cst_3 = arith.constant 3.200000e+01 : f32
    %6 = vector.broadcast %cst_3 : f32 to vector<128x1xf32>
    %7 = arith.divf %5, %6 : vector<128x1xf32>
    %8 = vector.broadcast %7 : vector<128x1xf32> to vector<128x32xf32>
    %9 = arith.subf %3, %8 : vector<128x32xf32>
    %10 = vector.broadcast %7 : vector<128x1xf32> to vector<128x32xf32>
    %11 = arith.subf %3, %10 : vector<128x32xf32>
    %12 = arith.mulf %9, %11 : vector<128x32xf32>
    %cst_4 = arith.constant dense<0.000000e+00> : vector<128xf32>
    %13 = vector.multi_reduction <add>, %12, %cst_4 [1] : vector<128x32xf32> to vector<128xf32>
    %14 = vector.shape_cast %13 : vector<128xf32> to vector<128x1xf32>
    %cst_5 = arith.constant 3.200000e+01 : f32
    %15 = vector.broadcast %cst_5 : f32 to vector<128x1xf32>
    %16 = arith.divf %14, %15 : vector<128x1xf32>
    %17 = vector.broadcast %7 : vector<128x1xf32> to vector<128x32xf32>
    %18 = arith.subf %3, %17 : vector<128x32xf32>
    %cst_6 = arith.constant 9.99999974E-6 : f32
    %19 = vector.broadcast %cst_6 : f32 to vector<128x1xf32>
    %20 = arith.addf %16, %19 : vector<128x1xf32>
    %21 = math.rsqrt %20 : vector<128x1xf32>
    %22 = vector.broadcast %21 : vector<128x1xf32> to vector<128x32xf32>
    %23 = arith.mulf %18, %22 : vector<128x32xf32>
    %c0_7 = arith.constant 0 : index
    %c0_8 = arith.constant 0 : index
    %24 = vector.load %arg2[%c0_7, %c0_8] : memref<1x32xf32, #tpu.memory_space<vmem>>, vector<1x32xf32>
    %25 = vector.broadcast %24 : vector<1x32xf32> to vector<128x32xf32>
    %26 = arith.mulf %23, %25 : vector<128x32xf32>
    %c0_9 = arith.constant 0 : index
    %c0_10 = arith.constant 0 : index
    %27 = vector.load %arg3[%c0_9, %c0_10] : memref<1x32xf32, #tpu.memory_space<vmem>>, vector<1x32xf32>
    %28 = vector.broadcast %27 : vector<1x32xf32> to vector<128x32xf32>
    %29 = arith.addf %26, %28 : vector<128x32xf32>
    %c0_11 = arith.constant 0 : index
    %c0_12 = arith.constant 0 : index
    %c0_13 = arith.constant 0 : index
    %30 = vector.load %arg4[%c0_11, %c0_12, %c0_13] : memref<3x32x32xf32, #tpu.memory_space<vmem>>, vector<1x32x32xf32>
    %31 = vector.shape_cast %30 : vector<1x32x32xf32> to vector<32x32xf32>
    %cst_14 = arith.constant dense<0.000000e+00> : vector<128x32xf32>
    %32 = tpu.matmul %29, %31, %cst_14 {dimension_numbers = #tpu.dot_dimension_numbers<[1], [0], [0], [1], [0, 0, 1, 1], [], []>} : vector<128x32xf32>, vector<32x32xf32>, vector<128x32xf32> -> vector<128x32xf32>
    %c1 = arith.constant 1 : index
    %c0_15 = arith.constant 0 : index
    %c0_16 = arith.constant 0 : index
    %33 = vector.load %arg4[%c1, %c0_15, %c0_16] : memref<3x32x32xf32, #tpu.memory_space<vmem>>, vector<1x32x32xf32>
    %34 = vector.shape_cast %33 : vector<1x32x32xf32> to vector<32x32xf32>
    %cst_17 = arith.constant dense<0.000000e+00> : vector<128x32xf32>
    %35 = tpu.matmul %29, %34, %cst_17 {dimension_numbers = #tpu.dot_dimension_numbers<[1], [0], [0], [1], [0, 0, 1, 1], [], []>} : vector<128x32xf32>, vector<32x32xf32>, vector<128x32xf32> -> vector<128x32xf32>
    %c2 = arith.constant 2 : index
    %c0_18 = arith.constant 0 : index
    %c0_19 = arith.constant 0 : index
    %36 = vector.load %arg4[%c2, %c0_18, %c0_19] : memref<3x32x32xf32, #tpu.memory_space<vmem>>, vector<1x32x32xf32>
    %37 = vector.shape_cast %36 : vector<1x32x32xf32> to vector<32x32xf32>
    %cst_20 = arith.constant dense<0.000000e+00> : vector<128x32xf32>
    %38 = tpu.matmul %29, %37, %cst_20 {dimension_numbers = #tpu.dot_dimension_numbers<[1], [0], [0], [1], [0, 0, 1, 1], [], []>} : vector<128x32xf32>, vector<32x32xf32>, vector<128x32xf32> -> vector<128x32xf32>
    %39 = vector.shape_cast %32 : vector<128x32xf32> to vector<16x8x32xf32>
    %40 = vector.shape_cast %35 : vector<128x32xf32> to vector<16x8x32xf32>
    %41 = vector.shape_cast %38 : vector<128x32xf32> to vector<16x8x32xf32>
    %cst_21 = arith.constant dense<0.000000e+00> : vector<16x8x8xf32>
    %42 = tpu.matmul %39, %40, %cst_21 {dimension_numbers = #tpu.dot_dimension_numbers<[2], [2], [1], [1], [0, 0, 0, 1, 1, 1], [0], [0]>} : vector<16x8x32xf32>, vector<16x8x32xf32>, vector<16x8x8xf32> -> vector<16x8x8xf32>
    %cst_22 = arith.constant dense<0xFF800000> : vector<16x8xf32>
    %43 = vector.multi_reduction <maximumf>, %42, %cst_22 [2] : vector<16x8x8xf32> to vector<16x8xf32>
    %44 = vector.shape_cast %43 : vector<16x8xf32> to vector<16x8x1xf32>
    %45 = vector.broadcast %44 : vector<16x8x1xf32> to vector<16x8x8xf32>
    %46 = arith.subf %42, %45 : vector<16x8x8xf32>
    %47 = math.exp %46 : vector<16x8x8xf32>
    %cst_23 = arith.constant dense<0.000000e+00> : vector<16x8xf32>
    %48 = vector.multi_reduction <add>, %47, %cst_23 [2] : vector<16x8x8xf32> to vector<16x8xf32>
    %49 = vector.shape_cast %48 : vector<16x8xf32> to vector<16x8x1xf32>
    %50 = tpu.reciprocal %49 : vector<16x8x1xf32> -> vector<16x8x1xf32>
    %51 = vector.broadcast %50 : vector<16x8x1xf32> to vector<16x8x8xf32>
    %52 = arith.mulf %47, %51 : vector<16x8x8xf32>
    %cst_24 = arith.constant dense<0.000000e+00> : vector<16x8x32xf32>
    %53 = tpu.matmul %52, %41, %cst_24 {dimension_numbers = #tpu.dot_dimension_numbers<[2], [1], [1], [2], [0, 0, 0, 1, 1, 2], [0], [0]>} : vector<16x8x8xf32>, vector<16x8x32xf32>, vector<16x8x32xf32> -> vector<16x8x32xf32>
    %54 = vector.shape_cast %53 : vector<16x8x32xf32> to vector<128x32xf32>
    %c0_25 = arith.constant 0 : index
    %c0_26 = arith.constant 0 : index
    %55 = vector.load %arg5[%c0_25, %c0_26] : memref<32x32xf32, #tpu.memory_space<vmem>>, vector<32x32xf32>
    %cst_27 = arith.constant dense<0.000000e+00> : vector<128x32xf32>
    %56 = tpu.matmul %54, %55, %cst_27 {dimension_numbers = #tpu.dot_dimension_numbers<[1], [0], [0], [1], [0, 0, 1, 1], [], []>} : vector<128x32xf32>, vector<32x32xf32>, vector<128x32xf32> -> vector<128x32xf32>
    %c0_28 = arith.constant 0 : index
    %c0_29 = arith.constant 0 : index
    %57 = vector.load %arg6[%c0_28, %c0_29] : memref<1x32xf32, #tpu.memory_space<vmem>>, vector<1x32xf32>
    %58 = vector.broadcast %57 : vector<1x32xf32> to vector<128x32xf32>
    %59 = arith.addf %56, %58 : vector<128x32xf32>
    %60 = vector.shape_cast %59 : vector<128x32xf32> to vector<16x8x32xf32>
    %61 = tpu.transpose %60, [1, 0, 2] : vector<16x8x32xf32> -> vector<8x16x32xf32>
    %62 = vector.shape_cast %61 : vector<8x16x32xf32> to vector<128x32xf32>
    %cst_30 = arith.constant dense<0.000000e+00> : vector<128xf32>
    %63 = vector.multi_reduction <add>, %62, %cst_30 [1] : vector<128x32xf32> to vector<128xf32>
    %64 = vector.shape_cast %63 : vector<128xf32> to vector<128x1xf32>
    %cst_31 = arith.constant 3.200000e+01 : f32
    %65 = vector.broadcast %cst_31 : f32 to vector<128x1xf32>
    %66 = arith.divf %64, %65 : vector<128x1xf32>
    %67 = vector.broadcast %66 : vector<128x1xf32> to vector<128x32xf32>
    %68 = arith.subf %62, %67 : vector<128x32xf32>
    %69 = vector.broadcast %66 : vector<128x1xf32> to vector<128x32xf32>
    %70 = arith.subf %62, %69 : vector<128x32xf32>
    %71 = arith.mulf %68, %70 : vector<128x32xf32>
    %cst_32 = arith.constant dense<0.000000e+00> : vector<128xf32>
    %72 = vector.multi_reduction <add>, %71, %cst_32 [1] : vector<128x32xf32> to vector<128xf32>
    %73 = vector.shape_cast %72 : vector<128xf32> to vector<128x1xf32>
    %cst_33 = arith.constant 3.200000e+01 : f32
    %74 = vector.broadcast %cst_33 : f32 to vector<128x1xf32>
    %75 = arith.divf %73, %74 : vector<128x1xf32>
    %76 = vector.broadcast %66 : vector<128x1xf32> to vector<128x32xf32>
    %77 = arith.subf %62, %76 : vector<128x32xf32>
    %cst_34 = arith.constant 9.99999974E-6 : f32
    %78 = vector.broadcast %cst_34 : f32 to vector<128x1xf32>
    %79 = arith.addf %75, %78 : vector<128x1xf32>
    %80 = math.rsqrt %79 : vector<128x1xf32>
    %81 = vector.broadcast %80 : vector<128x1xf32> to vector<128x32xf32>
    %82 = arith.mulf %77, %81 : vector<128x32xf32>
    %c0_35 = arith.constant 0 : index
    %c0_36 = arith.constant 0 : index
    %83 = vector.load %arg7[%c0_35, %c0_36] : memref<1x32xf32, #tpu.memory_space<vmem>>, vector<1x32xf32>
    %84 = vector.broadcast %83 : vector<1x32xf32> to vector<128x32xf32>
    %85 = arith.mulf %82, %84 : vector<128x32xf32>
    %c0_37 = arith.constant 0 : index
    %c0_38 = arith.constant 0 : index
    %86 = vector.load %arg8[%c0_37, %c0_38] : memref<1x32xf32, #tpu.memory_space<vmem>>, vector<1x32xf32>
    %87 = vector.broadcast %86 : vector<1x32xf32> to vector<128x32xf32>
    %88 = arith.addf %85, %87 : vector<128x32xf32>
    %c0_39 = arith.constant 0 : index
    %c0_40 = arith.constant 0 : index
    %c0_41 = arith.constant 0 : index
    %89 = vector.load %arg9[%c0_39, %c0_40, %c0_41] : memref<3x32x32xf32, #tpu.memory_space<vmem>>, vector<1x32x32xf32>
    %90 = vector.shape_cast %89 : vector<1x32x32xf32> to vector<32x32xf32>
    %cst_42 = arith.constant dense<0.000000e+00> : vector<128x32xf32>
    %91 = tpu.matmul %88, %90, %cst_42 {dimension_numbers = #tpu.dot_dimension_numbers<[1], [0], [0], [1], [0, 0, 1, 1], [], []>} : vector<128x32xf32>, vector<32x32xf32>, vector<128x32xf32> -> vector<128x32xf32>
    %c1_43 = arith.constant 1 : index
    %c0_44 = arith.constant 0 : index
    %c0_45 = arith.constant 0 : index
    %92 = vector.load %arg9[%c1_43, %c0_44, %c0_45] : memref<3x32x32xf32, #tpu.memory_space<vmem>>, vector<1x32x32xf32>
    %93 = vector.shape_cast %92 : vector<1x32x32xf32> to vector<32x32xf32>
    %cst_46 = arith.constant dense<0.000000e+00> : vector<128x32xf32>
    %94 = tpu.matmul %88, %93, %cst_46 {dimension_numbers = #tpu.dot_dimension_numbers<[1], [0], [0], [1], [0, 0, 1, 1], [], []>} : vector<128x32xf32>, vector<32x32xf32>, vector<128x32xf32> -> vector<128x32xf32>
    %c2_47 = arith.constant 2 : index
    %c0_48 = arith.constant 0 : index
    %c0_49 = arith.constant 0 : index
    %95 = vector.load %arg9[%c2_47, %c0_48, %c0_49] : memref<3x32x32xf32, #tpu.memory_space<vmem>>, vector<1x32x32xf32>
    %96 = vector.shape_cast %95 : vector<1x32x32xf32> to vector<32x32xf32>
    %cst_50 = arith.constant dense<0.000000e+00> : vector<128x32xf32>
    %97 = tpu.matmul %88, %96, %cst_50 {dimension_numbers = #tpu.dot_dimension_numbers<[1], [0], [0], [1], [0, 0, 1, 1], [], []>} : vector<128x32xf32>, vector<32x32xf32>, vector<128x32xf32> -> vector<128x32xf32>
    %98 = vector.shape_cast %91 : vector<128x32xf32> to vector<8x16x32xf32>
    %99 = vector.shape_cast %94 : vector<128x32xf32> to vector<8x16x32xf32>
    %100 = vector.shape_cast %97 : vector<128x32xf32> to vector<8x16x32xf32>
    %cst_51 = arith.constant dense<0.000000e+00> : vector<8x16x16xf32>
    %101 = tpu.matmul %98, %99, %cst_51 {dimension_numbers = #tpu.dot_dimension_numbers<[2], [2], [1], [1], [0, 0, 0, 1, 1, 1], [0], [0]>} : vector<8x16x32xf32>, vector<8x16x32xf32>, vector<8x16x16xf32> -> vector<8x16x16xf32>
    %cst_52 = arith.constant dense<0xFF800000> : vector<8x16xf32>
    %102 = vector.multi_reduction <maximumf>, %101, %cst_52 [2] : vector<8x16x16xf32> to vector<8x16xf32>
    %103 = vector.shape_cast %102 : vector<8x16xf32> to vector<8x16x1xf32>
    %104 = vector.broadcast %103 : vector<8x16x1xf32> to vector<8x16x16xf32>
    %105 = arith.subf %101, %104 : vector<8x16x16xf32>
    %106 = math.exp %105 : vector<8x16x16xf32>
    %cst_53 = arith.constant dense<0.000000e+00> : vector<8x16xf32>
    %107 = vector.multi_reduction <add>, %106, %cst_53 [2] : vector<8x16x16xf32> to vector<8x16xf32>
    %108 = vector.shape_cast %107 : vector<8x16xf32> to vector<8x16x1xf32>
    %109 = tpu.reciprocal %108 : vector<8x16x1xf32> -> vector<8x16x1xf32>
    %110 = vector.broadcast %109 : vector<8x16x1xf32> to vector<8x16x16xf32>
    %111 = arith.mulf %106, %110 : vector<8x16x16xf32>
    %cst_54 = arith.constant dense<0.000000e+00> : vector<8x16x32xf32>
    %112 = tpu.matmul %111, %100, %cst_54 {dimension_numbers = #tpu.dot_dimension_numbers<[2], [1], [1], [2], [0, 0, 0, 1, 1, 2], [0], [0]>} : vector<8x16x16xf32>, vector<8x16x32xf32>, vector<8x16x32xf32> -> vector<8x16x32xf32>
    %113 = vector.shape_cast %112 : vector<8x16x32xf32> to vector<128x32xf32>
    %c0_55 = arith.constant 0 : index
    %c0_56 = arith.constant 0 : index
    %114 = vector.load %arg10[%c0_55, %c0_56] : memref<32x32xf32, #tpu.memory_space<vmem>>, vector<32x32xf32>
    %cst_57 = arith.constant dense<0.000000e+00> : vector<128x32xf32>
    %115 = tpu.matmul %113, %114, %cst_57 {dimension_numbers = #tpu.dot_dimension_numbers<[1], [0], [0], [1], [0, 0, 1, 1], [], []>} : vector<128x32xf32>, vector<32x32xf32>, vector<128x32xf32> -> vector<128x32xf32>
    %c0_58 = arith.constant 0 : index
    %c0_59 = arith.constant 0 : index
    %116 = vector.load %arg11[%c0_58, %c0_59] : memref<1x32xf32, #tpu.memory_space<vmem>>, vector<1x32xf32>
    %117 = vector.broadcast %116 : vector<1x32xf32> to vector<128x32xf32>
    %118 = arith.addf %115, %117 : vector<128x32xf32>
    %119 = vector.shape_cast %118 : vector<128x32xf32> to vector<8x16x32xf32>
    %c0_60 = arith.constant 0 : index
    %c0_61 = arith.constant 0 : index
    %c0_62 = arith.constant 0 : index
    %c0_63 = arith.constant 0 : index
    %120 = vector.load %arg12[%c0_60, %c0_61, %c0_62, %c0_63] : memref<1x8x16x32xf32, #tpu.memory_space<vmem>>, vector<1x8x16x32xf32>
    %121 = vector.shape_cast %120 : vector<1x8x16x32xf32> to vector<8x16x32xf32>
    %122 = vector.shape_cast %119 : vector<8x16x32xf32> to vector<1x8x16x32xf32>
    tpu.vector_store %arg12[%c0_60, %c0_61, %c0_62, %c0_63], %122 {strides = array<i32>} : memref<1x8x16x32xf32, #tpu.memory_space<vmem>>, vector<1x8x16x32xf32>,
    return
  }
  func.func @transform_0(%arg0: i32) -> (i32, i32, i32, i32) {
    %c0_i32 = arith.constant 0 : i32
    %c0_i32_0 = arith.constant 0 : i32
    %c0_i32_1 = arith.constant 0 : i32
    %c0_i32_2 = arith.constant 0 : i32
    return %arg0, %c0_i32, %c0_i32_0, %c0_i32_1 : i32, i32, i32, i32
  }
  func.func @transform_1(%arg0: i32) -> (i32, i32) {
    %c0_i32 = arith.constant 0 : i32
    %c0_i32_0 = arith.constant 0 : i32
    %c0_i32_1 = arith.constant 0 : i32
    return %c0_i32, %c0_i32_0 : i32, i32
  }
  func.func @transform_2(%arg0: i32) -> (i32, i32) {
    %c0_i32 = arith.constant 0 : i32
    %c0_i32_0 = arith.constant 0 : i32
    %c0_i32_1 = arith.constant 0 : i32
    return %c0_i32, %c0_i32_0 : i32, i32
  }
  func.func @transform_3(%arg0: i32) -> (i32, i32, i32) {
    %c0_i32 = arith.constant 0 : i32
    %c0_i32_0 = arith.constant 0 : i32
    %c0_i32_1 = arith.constant 0 : i32
    %c0_i32_2 = arith.constant 0 : i32
    return %c0_i32, %c0_i32_0, %c0_i32_1 : i32, i32, i32
  }
  func.func @transform_4(%arg0: i32) -> (i32, i32) {
    %c0_i32 = arith.constant 0 : i32
    %c0_i32_0 = arith.constant 0 : i32
    %c0_i32_1 = arith.constant 0 : i32
    return %c0_i32, %c0_i32_0 : i32, i32
  }
  func.func @transform_5(%arg0: i32) -> (i32, i32) {
    %c0_i32 = arith.constant 0 : i32
    %c0_i32_0 = arith.constant 0 : i32
    %c0_i32_1 = arith.constant 0 : i32
    return %c0_i32, %c0_i32_0 : i32, i32
  }
  func.func @transform_6(%arg0: i32) -> (i32, i32) {
    %c0_i32 = arith.constant 0 : i32
    %c0_i32_0 = arith.constant 0 : i32
    %c0_i32_1 = arith.constant 0 : i32
    return %c0_i32, %c0_i32_0 : i32, i32
  }
  func.func @transform_7(%arg0: i32) -> (i32, i32) {
    %c0_i32 = arith.constant 0 : i32
    %c0_i32_0 = arith.constant 0 : i32
    %c0_i32_1 = arith.constant 0 : i32
    return %c0_i32, %c0_i32_0 : i32, i32
  }
  func.func @transform_8(%arg0: i32) -> (i32, i32, i32) {
    %c0_i32 = arith.constant 0 : i32
    %c0_i32_0 = arith.constant 0 : i32
    %c0_i32_1 = arith.constant 0 : i32
    %c0_i32_2 = arith.constant 0 : i32
    return %c0_i32, %c0_i32_0, %c0_i32_1 : i32, i32, i32
  }
  func.func @transform_9(%arg0: i32) -> (i32, i32) {
    %c0_i32 = arith.constant 0 : i32
    %c0_i32_0 = arith.constant 0 : i32
    %c0_i32_1 = arith.constant 0 : i32
    return %c0_i32, %c0_i32_0 : i32, i32
  }
  func.func @transform_10(%arg0: i32) -> (i32, i32) {
    %c0_i32 = arith.constant 0 : i32
    %c0_i32_0 = arith.constant 0 : i32
    %c0_i32_1 = arith.constant 0 : i32
    return %c0_i32, %c0_i32_0 : i32, i32
  }
  func.func @transform_11(%arg0: i32) -> (i32, i32, i32, i32) {
    %c0_i32 = arith.constant 0 : i32
    %c0_i32_0 = arith.constant 0 : i32
    %c0_i32_1 = arith.constant 0 : i32
    %c0_i32_2 = arith.constant 0 : i32
    return %arg0, %c0_i32, %c0_i32_0, %c0_i32_1 : i32, i32, i32, i32
  }
}

</mosaic_0001>

<bundles_post_ra>
// kernel: spatio_temporal_attention.1
= control target key start
LH: loop header
LB: loop body
LE: loop exit
PB: predicated region body
PF: predicated region fallthrough
CT: control target
= control target key end

     0   :  { %16 = vsyncpa [#allocation3], 0  ;;  %s10223_s0 = inlined_call_operand.vmem [shape: f32[2,8,16,32], index: 0, kind: input, shape index: {}]   ;;  %s10224_s1 = inlined_call_operand.vmem [shape: f32[1,32], index: 1, kind: input, shape index: {}]   ;;  %s10225_s2 = inlined_call_operand.vmem [shape: f32[1,32], index: 2, kind: input, shape index: {}]   ;;  %s10226_s3 = inlined_call_operand.vmem [shape: f32[3,32,32], index: 3, kind: input, shape index: {}]   ;;  %s10227_s4 = inlined_call_operand.vmem [shape: f32[32,32], index: 4, kind: input, shape index: {}]   ;;  %s10228_s5 = inlined_call_operand.vmem [shape: f32[1,32], index: 5, kind: input, shape index: {}]   ;;  %s10229_s6 = inlined_call_operand.vmem [shape: f32[1,32], index: 6, kind: input, shape index: {}]   ;;  %s10230_s7 = inlined_call_operand.vmem [shape: f32[1,32], index: 7, kind: input, shape index: {}]   ;;  %s10231_s8 = inlined_call_operand.vmem [shape: f32[3,32,32], index: 8, kind: input, shape index: {}]   ;;  %s10232_s9 = inlined_call_operand.vmem [shape: f32[32,32], index: 9, kind: input, shape index: {}]   ;;  %s10233_s10 = inlined_call_operand.vmem [shape: f32[1,32], index: 10, kind: input, shape index: {}]   ;;  %s10234_s11 = inlined_call_operand.hbm [shape: f32[2,8,16,32], index: 11, kind: output, shape index: {}]  }
   0x1   :  { %18 = vsyncpa [#allocation3 + $0x1], 0  ;;  %s8623_s17 = smov 0   ;;  %s8625_s18 = smov 0  }
   0x2   :  { %s8627_s19 = smov 0   ;;  %s8629_s20 = smov 0  }
   0x3 LB: > { %s8644_s21 = sadd.s32 4294967295, %s8554_s20   ;;  %s7031_s22 = sadd.s32 4294967294, %s8554_s20   ;;  %s8554_s20 = sphi %s8629_s20, %s10242_s20   ;;  %s8550_s19 = sphi %s8627_s19, %s10241_s19   ;;  %s8546_s18 = sphi %s8625_s18, %s10240_s18   ;;  %s8542_s17 = sphi %s8623_s17, %s10239_s17  }
   0x4   : > { %s8648_s23 = sadd.s32 1, %s8554_s20   ;;  %s267_s24 = sadd.s32 1, %s8550_s19 }
   0x5   : > { %s264_s25 = ssub.s32 %s8554_s20, %s8648_s23  ;;  %p277_p0 = scmp.ne.s32.totalorder %s8550_s19, %s8546_s18 }
   0x6   : > { %p265_p1 = scmp.eq.s32.totalorder %s264_s25, 0  ;;  %p278_p2 = scmp.eq.s32.totalorder %s8644_s21, 1 }
   0x7   : > { %p283_p3 = scmp.ne.s32.totalorder %s8546_s18, %s8542_s17  ;;  %p284_p4 = scmp.eq.s32.totalorder %s7031_s22, 1 }
   0x8   : > { %s8659_s26 = scalar_select %p265_p1, %s8550_s19, %s267_s24  }
   0x9   : > { %p8661_p5 = por %p278_p2, %p277_p0  ;;  %p8665_p6 = por %p284_p4, %p283_p3 }
   0xa   : > { %p7034_p7 = scmp.ge.s32.totalorder %s8554_s20, 1  ;;  %p340_p8 = scmp.lt.s32.totalorder %s8554_s20, 3 }
   0xc   : > { %p341_p9 = pnand %p7034_p7, %p340_p8 }
   0xd   : > { %p380_p10 = scmp.lt.s32.totalorder (!%p341_p9), %s8644_s21, 1  ;;  %v406_v0 = vlaneseq (!%p341_p9)  ;;  %v8556_v1 = vmov (!%p341_p9), 1983009808   ;;  %v8557_v3 = vmov (!%p341_p9), 1934713408   ;;  %vm673_vm0 = vcmask (!%p341_p9), 261120  }
   0xe   : > { %344 = sbr.rel (%p341_p9) target bundleno = 3131 (0xc3b), region = 64  ;;  %v404_v2 = vunpack.c.l.s4 (!%p341_p9), %v8556_v1  ;;  %v468_v4 = vunpack.c.l.s4 (!%p341_p9), %v8557_v3  ;;  %vm8559_vm1 = vmmov (!%p341_p9), 0   ;;  %vm2642_vm2 = vcmask (!%p341_p9), 64512   ;;  %vm9883_vm3 = vmpackc.low (!%p341_p9), %vm673_vm0, %vm673_vm0  ;;  %s377_s25 = sand.u32 (!%p341_p9), 1, %s8546_s18  }
   0xf   : > { %v407_v5 = vshrl.u32 (!%p341_p9), %v406_v0, 7  ;;  %vm5910_vm4 = vcmask (!%p341_p9), 130048  }
  0x10   : > { %v405_v6 = vunpack.c.0.s8 (!%p341_p9), %v404_v2  ;;  %v469_v7 = vunpack.c.0.s8 (!%p341_p9), %v468_v4 }
  0x12   : > { %v8678_v8 = vsub.s32 (!%p341_p9), %v405_v6, %v407_v5  ;;  %v8688_v19 = vsub.s32 (!%p341_p9), %v469_v7, %v407_v5 }
  0x15   : > { %s381_s29 = scalar_select %p380_p10, %s8644_s21, 1 }
  0x17   : > { %s7289_s30 = sshll.u32 %s381_s29, 7  ;;  %s7035_s29 = sshll.u32 %s377_s25, 7 }
  0x18   : > { %s8676_s14 = scalar_lea.vmem %s10223_s0, %s7289_s30  ;;  %s10137_s13 = scalar_lea.vmem [#allocation2], %s7035_s29 }
  0x19   : > { %v386_v9 = vld [vmem:[%s8676_s14 + $0x8] sm:$0xff]  ;;  %v388_v10 = vld [vmem:[%s8676_s14 + $0x18] sm:$0xff]  ;;  %v8691_v22 = vld [vmem:[%s8676_s14] sm:$0xff]  ;;  %s6969_s15 = sshll.u32 %s10137_s13, 4  ;;  %s8560_s30 = smov [#allocation2]   ;;  %s10174_s15 = int_to_ptr.vmem [resolvable:$true] %s6969_s15 }
  0x1a   : > { %v390_v11 = vld [vmem:[%s8676_s14 + $0x28] sm:$0xff]  ;;  %v392_v12 = vld [vmem:[%s8676_s14 + $0x38] sm:$0xff]  ;;  %v8696_v27 = vld [vmem:[%s8676_s14 + $0x10] sm:$0xff]  ;;  %s8492_s29 = scalar_lea.vmem %s10174_s15, 2048  ;;  %s8496_s12 = sshll.u32 %s8560_s30, 4  ;;  %s8497_s12 = int_to_ptr.vmem [resolvable:$false] %s8496_s12 }
  0x1b   : > { %v394_v13 = vld [vmem:[%s8676_s14 + $0x48] sm:$0xff]  ;;  %v396_v14 = vld [vmem:[%s8676_s14 + $0x58] sm:$0xff]  ;;  %v537_v15 = vcombine.low %v386_v9, %v390_v11  ;;  %v538_v16 = vcombine.high %v386_v9, %v390_v11  ;;  %v553_v20 = vcombine.low %v388_v10, %v392_v12  ;;  %v554_v21 = vcombine.high %v388_v10, %v392_v12  ;;  %v8699_v28 = vld [vmem:[%s8676_s14 + $0x20] sm:$0xff]  ;;  %p8493_p11 = scmp.ne.s32.totalorder %s10174_s15, %s8492_s29  ;;  %p8499_p0 = scmp.lt.s32.totalorder %s10174_s15, %s8497_s12 }
  0x1c   : > { %v398_v17 = vld [vmem:[%s8676_s14 + $0x68] sm:$0xff]  ;;  %v400_v18 = vld [vmem:[%s8676_s14 + $0x78] sm:$0xff]  ;;  %v8702_v29 = vld [vmem:[%s8676_s14 + $0x30] sm:$0xff]  ;;  %v401_v36 = vcombine.low %v8691_v22, %v8699_v28 }
  0x1d   : > { %v545_v23 = vrot.slane %v537_v15, %v8678_v8  ;;  %v569_v24 = vcombine.low %v394_v13, %v398_v17  ;;  %v585_v25 = vcombine.low %v396_v14, %v400_v18  ;;  %v552_v26 = vrot.slane %v538_v16, %v8678_v8  ;;  %v393_v62 = vld [vmem:[%s8676_s14 + $0x40] sm:$0xff]  ;;  %v395_v63 = vld [vmem:[%s8676_s14 + $0x50] sm:$0xff]  ;;  %p8494_p12 = pnand %p8493_p11, %p8661_p5 }
  0x1e   : > { %v561_v30 = vrot.slane %v553_v20, %v8678_v8  ;;  %v568_v31 = vrot.slane %v554_v21, %v8678_v8  ;;  %v570_v32 = vcombine.high %v394_v13, %v398_v17  ;;  %v586_v33 = vcombine.high %v396_v14, %v400_v18  ;;  %v397_v0 = vld [vmem:[%s8676_s14 + $0x60] sm:$0xff]  ;;  %v399_v1 = vld [vmem:[%s8676_s14 + $0x70] sm:$0xff]  ;;  %s7290_s14 = sshll.u32 %s8644_s21, 11  ;;  %s10182_s21 = scalar_lea.sflag [#allocation3], %s377_s25 }
  0x1f   : > { %v577_v34 = vrot.slane %v569_v24, %v8678_v8  ;;  %v593_v35 = vrot.slane %v585_v25, %v8678_v8  ;;  %v417_v37 = vcombine.low %v8696_v27, %v8702_v29  ;;  %v409_v56 = vrot.slane %v401_v36, %v8678_v8  ;;  %s10172_s24 = scalar_lea.hbm %s10234_s11, %s7290_s14  ;;  %p8495_p13 = pneg %p8494_p12 }
  0x20   : > { %v601_v38 = vcombine.low %v545_v23, %v561_v30  ;;  %v602_v39 = vcombine.high %v545_v23, %v561_v30  ;;  %v584_v40 = vrot.slane %v570_v32, %v8678_v8  ;;  %v600_v41 = vrot.slane %v586_v33, %v8678_v8  ;;  %s8498_s14 = scalar_lea.vmem %s8497_s12, 4096 }
  0x21   : > { %v633_v42 = vcombine.low %v577_v34, %v593_v35  ;;  %v634_v43 = vcombine.high %v577_v34, %v593_v35  ;;  %v617_v44 = vcombine.low %v552_v26, %v568_v31  ;;  %v618_v45 = vcombine.high %v552_v26, %v568_v31  ;;  %p8500_p1 = scmp.lt.s32.totalorder %s8498_s14, %s8492_s29 }
  0x22   : > { %v609_v46 = vrot.slane %v601_v38, %v8688_v19  ;;  %v616_v47 = vrot.slane %v602_v39, %v8688_v19  ;;  %v649_v48 = vcombine.low %v584_v40, %v600_v41  ;;  %v650_v49 = vcombine.high %v584_v40, %v600_v41 }
  0x23   : > { %v641_v50 = vrot.slane %v633_v42, %v8688_v19  ;;  %v648_v51 = vrot.slane %v634_v43, %v8688_v19  ;;  %v625_v52 = vrot.slane %v617_v44, %v8688_v19  ;;  %v632_v53 = vrot.slane %v618_v45, %v8688_v19  ;;  %p8501_p2 = por %p8500_p1, %p8499_p0 }
  0x24   : > { %v657_v54 = vrot.slane %v649_v48, %v8688_v19  ;;  %v664_v55 = vrot.slane %v650_v49, %v8688_v19  ;;  %v425_v57 = vrot.slane %v417_v37, %v8678_v8  ;;  %v433_v11 = vcombine.low %v393_v62, %v397_v0 }
  0x25   : > { %v8724_v58 = vcombine.low %v609_v46, %v641_v50  ;;  %v8726_v59 = vcombine.low %v616_v47, %v648_v51  ;;  %v8728_v60 = vcombine.high %v609_v46, %v641_v50  ;;  %v8730_v61 = vcombine.high %v616_v47, %v648_v51  ;;  %p8502_p3 = pnand %p8501_p2, %p8495_p13 }
  0x26   : > { %v8740_v4 = vcombine.low %v625_v52, %v657_v54  ;;  %v8744_v6 = vcombine.high %v625_v52, %v657_v54  ;;  %v8746_v7 = vcombine.low %v632_v53, %v664_v55  ;;  %v8748_v9 = vcombine.high %v632_v53, %v664_v55 }
  0x27   : > { %v698_v2 = vsel %vm673_vm0, %v8724_v58, 0.0  ;;  %v704_v3 = vsel %vm673_vm0, %v8726_v59, 0.0  ;;  %v701_v5 = vsel %vm673_vm0, %v8728_v60, 0.0  ;;  %v707_v10 = vsel %vm673_vm0, %v8730_v61, 0.0 }
  0x28   : > { %699 = vadd.xlane.f32.xlu0 %v698_v2  ;;  %705 = vadd.xlane.f32.xlu1 %v704_v3  ;;  %v449_v12 = vcombine.low %v395_v63, %v399_v1  ;;  %v465_v13 = vcombine.low %v409_v56, %v425_v57  ;;  %v402_v14 = vcombine.high %v8691_v22, %v8699_v28  ;;  %v710_v18 = vsel %vm673_vm0, %v8740_v4, 0.0 }
  0x29   : > { %v418_v15 = vcombine.high %v8696_v27, %v8702_v29  ;;  %v434_v16 = vcombine.high %v393_v62, %v397_v0  ;;  %v450_v17 = vcombine.high %v395_v63, %v399_v1  ;;  %v441_v20 = vrot.slane %v433_v11, %v8678_v8 }
  0x2a   : > { %v457_v21 = vrot.slane %v449_v12, %v8678_v8  ;;  %v466_v23 = vcombine.high %v409_v56, %v425_v57  ;;  %v713_v24 = vsel %vm673_vm0, %v8744_v6, 0.0  ;;  %v473_v22 = vrot.slane %v465_v13, %v8688_v19 }
  0x2b   : > { %v416_v25 = vrot.slane %v402_v14, %v8678_v8  ;;  %v432_v26 = vrot.slane %v418_v15, %v8678_v8  ;;  %v448_v29 = vrot.slane %v434_v16, %v8678_v8  ;;  %v464_v30 = vrot.slane %v450_v17, %v8678_v8 }
  0x2c   : > { %702 = vadd.xlane.f32.xlu0 %v701_v5  ;;  %708 = vadd.xlane.f32.xlu1 %v707_v10  ;;  %v497_v27 = vcombine.low %v441_v20, %v457_v21  ;;  %v498_v28 = vcombine.high %v441_v20, %v457_v21  ;;  %v716_v32 = vsel %vm673_vm0, %v8746_v7, 0.0  ;;  %v480_v33 = vrot.slane %v466_v23, %v8688_v19 }
  0x2d   : > { %v481_v35 = vcombine.low %v416_v25, %v432_v26  ;;  %v719_v36 = vsel %vm673_vm0, %v8748_v9, 0.0  ;;  %v513_v39 = vcombine.low %v448_v29, %v464_v30  ;;  %v482_v40 = vcombine.high %v416_v25, %v432_v26 }
  0x2e   : > { %v505_v31 = vrot.slane %v497_v27, %v8688_v19  ;;  %v512_v34 = vrot.slane %v498_v28, %v8688_v19  ;;  %v514_v43 = vcombine.high %v448_v29, %v464_v30 }
  0x2f   : > { %v489_v42 = vrot.slane %v481_v35, %v8688_v19  ;;  %v521_v47 = vrot.slane %v513_v39, %v8688_v19  ;;  %v496_v48 = vrot.slane %v482_v40, %v8688_v19 }
  0x30   : > { %711 = vadd.xlane.f32.xlu0 %v710_v18  ;;  %714 = vadd.xlane.f32.xlu1 %v713_v24  ;;  %v8774_v37 = vcombine.low %v473_v22, %v505_v31  ;;  %v8776_v38 = vcombine.high %v473_v22, %v505_v31  ;;  %v8778_v41 = vcombine.low %v480_v33, %v512_v34 }
  0x31   : > { %v8785_v46 = vcombine.high %v480_v33, %v512_v34  ;;  %v528_v49 = vrot.slane %v514_v43, %v8688_v19  ;;  %v8794_v52 = vcombine.low %v489_v42, %v521_v47  ;;  %v8796_v53 = vcombine.high %v489_v42, %v521_v47 }
  0x32   : > { %v674_v44 = vsel %vm673_vm0, %v8774_v37, 0.0  ;;  %v677_v45 = vsel %vm673_vm0, %v8776_v38, 0.0  ;;  %v680_v50 = vsel %vm673_vm0, %v8778_v41, 0.0 }
  0x33   : > { %v683_v51 = vsel %vm673_vm0, %v8785_v46, 0.0  ;;  %v686_v54 = vsel %vm673_vm0, %v8794_v52, 0.0  ;;  %v689_v55 = vsel %vm673_vm0, %v8796_v53, 0.0  ;;  %v8802_v56 = vcombine.low %v496_v48, %v528_v49 }
  0x34   : > { %717 = vadd.xlane.f32.xlu0 %v716_v32  ;;  %720 = vadd.xlane.f32.xlu1 %v719_v36  ;;  %v8804_v57 = vcombine.high %v496_v48, %v528_v49 }
  0x35   : > { %v692_v62 = vsel %vm673_vm0, %v8802_v56, 0.0 }
  0x36   : > { %v695_v63 = vsel %vm673_vm0, %v8804_v57, 0.0 }
  0x38   : > { %675 = vadd.xlane.f32.xlu0 %v674_v44  ;;  %678 = vadd.xlane.f32.xlu1 %v677_v45 }
  0x3c   : > { %681 = vadd.xlane.f32.xlu0 %v680_v50  ;;  %684 = vadd.xlane.f32.xlu1 %v683_v51 }
  0x40   : > { %687 = vadd.xlane.f32.xlu0 %v686_v54  ;;  %690 = vadd.xlane.f32.xlu1 %v689_v55 }
  0x44   : > { %693 = vadd.xlane.f32.xlu0 %v692_v62  ;;  %696 = vadd.xlane.f32.xlu1 %v695_v63 }
  0xb5   : > { %v700_v0 = vpop.xlane.xlu0 %699  ;;  %v706_v1 = vpop.xlane.xlu1 %705 }
  0xb6   : > { %v731_v2 = vmul.f32 0.03125, %v700_v0  ;;  %v733_v3 = vmul.f32 0.03125, %v706_v1 }
  0xb8   : > { %v8811_v5 = vsub.f32 %v8724_v58, %v731_v2  ;;  %v8814_v10 = vsub.f32 %v8726_v59, %v733_v3 }
  0xb9   : > { %v703_v11 = vpop.xlane.xlu0 %702  ;;  %v709_v12 = vpop.xlane.xlu1 %708 }
  0xba   : > { %v732_v13 = vmul.f32 0.03125, %v703_v11  ;;  %v734_v14 = vmul.f32 0.03125, %v709_v12  ;;  %v763_v15 = vmul.f32 %v8811_v5, %v8811_v5  ;;  %v765_v16 = vmul.f32 %v8814_v10, %v8814_v10 }
  0xbc   : > { %v8821_v17 = vsub.f32 %v8728_v60, %v732_v13  ;;  %v8824_v18 = vsub.f32 %v8730_v61, %v734_v14  ;;  %v795_v58 = vsel %vm673_vm0, %v763_v15, 0.0  ;;  %v801_v21 = vsel %vm673_vm0, %v765_v16, 0.0 }
  0xbd   : > { %v712_v59 = vpop.xlane.xlu0 %711  ;;  %796 = vadd.xlane.f32.xlu0 %v795_v58  ;;  %v715_v20 = vpop.xlane.xlu1 %714 }
  0xbe   : > { %v735_v23 = vmul.f32 0.03125, %v712_v59  ;;  %v736_v24 = vmul.f32 0.03125, %v715_v20  ;;  %v764_v22 = vmul.f32 %v8821_v17, %v8821_v17  ;;  %v766_v25 = vmul.f32 %v8824_v18, %v8824_v18 }
  0xc0   : > { %v8833_v60 = vsub.f32 %v8740_v4, %v735_v23  ;;  %v8836_v61 = vsub.f32 %v8744_v6, %v736_v24  ;;  %v798_v26 = vsel %vm673_vm0, %v764_v22, 0.0  ;;  %v804_v29 = vsel %vm673_vm0, %v766_v25, 0.0 }
  0xc1   : > { %v718_v27 = vpop.xlane.xlu0 %717  ;;  %799 = vadd.xlane.f32.xlu1 %v798_v26  ;;  %802 = vadd.xlane.f32.xlu0 %v801_v21  ;;  %v721_v28 = vpop.xlane.xlu1 %720 }
  0xc2   : > { %v737_v30 = vmul.f32 0.03125, %v718_v27  ;;  %v738_v31 = vmul.f32 0.03125, %v721_v28  ;;  %v767_v32 = vmul.f32 %v8833_v60, %v8833_v60  ;;  %v768_v4 = vmul.f32 %v8836_v61, %v8836_v61  ;;  %v930_v27 = vld [vmem:[%s10226_s3 + $0x8] sm:$0xff] }
  0xc4   : > { %v8845_v33 = vsub.f32 %v8746_v7, %v737_v30  ;;  %v8848_v6 = vsub.f32 %v8748_v9, %v738_v31  ;;  %v807_v34 = vsel %vm673_vm0, %v767_v32, 0.0  ;;  %v810_v36 = vsel %vm673_vm0, %v768_v4, 0.0  ;;  %v932_v30 = vld [vmem:[%s10226_s3 + $0x18] sm:$0xff]  ;;  %v7056_v32 = vld [vmem:[%s10226_s3 + $0x20] sm:$0xff]  ;;  %v7057_v4 = vld [vmem:[%s10226_s3 + $0x28] sm:$0xff] }
  0xc5   : > { %805 = vadd.xlane.f32.xlu1 %v804_v29  ;;  %808 = vadd.xlane.f32.xlu0 %v807_v34  ;;  %v676_v35 = vpop.xlane.xlu0 %675  ;;  %v679_v39 = vpop.xlane.xlu1 %678  ;;  %v931_v29 = vld [vmem:[%s10226_s3 + $0x10] sm:$0xff]  ;;  %v8924_v34 = vpack.c.bf16 %v7057_v4, %v7056_v32  ;;  %v7059_v4 = vld [vmem:[%s10226_s3 + $0x38] sm:$0xff] }
  0xc6   : > { %v723_v40 = vmul.f32 0.03125, %v676_v35  ;;  %v724_v42 = vmul.f32 0.03125, %v679_v39  ;;  %v769_v43 = vmul.f32 %v8845_v33, %v8845_v33  ;;  %v770_v7 = vmul.f32 %v8848_v6, %v8848_v6  ;;  %v7076_v35 = vld [vmem:[%s10226_s3 + $0x40] sm:$0xff]  ;;  %v7058_v32 = vld [vmem:[%s10226_s3 + $0x30] sm:$0xff] }
  0xc7   : > { %v8111_v31 = vpack.c.bf16 %v932_v30, %v931_v29 }
  0xc8   : > { %v8857_v44 = vsub.f32 %v8774_v37, %v723_v40  ;;  %v8860_v9 = vsub.f32 %v8776_v38, %v724_v42  ;;  %v813_v45 = vsel %vm673_vm0, %v769_v43, 0.0  ;;  %v816_v48 = vsel %vm673_vm0, %v770_v7, 0.0 }
  0xc9   : > { %811 = vadd.xlane.f32.xlu1 %v810_v36  ;;  %814 = vadd.xlane.f32.xlu0 %v813_v45  ;;  %v682_v47 = vpop.xlane.xlu0 %681  ;;  %v685_v49 = vpop.xlane.xlu1 %684  ;;  %v7077_v36 = vld [vmem:[%s10226_s3 + $0x48] sm:$0xff] }
  0xca   : > { %v725_v50 = vmul.f32 0.03125, %v682_v47  ;;  %v726_v51 = vmul.f32 0.03125, %v685_v49  ;;  %v755_v54 = vmul.f32 %v8857_v44, %v8857_v44  ;;  %v756_v37 = vmul.f32 %v8860_v9, %v8860_v9 }
  0xcb   : > { %v8933_v39 = vpack.c.bf16 %v7077_v36, %v7076_v35 }
  0xcc   : > { %v8869_v55 = vsub.f32 %v8778_v41, %v725_v50  ;;  %v8872_v38 = vsub.f32 %v8785_v46, %v726_v51  ;;  %v771_v62 = vsel %vm673_vm0, %v755_v54, 0.0  ;;  %v774_v0 = vsel %vm673_vm0, %v756_v37, 0.0 }
  0xcd   : > { %817 = vadd.xlane.f32.xlu1 %v816_v48  ;;  %772 = vadd.xlane.f32.xlu0 %v771_v62  ;;  %v688_v63 = vpop.xlane.xlu0 %687  ;;  %v691_v1 = vpop.xlane.xlu1 %690 }
  0xce   : > { %v727_v2 = vmul.f32 0.03125, %v688_v63  ;;  %v728_v3 = vmul.f32 0.03125, %v691_v1  ;;  %v757_v11 = vmul.f32 %v8869_v55, %v8869_v55  ;;  %v758_v41 = vmul.f32 %v8872_v38, %v8872_v38 }
  0xd0   : > { %v8881_v12 = vsub.f32 %v8794_v52, %v727_v2  ;;  %v8884_v46 = vsub.f32 %v8796_v53, %v728_v3  ;;  %v777_v13 = vsel %vm673_vm0, %v757_v11, 0.0  ;;  %v780_v15 = vsel %vm673_vm0, %v758_v41, 0.0 }
  0xd1   : > { %775 = vadd.xlane.f32.xlu1 %v774_v0  ;;  %778 = vadd.xlane.f32.xlu0 %v777_v13  ;;  %v694_v14 = vpop.xlane.xlu0 %693  ;;  %v697_v16 = vpop.xlane.xlu1 %696 }
  0xd2   : > { %v729_v58 = vmul.f32 0.03125, %v694_v14  ;;  %v730_v59 = vmul.f32 0.03125, %v697_v16  ;;  %v759_v20 = vmul.f32 %v8881_v12, %v8881_v12  ;;  %v760_v52 = vmul.f32 %v8884_v46, %v8884_v46 }
  0xd4   : > { %v8893_v21 = vsub.f32 %v8802_v56, %v729_v58  ;;  %v8896_v53 = vsub.f32 %v8804_v57, %v730_v59  ;;  %v783_v23 = vsel %vm673_vm0, %v759_v20, 0.0  ;;  %v786_v24 = vsel %vm673_vm0, %v760_v52, 0.0  ;;  %v929_v57 = vld [vmem:[%s10226_s3] sm:$0xff] }
  0xd5   : > { %781 = vadd.xlane.f32.xlu1 %v780_v15  ;;  %784 = vadd.xlane.f32.xlu0 %v783_v23  ;;  %v8107_v28 = vpack.c.bf16 %v930_v27, %v929_v57  ;;  %v8939_v15 = vld [vmem:[%s10224_s1] ss:$0 sm:$0xff] }
  0xd6   : > { %v761_v22 = vmul.f32 %v8893_v21, %v8893_v21  ;;  %v762_v25 = vmul.f32 %v8896_v53, %v8896_v53  ;;  %v8945_v23 = vld [vmem:[%s10225_s2] ss:$0 sm:$0xff] }
  0xd7   : > { %8251 = vmatprep.subr.bf16.mxu1 %v8107_v28  ;;  %8108 = vmatprep.subr.bf16.mxu0 %v8107_v28 }
  0xd8   : > { %v789_v26 = vsel %vm673_vm0, %v761_v22, 0.0  ;;  %v792_v56 = vsel %vm673_vm0, %v762_v25, 0.0  ;;  %8253 = vmatpush3.bf16.msra.mxu1 %v8107_v28  ;;  %8110 = vmatpush3.bf16.msra.mxu0 %v8107_v28 }
  0xd9   : > { %787 = vadd.xlane.f32.xlu1 %v786_v24  ;;  %790 = vadd.xlane.f32.xlu0 %v789_v26 }
  0xda   : > { %8252 = vmatprep.subr.bf16.mxu1 %v8111_v31  ;;  %8112 = vmatprep.subr.bf16.mxu0 %v8111_v31 }
  0xdc   : > { %8254 = vmatpush3.bf16.msra.mxu1 %v8111_v31  ;;  %8114 = vmatpush3.bf16.msra.mxu0 %v8111_v31 }
  0xdd   : > { %793 = vadd.xlane.f32.xlu1 %v792_v56  ;;  %8116 = vmatprep.subr.bf16.mxu1 %v8924_v34 }
  0xde   : > { %8124 = vmatprep.subr.bf16.mxu0 %v8933_v39 }
 0x14a   : > { %v797_v40 = vpop.xlane.xlu0 %796 }
 0x14b   : > { %v827_v42 = vmul.f32 0.03125, %v797_v40 }
 0x14d   : > { %v843_v43 = vadd.f32 1e-05, %v827_v42 }
 0x14e   : > { %v800_v7 = vpop.xlane.xlu1 %799  ;;  %v803_v45 = vpop.xlane.xlu0 %802 }
 0x14f   : > { %8300 = vrsqrt.f32 %v843_v43  ;;  %v828_v47 = vmul.f32 0.03125, %v800_v7  ;;  %v829_v48 = vmul.f32 0.03125, %v803_v45 }
 0x151   : > { %v844_v49 = vadd.f32 1e-05, %v828_v47  ;;  %v845_v50 = vadd.f32 1e-05, %v829_v48  ;;  %v8119_v48 = vpack.c.bf16 %v7059_v4, %v7058_v32 }
 0x152   : > { %v806_v51 = vpop.xlane.xlu1 %805  ;;  %v809_v54 = vpop.xlane.xlu0 %808 }
 0x153   : > { %8302 = vrsqrt.f32 %v844_v49  ;;  %v830_v37 = vmul.f32 0.03125, %v806_v51  ;;  %v831_v62 = vmul.f32 0.03125, %v809_v54 }
 0x154   : > { %8304 = vrsqrt.f32 %v845_v50 }
 0x155   : > { %v846_v63 = vadd.f32 1e-05, %v830_v37  ;;  %v847_v0 = vadd.f32 1e-05, %v831_v62 }
 0x156   : > { %v812_v1 = vpop.xlane.xlu1 %811  ;;  %v815_v2 = vpop.xlane.xlu0 %814 }
 0x157   : > { %8306 = vrsqrt.f32 %v846_v63  ;;  %v832_v3 = vmul.f32 0.03125, %v812_v1  ;;  %v833_v11 = vmul.f32 0.03125, %v815_v2 }
 0x158   : > { %8308 = vrsqrt.f32 %v847_v0 }
 0x159   : > { %v8301_v41 = vpop.eup %8300  ;;  %v848_v13 = vadd.f32 1e-05, %v832_v3  ;;  %v849_v14 = vadd.f32 1e-05, %v833_v11 }
 0x15a   : > { %v818_v16 = vpop.xlane.xlu1 %817  ;;  %v773_v58 = vpop.xlane.xlu0 %772  ;;  %v875_v59 = vmul.f32 %v8301_v41, %v8811_v5 }
 0x15b   : > { %8310 = vrsqrt.f32 %v848_v13  ;;  %v834_v20 = vmul.f32 0.03125, %v818_v16  ;;  %v819_v52 = vmul.f32 0.03125, %v773_v58 }
 0x15c   : > { %8312 = vrsqrt.f32 %v849_v14  ;;  %v898_v24 = vmul.f32 %v8939_v15, %v875_v59 }
 0x15d   : > { %v8303_v22 = vpop.eup %8302  ;;  %v850_v25 = vadd.f32 1e-05, %v834_v20  ;;  %v835_v26 = vadd.f32 1e-05, %v819_v52 }
 0x15e   : > { %v8305_v56 = vpop.eup %8304  ;;  %v776_v57 = vpop.xlane.xlu1 %775  ;;  %v8949_v28 = vadd.f32 %v8945_v23, %v898_v24  ;;  %v876_v5 = vmul.f32 %v8303_v22, %v8821_v17 }
 0x15f   : > { %v779_v27 = vpop.xlane.xlu0 %778  ;;  %8314 = vrsqrt.f32 %v850_v25  ;;  %v820_v29 = vmul.f32 0.03125, %v776_v57  ;;  %v877_v31 = vmul.f32 %v8305_v56, %v8814_v10 }
 0x160   : > { %v821_v30 = vmul.f32 0.03125, %v779_v27  ;;  %8316 = vrsqrt.f32 %v835_v26  ;;  %7599 = vmatprep.mubr.msk.f32.mxu1 %vm673_vm0, %v8949_v28  ;;  %v899_v35 = vmul.f32 %v8939_v15, %v876_v5 }
 0x161   : > { %v8307_v17 = vpop.eup %8306  ;;  %v836_v36 = vadd.f32 1e-05, %v820_v29  ;;  %v900_v42 = vmul.f32 %v8939_v15, %v877_v31 }
 0x162   : > { %v837_v40 = vadd.f32 1e-05, %v821_v30  ;;  %v8309_v10 = vpop.eup %8308  ;;  %v782_v43 = vpop.xlane.xlu1 %781  ;;  %v8964_v45 = vadd.f32 %v8945_v23, %v899_v35  ;;  %v878_v47 = vmul.f32 %v8307_v17, %v8824_v18  ;;  %v7078_v35 = vld [vmem:[%s10226_s3 + $0x50] sm:$0xff]  ;;  %v7079_v17 = vld [vmem:[%s10226_s3 + $0x58] sm:$0xff] }
 0x163   : > { %v785_v7 = vpop.xlane.xlu0 %784  ;;  %8318 = vrsqrt.f32 %v836_v36  ;;  %v822_v49 = vmul.f32 0.03125, %v782_v43  ;;  %v8968_v51 = vadd.f32 %v8945_v23, %v900_v42  ;;  %v879_v37 = vmul.f32 %v8309_v10, %v8833_v60 }
 0x164   : > { %v823_v50 = vmul.f32 0.03125, %v785_v7  ;;  %8320 = vrsqrt.f32 %v837_v40  ;;  %7600 = vmatmul.mubr.msk.f32.vlgmr.msra.gmra.mrb[0].mxu1 %vm673_vm0, %v8964_v45  ;;  %v901_v54 = vmul.f32 %v8939_v15, %v878_v47  ;;  %v8127_v7 = vpack.c.bf16 %v7079_v17, %v7078_v35 }
 0x165   : > { %v8311_v62 = vpop.eup %8310  ;;  %v838_v63 = vadd.f32 1e-05, %v822_v49  ;;  %7602 = vmatprep.mubr.msk.f32.mxu1 %vm673_vm0, %v8968_v51  ;;  %8118 = vmatpush3.bf16.msra.mxu1 %v8924_v34  ;;  %v902_v11 = vmul.f32 %v8939_v15, %v879_v37 }
 0x166   : > { %v839_v0 = vadd.f32 1e-05, %v823_v50  ;;  %v8313_v18 = vpop.eup %8312  ;;  %v788_v1 = vpop.xlane.xlu1 %787  ;;  %v8978_v3 = vadd.f32 %v8945_v23, %v901_v54  ;;  %v880_v41 = vmul.f32 %v8311_v62, %v8836_v61  ;;  %8120 = vmatprep.subr.bf16.mxu1 %v8119_v48 }
 0x167   : > { %v791_v2 = vpop.xlane.xlu0 %790  ;;  %8322 = vrsqrt.f32 %v838_v63  ;;  %v824_v60 = vmul.f32 0.03125, %v788_v1  ;;  %v881_v14 = vmul.f32 %v8313_v18, %v8845_v33  ;;  %v8986_v34 = vadd.f32 %v8945_v23, %v902_v11 }
 0x168   : > { %v825_v13 = vmul.f32 0.03125, %v791_v2  ;;  %8324 = vrsqrt.f32 %v839_v0  ;;  %7603 = vmatmul.mubr.msk.f32.gmra.mrb[2].mxu1 %vm673_vm0, %v8978_v3  ;;  %v903_v16 = vmul.f32 %v8939_v15, %v880_v41 }
 0x169   : > { %v8315_v58 = vpop.eup %8314  ;;  %v840_v59 = vadd.f32 1e-05, %v824_v60  ;;  %v904_v61 = vmul.f32 %v8939_v15, %v881_v14  ;;  %8122 = vmatpush3.bf16.msra.mxu1 %v8119_v48  ;;  %7605 = vmatprep.mubr.msk.f32.mxu1 %vm673_vm0, %v8986_v34 }
 0x16a   : > { %v841_v20 = vadd.f32 1e-05, %v825_v13  ;;  %v8317_v52 = vpop.eup %8316  ;;  %v794_v33 = vpop.xlane.xlu1 %793  ;;  %v8993_v24 = vadd.f32 %v8945_v23, %v903_v16  ;;  %v882_v22 = vmul.f32 %v8315_v58, %v8848_v6 }
 0x16b   : > { %8326 = vrsqrt.f32 %v840_v59  ;;  %v826_v25 = vmul.f32 0.03125, %v794_v33  ;;  %v8997_v26 = vadd.f32 %v8945_v23, %v904_v61  ;;  %v867_v56 = vmul.f32 %v8317_v52, %v8857_v44 }
 0x16c   : > { %8328 = vrsqrt.f32 %v841_v20  ;;  %7606 = vmatmul.mubr.msk.f32.gmra.mrb[4].mxu1 %vm673_vm0, %v8993_v24  ;;  %v905_v57 = vmul.f32 %v8939_v15, %v882_v22 }
 0x16d   : > { %v8319_v27 = vpop.eup %8318  ;;  %v842_v5 = vadd.f32 1e-05, %v826_v25  ;;  %7608 = vmatprep.mubr.msk.f32.mxu1 %vm673_vm0, %v8997_v26  ;;  %v890_v6 = vmul.f32 %v8939_v15, %v867_v56 }
 0x16e   : > { %v8321_v29 = vpop.eup %8320  ;;  %v9007_v30 = vadd.f32 %v8945_v23, %v905_v57  ;;  %v868_v31 = vmul.f32 %v8319_v27, %v8860_v9 }
 0x16f   : > { %8330 = vrsqrt.f32 %v842_v5  ;;  %v913_v44 = vadd.f32 %v8945_v23, %v890_v6  ;;  %v869_v32 = vmul.f32 %v8321_v29, %v8869_v55 }
 0x170   : > { %7609 = vmatmul.mubr.msk.f32.gmra.mrb[6].mxu1 %vm673_vm0, %v9007_v30  ;;  %v891_v4 = vmul.f32 %v8939_v15, %v868_v31 }
 0x171   : > { %v8323_v36 = vpop.eup %8322  ;;  %7587 = vmatprep.mubr.msk.f32.mxu0 %vm673_vm0, %v913_v44  ;;  %7619 = vmatprep.mubr.msk.f32.mxu1 %vm673_vm0, %v913_v44  ;;  %v892_v9 = vmul.f32 %v8939_v15, %v869_v32 }
 0x172   : > { %v8325_v55 = vpop.eup %8324  ;;  %v914_v40 = vadd.f32 %v8945_v23, %v891_v4  ;;  %v870_v42 = vmul.f32 %v8323_v36, %v8872_v38 }
 0x173   : > { %v915_v10 = vadd.f32 %v8945_v23, %v892_v9  ;;  %v871_v43 = vmul.f32 %v8325_v55, %v8881_v12 }
 0x174   : > { %7588 = vmatmul.mubr.msk.f32.vlgmr.msra.gmra.mrb[0].mxu0 %vm673_vm0, %v914_v40  ;;  %7620 = vmatmul.mubr.msk.f32.vlgmr.msra.gmra.mrb[8].mxu1 %vm673_vm0, %v914_v40  ;;  %v893_v47 = vmul.f32 %v8939_v15, %v870_v42 }
 0x175   : > { %v8327_v48 = vpop.eup %8326  ;;  %7590 = vmatprep.mubr.msk.f32.mxu0 %vm673_vm0, %v915_v10  ;;  %7622 = vmatprep.mubr.msk.f32.mxu1 %vm673_vm0, %v915_v10  ;;  %v894_v49 = vmul.f32 %v8939_v15, %v871_v43 }
 0x176   : > { %v8329_v50 = vpop.eup %8328  ;;  %v916_v38 = vadd.f32 %v8945_v23, %v893_v47  ;;  %v872_v54 = vmul.f32 %v8327_v48, %v8884_v46  ;;  %8126 = vmatpush3.bf16.msra.mxu0 %v8933_v39 }
 0x177   : > { %v917_v12 = vadd.f32 %v8945_v23, %v894_v49  ;;  %v873_v37 = vmul.f32 %v8329_v50, %v8893_v21  ;;  %8128 = vmatprep.subr.bf16.mxu0 %v8127_v7 }
 0x178   : > { %7591 = vmatmul.mubr.msk.f32.gmra.mrb[2].mxu0 %vm673_vm0, %v916_v38  ;;  %7623 = vmatmul.mubr.msk.f32.gmra.mrb[10].mxu1 %vm673_vm0, %v916_v38  ;;  %v895_v62 = vmul.f32 %v8939_v15, %v872_v54 }
 0x179   : > { %v8331_v63 = vpop.eup %8330  ;;  %7593 = vmatprep.mubr.msk.f32.mxu0 %vm673_vm0, %v917_v12  ;;  %7625 = vmatprep.mubr.msk.f32.mxu1 %vm673_vm0, %v917_v12  ;;  %v896_v46 = vmul.f32 %v8939_v15, %v873_v37 }
 0x17a   : > { %v918_v39 = vadd.f32 %v8945_v23, %v895_v62  ;;  %v874_v0 = vmul.f32 %v8331_v63, %v8896_v53  ;;  %8130 = vmatpush3.bf16.msra.mxu0 %v8127_v7  ;;  %v8558_v53 = vmov 0.0  }
 0x17b   : > { %v919_v21 = vadd.f32 %v8945_v23, %v896_v46  ;;  %7675 = vmatprep.subr.mxu1 %v8558_v53  ;;  %7715 = vmatprep.subr.mxu0 %v8558_v53 }
 0x17c   : > { %7594 = vmatmul.mubr.msk.f32.gmra.mrb[4].mxu0 %vm673_vm0, %v918_v39  ;;  %7626 = vmatmul.mubr.msk.f32.gmra.mrb[12].mxu1 %vm673_vm0, %v918_v39  ;;  %v897_v18 = vmul.f32 %v8939_v15, %v874_v0 }
 0x17d   : > { %7596 = vmatprep.mubr.msk.f32.mxu0 %vm673_vm0, %v919_v21  ;;  %7628 = vmatprep.mubr.msk.f32.mxu1 %vm673_vm0, %v919_v21 }
 0x17e   : > { %v920_v1 = vadd.f32 %v8945_v23, %v897_v18 }
 0x180   : > { %7597 = vmatmul.mubr.msk.f32.gmra.mrb[6].mxu0 %vm673_vm0, %v920_v1  ;;  %7629 = vmatmul.mubr.msk.f32.gmra.mrb[14].mxu1 %vm673_vm0, %v920_v1 }
 0x181   : > { %7631 = vmatprep.mubr.msk.f32.mxu1 %vm673_vm0, %v8949_v28  ;;  %7651 = vmatprep.mubr.msk.f32.mxu0 %vm673_vm0, %v913_v44 }
 0x184   : > { %7632 = vmatmul.mubr.msk.f32.gmra.mrb[16].mxu1 %vm673_vm0, %v8964_v45  ;;  %7652 = vmatmul.mubr.msk.f32.vlgmr.msra.gmra.mrb[8].mxu0 %vm673_vm0, %v914_v40 }
 0x185   : > { %7634 = vmatprep.mubr.msk.f32.mxu1 %vm673_vm0, %v8968_v51  ;;  %7654 = vmatprep.mubr.msk.f32.mxu0 %vm673_vm0, %v915_v10 }
 0x188   : > { %7635 = vmatmul.mubr.msk.f32.gmra.mrb[18].mxu1 %vm673_vm0, %v8978_v3  ;;  %7655 = vmatmul.mubr.msk.f32.gmra.mrb[10].mxu0 %vm673_vm0, %v916_v38 }
 0x189   : > { %7637 = vmatprep.mubr.msk.f32.mxu1 %vm673_vm0, %v8986_v34  ;;  %7657 = vmatprep.mubr.msk.f32.mxu0 %vm673_vm0, %v917_v12 }
 0x18c   : > { %7638 = vmatmul.mubr.msk.f32.gmra.mrb[20].mxu1 %vm673_vm0, %v8993_v24  ;;  %7658 = vmatmul.mubr.msk.f32.gmra.mrb[12].mxu0 %vm673_vm0, %v918_v39 }
 0x18d   : > { %7640 = vmatprep.mubr.msk.f32.mxu1 %vm673_vm0, %v8997_v26  ;;  %7660 = vmatprep.mubr.msk.f32.mxu0 %vm673_vm0, %v919_v21 }
 0x190   : > { %7641 = vmatmul.mubr.msk.f32.gmra.mrb[22].mxu1 %vm673_vm0, %v9007_v30  ;;  %7661 = vmatmul.mubr.msk.f32.gmra.mrb[14].mxu0 %vm673_vm0, %v920_v1 }
 0x191   : > { %7663 = vmatprep.mubr.msk.f32.mxu0 %vm673_vm0, %v8949_v28  ;;  %7677 = vmatprep.mubr.msk.f32.mxu1 %vm8559_vm1, %v8558_v53 }
 0x194   : > { %7664 = vmatmul.mubr.msk.f32.gmra.mrb[16].mxu0 %vm673_vm0, %v8964_v45 }
 0x195   : > { %7666 = vmatprep.mubr.msk.f32.mxu0 %vm673_vm0, %v8968_v51 }
 0x198   : > { %7667 = vmatmul.mubr.msk.f32.gmra.mrb[18].mxu0 %vm673_vm0, %v8978_v3 }
 0x199   : > { %7669 = vmatprep.mubr.msk.f32.mxu0 %vm673_vm0, %v8986_v34 }
 0x19c   : > { %7670 = vmatmul.mubr.msk.f32.gmra.mrb[20].mxu0 %vm673_vm0, %v8993_v24 }
 0x19d   : > { %7672 = vmatprep.mubr.msk.f32.mxu0 %vm673_vm0, %v8997_v26 }
 0x1a0   : > { %7673 = vmatmul.mubr.msk.f32.gmra.mrb[22].mxu0 %vm673_vm0, %v9007_v30 }
 0x1a1   : > { %7717 = vmatprep.mubr.msk.f32.mxu0 %vm8559_vm1, %v8558_v53 }
 0x237   : > { %v9102_v15 = vpop.f32.mrb[0].mxu1 }
 0x238   : > { %v1087_v23 = vpop.f32.mrb[1].mxu1 }
 0x23b   : > { %v9104_v28 = vpop.f32.mrb[2].mxu1 }
 0x23c   : > { %v1097_v45 = vpop.f32.mrb[3].mxu1 }
 0x23f   : > { %v9106_v51 = vpop.f32.mrb[4].mxu1 }
 0x240   : > { %v9108_v2 = vpop.f32.mrb[5].mxu1 }
 0x243   : > { %v9110_v3 = vpop.f32.mrb[6].mxu1 }
 0x244   : > { %v9112_v11 = vpop.f32.mrb[7].mxu1 }
 0x247   : > { %v7589_v41 = vpop.f32.mrb[0].mxu0  ;;  %v7621_v60 = vpop.f32.mrb[8].mxu1 }
 0x248   : > { %v1047_v13 = vpop.f32.mrb[1].mxu0  ;;  %v1197_v14 = vpop.f32.mrb[9].mxu1 }
 0x249   : > { %7676 = vmatpush3.xpose.msk.msra.mxu1 %vm673_vm0, %v1197_v14 }
 0x24a   : > { %7680 = vmatprep.subr.mxu1 %v8558_v53 }
 0x24b   : > { %v7592_v34 = vpop.f32.mrb[2].mxu0  ;;  %v7624_v16 = vpop.f32.mrb[10].mxu1 }
 0x24c   : > { %v1057_v58 = vpop.f32.mrb[3].mxu0  ;;  %v1207_v59 = vpop.f32.mrb[11].mxu1  ;;  %7678 = vmatmul.mubr.msk.f32.vlgmr.msra.gmra.mrb[24].mxu1 %vm673_vm0, %v1047_v13 }
 0x24d   : > { %7681 = vmatpush3.xpose.msk.msra.mxu1 %vm673_vm0, %v7621_v60  ;;  %7682 = vmatprep.mubr.msk.f32.mxu1 %vm8559_vm1, %v8558_v53 }
 0x24e   : > { %7685 = vmatprep.subr.mxu1 %v8558_v53 }
 0x24f   : > { %v7595_v20 = vpop.f32.mrb[4].mxu0  ;;  %v7627_v61 = vpop.f32.mrb[12].mxu1 }
 0x250   : > { %v1067_v52 = vpop.f32.mrb[5].mxu0  ;;  %v1217_v33 = vpop.f32.mrb[13].mxu1  ;;  %7683 = vmatmul.mubr.msk.f32.vlgmr.msra.gmra.mrb[26].mxu1 %vm673_vm0, %v7589_v41 }
 0x251   : > { %7686 = vmatpush3.xpose.msk.msra.mxu1 %vm673_vm0, %v1207_v59  ;;  %7687 = vmatprep.mubr.msk.f32.mxu1 %vm8559_vm1, %v8558_v53 }
 0x252   : > { %7690 = vmatprep.subr.mxu1 %v8558_v53 }
 0x253   : > { %v7598_v24 = vpop.f32.mrb[6].mxu0  ;;  %v7630_v22 = vpop.f32.mrb[14].mxu1 }
 0x254   : > { %v1077_v25 = vpop.f32.mrb[7].mxu0  ;;  %v1227_v26 = vpop.f32.mrb[15].mxu1  ;;  %7688 = vmatmul.mubr.msk.f32.vlgmr.msra.gmra.mrb[28].mxu1 %vm673_vm0, %v1057_v58 }
 0x255   : > { %7691 = vmatpush3.xpose.msk.msra.mxu1 %vm673_vm0, %v7624_v16  ;;  %7692 = vmatprep.mubr.msk.f32.mxu1 %vm8559_vm1, %v8558_v53 }
 0x256   : > { %7695 = vmatprep.subr.mxu1 %v8558_v53 }
 0x257   : > { %v7633_v56 = vpop.f32.mrb[16].mxu1  ;;  %v9131_v57 = vpop.f32.mrb[8].mxu0 }
 0x258   : > { %v1237_v27 = vpop.f32.mrb[17].mxu1  ;;  %v1347_v5 = vpop.f32.mrb[9].mxu0  ;;  %7693 = vmatmul.mubr.msk.f32.vlgmr.msra.gmra.mrb[30].mxu1 %vm673_vm0, %v7592_v34 }
 0x259   : > { %7696 = vmatpush3.xpose.msk.msra.mxu1 %vm673_vm0, %v1217_v33  ;;  %7716 = vmatpush3.xpose.msk.msra.mxu0 %vm673_vm0, %v1237_v27 }
 0x25a   : > { %7697 = vmatprep.mubr.msk.f32.mxu1 %vm8559_vm1, %v8558_v53  ;;  %7700 = vmatprep.subr.mxu1 %v8558_v53 }
 0x25b   : > { %v7636_v6 = vpop.f32.mrb[18].mxu1  ;;  %v9139_v29 = vpop.f32.mrb[10].mxu0  ;;  %7725 = vmatprep.subr.mxu0 %v8558_v53 }
 0x25c   : > { %v1247_v30 = vpop.f32.mrb[19].mxu1  ;;  %v9142_v31 = vpop.f32.mrb[11].mxu0  ;;  %7698 = vmatmul.mubr.msk.f32.vlgmr.msra.gmra.mrb[32].mxu1 %vm673_vm0, %v1067_v52  ;;  %7718 = vmatmul.mubr.msk.f32.vlgmr.msra.gmra.mrb[24].mxu0 %vm673_vm0, %v1087_v23 }
 0x25d   : > { %7701 = vmatpush3.xpose.msk.msra.mxu1 %vm673_vm0, %v7627_v61  ;;  %7726 = vmatpush3.xpose.msk.msra.mxu0 %vm673_vm0, %v1247_v30 }
 0x25e   : > { %7702 = vmatprep.mubr.msk.f32.mxu1 %vm8559_vm1, %v8558_v53  ;;  %7727 = vmatprep.mubr.msk.f32.mxu0 %vm8559_vm1, %v8558_v53 }
 0x25f   : > { %v7639_v44 = vpop.f32.mrb[20].mxu1  ;;  %v9152_v32 = vpop.f32.mrb[12].mxu0  ;;  %7705 = vmatprep.subr.mxu1 %v8558_v53  ;;  %7735 = vmatprep.subr.mxu0 %v8558_v53 }
 0x260   : > { %v1257_v4 = vpop.f32.mrb[21].mxu1  ;;  %v9156_v35 = vpop.f32.mrb[13].mxu0  ;;  %7703 = vmatmul.mubr.msk.f32.vlgmr.msra.gmra.mrb[34].mxu1 %vm673_vm0, %v7595_v20  ;;  %7728 = vmatmul.mubr.msk.f32.vlgmr.msra.gmra.mrb[26].mxu0 %vm673_vm0, %v1097_v45 }
 0x261   : > { %7706 = vmatpush3.xpose.msk.msra.mxu1 %vm673_vm0, %v1227_v26  ;;  %7736 = vmatpush3.xpose.msk.msra.mxu0 %vm673_vm0, %v1257_v4 }
 0x262   : > { %7707 = vmatprep.mubr.msk.f32.mxu1 %vm8559_vm1, %v8558_v53  ;;  %7737 = vmatprep.mubr.msk.f32.mxu0 %vm8559_vm1, %v8558_v53 }
 0x263   : > { %v7642_v17 = vpop.f32.mrb[22].mxu1  ;;  %v9166_v36 = vpop.f32.mrb[14].mxu0  ;;  %7710 = vmatprep.subr.mxu1 %v8558_v53  ;;  %7745 = vmatprep.subr.mxu0 %v8558_v53 }
 0x264   : > { %v1267_v9 = vpop.f32.mrb[23].mxu1  ;;  %v9170_v55 = vpop.f32.mrb[15].mxu0  ;;  %7708 = vmatmul.mubr.msk.f32.vlgmr.msra.gmra.mrb[36].mxu1 %vm673_vm0, %v1077_v25  ;;  %7738 = vmatmul.mubr.msk.f32.vlgmr.msra.gmra.mrb[28].mxu0 %vm673_vm0, %v9108_v2 }
 0x265   : > { %7711 = vmatpush3.xpose.msk.msra.mxu1 %vm673_vm0, %v7630_v22  ;;  %7746 = vmatpush3.xpose.msk.msra.mxu0 %vm673_vm0, %v1267_v9 }
 0x266   : > { %7712 = vmatprep.mubr.msk.f32.mxu1 %vm8559_vm1, %v8558_v53  ;;  %7747 = vmatprep.mubr.msk.f32.mxu0 %vm8559_vm1, %v8558_v53 }
 0x267   : > { %v9181_v40 = vpop.f32.mrb[16].mxu0  ;;  %7720 = vmatprep.subr.mxu1 %v8558_v53  ;;  %7755 = vmatprep.subr.mxu0 %v8558_v53 }
 0x268   : > { %v9185_v42 = vpop.f32.mrb[17].mxu0  ;;  %7713 = vmatmul.mubr.msk.f32.vlgmr.msra.gmra.mrb[38].mxu1 %vm673_vm0, %v7598_v24  ;;  %7748 = vmatmul.mubr.msk.f32.vlgmr.msra.gmra.mrb[30].mxu0 %vm673_vm0, %v9112_v11 }
 0x269   : > { %7721 = vmatpush3.xpose.msk.msra.mxu1 %vm673_vm0, %v7633_v56  ;;  %7756 = vmatpush3.msra.mxu0 %v1347_v5 }
 0x26a   : > { %7722 = vmatprep.mubr.msk.f32.mxu1 %vm8559_vm1, %v8558_v53  ;;  %7730 = vmatprep.subr.mxu1 %v8558_v53 }
 0x26b   : > { %v9194_v10 = vpop.f32.mrb[18].mxu0  ;;  %7757 = vmatprep.mubr.msk.f32.mxu0 %vm8559_vm1, %v8558_v53  ;;  %7765 = vmatprep.subr.mxu0 %v8558_v53 }
 0x26c   : > { %v9199_v43 = vpop.f32.mrb[19].mxu0  ;;  %7723 = vmatmul.mubr.msk.f32.vlgmr.msra.gmra.mrb[40].mxu1 %vm673_vm0, %v9102_v15 }
 0x26d   : > { %7731 = vmatpush3.xpose.msk.msra.mxu1 %vm673_vm0, %v7636_v6  ;;  %7732 = vmatprep.mubr.msk.f32.mxu1 %vm8559_vm1, %v8558_v53 }
 0x26e   : > { %7740 = vmatprep.subr.mxu1 %v8558_v53 }
 0x26f   : > { %v9207_v7 = vpop.f32.mrb[20].mxu0 }
 0x270   : > { %v9209_v47 = vpop.f32.mrb[21].mxu0  ;;  %7733 = vmatmul.mubr.msk.f32.vlgmr.msra.gmra.mrb[42].mxu1 %vm673_vm0, %v9104_v28 }
 0x271   : > { %7741 = vmatpush3.xpose.msk.msra.mxu1 %vm673_vm0, %v7639_v44  ;;  %7742 = vmatprep.mubr.msk.f32.mxu1 %vm8559_vm1, %v8558_v53 }
 0x272   : > { %7750 = vmatprep.subr.mxu1 %v8558_v53 }
 0x273   : > { %v9217_v48 = vpop.f32.mrb[22].mxu0 }
 0x274   : > { %v9219_v49 = vpop.f32.mrb[23].mxu0  ;;  %7743 = vmatmul.mubr.msk.f32.vlgmr.msra.gmra.mrb[44].mxu1 %vm673_vm0, %v9106_v51 }
 0x275   : > { %7751 = vmatpush3.xpose.msk.msra.mxu1 %vm673_vm0, %v7642_v17  ;;  %7752 = vmatprep.mubr.msk.f32.mxu1 %vm8559_vm1, %v8558_v53 }
 0x276   : > { %7760 = vmatprep.subr.mxu1 %v8558_v53 }
 0x278   : > { %7753 = vmatmul.mubr.msk.f32.vlgmr.msra.gmra.mrb[46].mxu1 %vm673_vm0, %v9110_v3 }
 0x279   : > { %7761 = vmatpush3.msra.mxu1 %v9131_v57  ;;  %7762 = vmatprep.mubr.msk.f32.mxu1 %vm8559_vm1, %v8558_v53 }
 0x27a   : > { %7770 = vmatprep.subr.mxu1 %v8558_v53 }
 0x31f   : > { %v9233_v50 = vpop.f32.mrb[24].mxu1 }
 0x320   : > { %v7679_v38 = vpop.f32.mrb[25].mxu1  ;;  %v2643_v54 = vsel %vm2642_vm2, %v9233_v50, -inf }
 0x321   : > { %2644 = vmax.xlane.f32.xlu0 %v2643_v54 }
 0x323   : > { %v9237_v12 = vpop.f32.mrb[26].mxu1 }
 0x324   : > { %v7684_v37 = vpop.f32.mrb[27].mxu1  ;;  %v2646_v62 = vsel %vm2642_vm2, %v9237_v12, -inf }
 0x325   : > { %2647 = vmax.xlane.f32.xlu1 %v2646_v62 }
 0x327   : > { %v9241_v63 = vpop.f32.mrb[28].mxu1 }
 0x328   : > { %v7689_v46 = vpop.f32.mrb[29].mxu1  ;;  %v2649_v39 = vsel %vm2642_vm2, %v9241_v63, -inf }
 0x329   : > { %2650 = vmax.xlane.f32.xlu0 %v2649_v39 }
 0x32b   : > { %v9245_v0 = vpop.f32.mrb[30].mxu1 }
 0x32c   : > { %v7694_v21 = vpop.f32.mrb[31].mxu1  ;;  %v2652_v18 = vsel %vm2642_vm2, %v9245_v0, -inf }
 0x32d   : > { %2653 = vmax.xlane.f32.xlu1 %v2652_v18 }
 0x32f   : > { %v9249_v1 = vpop.f32.mrb[32].mxu1  ;;  %v9251_v15 = vpop.f32.mrb[24].mxu0 }
 0x330   : > { %v7699_v23 = vpop.f32.mrb[33].mxu1  ;;  %v7719_v28 = vpop.f32.mrb[25].mxu0  ;;  %v2655_v45 = vsel %vm2642_vm2, %v9249_v1, -inf  ;;  %v2667_v33 = vsel %vm2642_vm2, %v9251_v15, -inf }
 0x331   : > { %2656 = vmax.xlane.f32.xlu0 %v2655_v45 }
 0x333   : > { %v9255_v51 = vpop.f32.mrb[34].mxu1  ;;  %v9257_v2 = vpop.f32.mrb[26].mxu0 }
 0x334   : > { %v7704_v3 = vpop.f32.mrb[35].mxu1  ;;  %v7729_v11 = vpop.f32.mrb[27].mxu0  ;;  %v2658_v41 = vsel %vm2642_vm2, %v9255_v51, -inf  ;;  %v2673_v26 = vsel %vm2642_vm2, %v9257_v2, -inf }
 0x335   : > { %2659 = vmax.xlane.f32.xlu1 %v2658_v41 }
 0x337   : > { %v9261_v60 = vpop.f32.mrb[36].mxu1  ;;  %v9263_v13 = vpop.f32.mrb[28].mxu0 }
 0x338   : > { %v7709_v14 = vpop.f32.mrb[37].mxu1  ;;  %v7739_v34 = vpop.f32.mrb[29].mxu0  ;;  %v2661_v16 = vsel %vm2642_vm2, %v9261_v60, -inf  ;;  %v2679_v5 = vsel %vm2642_vm2, %v9263_v13, -inf }
 0x339   : > { %2662 = vmax.xlane.f32.xlu0 %v2661_v16 }
 0x33b   : > { %v9267_v58 = vpop.f32.mrb[38].mxu1  ;;  %v9269_v59 = vpop.f32.mrb[30].mxu0 }
 0x33c   : > { %v7714_v20 = vpop.f32.mrb[39].mxu1  ;;  %v7749_v61 = vpop.f32.mrb[31].mxu0  ;;  %v2664_v52 = vsel %vm2642_vm2, %v9267_v58, -inf  ;;  %v2685_v4 = vsel %vm2642_vm2, %v9269_v59, -inf }
 0x33d   : > { %2665 = vmax.xlane.f32.xlu1 %v2664_v52  ;;  %2668 = vmax.xlane.f32.xlu0 %v2667_v33 }
 0x33f   : > { %v9275_v24 = vpop.f32.mrb[40].mxu1 }
 0x340   : > { %v7724_v22 = vpop.f32.mrb[41].mxu1  ;;  %v2670_v25 = vsel %vm2642_vm2, %v9275_v24, -inf }
 0x341   : > { %2671 = vmax.xlane.f32.xlu1 %v2670_v25  ;;  %2674 = vmax.xlane.f32.xlu0 %v2673_v26 }
 0x343   : > { %v9281_v56 = vpop.f32.mrb[42].mxu1 }
 0x344   : > { %v7734_v57 = vpop.f32.mrb[43].mxu1  ;;  %v2676_v27 = vsel %vm2642_vm2, %v9281_v56, -inf }
 0x345   : > { %2677 = vmax.xlane.f32.xlu1 %v2676_v27  ;;  %2680 = vmax.xlane.f32.xlu0 %v2679_v5 }
 0x347   : > { %v9287_v6 = vpop.f32.mrb[44].mxu1 }
 0x348   : > { %v7744_v30 = vpop.f32.mrb[45].mxu1  ;;  %v2682_v44 = vsel %vm2642_vm2, %v9287_v6, -inf }
 0x349   : > { %2683 = vmax.xlane.f32.xlu1 %v2682_v44  ;;  %2686 = vmax.xlane.f32.xlu0 %v2685_v4 }
 0x34b   : > { %v9293_v17 = vpop.f32.mrb[46].mxu1 }
 0x34c   : > { %v7754_v9 = vpop.f32.mrb[47].mxu1  ;;  %v2688_v38 = vsel %vm2642_vm2, %v9293_v17, -inf }
 0x34d   : > { %2689 = vmax.xlane.f32.xlu1 %v2688_v38 }
 0x3ae   : > { %v2645_v54 = vpop.xlane.xlu0 %2644 }
 0x3af   : > { %v2691_v37 = vsub.f32 %v9233_v50, %v2645_v54 }
 0x3b1   : > { %v2707_v62 = vmul.f32 1.442695, %v2691_v37 }
 0x3b2   : > { %v2648_v46 = vpop.xlane.xlu1 %2647 }
 0x3b3   : > { %8332 = vpow2.f32 %v2707_v62  ;;  %v2692_v39 = vsub.f32 %v9237_v12, %v2648_v46 }
 0x3b5   : > { %v2709_v21 = vmul.f32 1.442695, %v2692_v39 }
 0x3b6   : > { %v2651_v18 = vpop.xlane.xlu0 %2650 }
 0x3b7   : > { %8334 = vpow2.f32 %v2709_v21  ;;  %v2693_v23 = vsub.f32 %v9241_v63, %v2651_v18 }
 0x3b9   : > { %v2711_v28 = vmul.f32 1.442695, %v2693_v23 }
 0x3ba   : > { %v2654_v45 = vpop.xlane.xlu1 %2653 }
 0x3bb   : > { %8336 = vpow2.f32 %v2711_v28  ;;  %v2694_v3 = vsub.f32 %v9245_v0, %v2654_v45 }
 0x3bd   : > { %v9301_v11 = vpop.eup %8332  ;;  %v2713_v41 = vmul.f32 1.442695, %v2694_v3 }
 0x3be   : > { %v2657_v14 = vpop.xlane.xlu0 %2656  ;;  %v2739_v50 = vsel %vm2642_vm2, %v9301_v11, 0.0 }
 0x3bf   : > { %8338 = vpow2.f32 %v2713_v41  ;;  %v2695_v12 = vsub.f32 %v9249_v1, %v2657_v14  ;;  %2740 = vadd.xlane.f32.xlu0 %v2739_v50 }
 0x3c1   : > { %v9306_v34 = vpop.eup %8334  ;;  %v2715_v16 = vmul.f32 1.442695, %v2695_v12 }
 0x3c2   : > { %v2660_v63 = vpop.xlane.xlu1 %2659  ;;  %v2742_v20 = vsel %vm2642_vm2, %v9306_v34, 0.0 }
 0x3c3   : > { %8340 = vpow2.f32 %v2715_v16  ;;  %v2696_v0 = vsub.f32 %v9255_v51, %v2660_v63  ;;  %2743 = vadd.xlane.f32.xlu1 %v2742_v20 }
 0x3c5   : > { %v9311_v61 = vpop.eup %8336  ;;  %v2717_v52 = vmul.f32 1.442695, %v2696_v0 }
 0x3c6   : > { %v2663_v33 = vpop.xlane.xlu0 %2662  ;;  %v2745_v22 = vsel %vm2642_vm2, %v9311_v61, 0.0 }
 0x3c7   : > { %8342 = vpow2.f32 %v2717_v52  ;;  %v2697_v1 = vsub.f32 %v9261_v60, %v2663_v33  ;;  %2746 = vadd.xlane.f32.xlu0 %v2745_v22 }
 0x3c9   : > { %v9316_v25 = vpop.eup %8338  ;;  %v2719_v26 = vmul.f32 1.442695, %v2697_v1 }
 0x3ca   : > { %v2666_v57 = vpop.xlane.xlu1 %2665  ;;  %v2669_v27 = vpop.xlane.xlu0 %2668  ;;  %v2748_v51 = vsel %vm2642_vm2, %v9316_v25, 0.0 }
 0x3cb   : > { %8344 = vpow2.f32 %v2719_v26  ;;  %v2698_v5 = vsub.f32 %v9267_v58, %v2666_v57  ;;  %v2699_v30 = vsub.f32 %v9251_v15, %v2669_v27  ;;  %2749 = vadd.xlane.f32.xlu1 %v2748_v51 }
 0x3cd   : > { %v9322_v44 = vpop.eup %8340  ;;  %v2721_v4 = vmul.f32 1.442695, %v2698_v5  ;;  %v2723_v9 = vmul.f32 1.442695, %v2699_v30 }
 0x3ce   : > { %v2672_v60 = vpop.xlane.xlu1 %2671  ;;  %v2675_v38 = vpop.xlane.xlu0 %2674  ;;  %v2751_v54 = vsel %vm2642_vm2, %v9322_v44, 0.0 }
 0x3cf   : > { %8346 = vpow2.f32 %v2721_v4  ;;  %v2700_v37 = vsub.f32 %v9275_v24, %v2672_v60  ;;  %v2701_v62 = vsub.f32 %v9257_v2, %v2675_v38  ;;  %2752 = vadd.xlane.f32.xlu0 %v2751_v54 }
 0x3d0   : > { %8348 = vpow2.f32 %v2723_v9 }
 0x3d1   : > { %v9328_v58 = vpop.eup %8342  ;;  %v2725_v15 = vmul.f32 1.442695, %v2700_v37  ;;  %v2727_v46 = vmul.f32 1.442695, %v2701_v62 }
 0x3d2   : > { %v2678_v39 = vpop.xlane.xlu1 %2677  ;;  %v2681_v21 = vpop.xlane.xlu0 %2680  ;;  %v2754_v18 = vsel %vm2642_vm2, %v9328_v58, 0.0 }
 0x3d3   : > { %8350 = vpow2.f32 %v2725_v15  ;;  %v2702_v23 = vsub.f32 %v9281_v56, %v2678_v39  ;;  %v2703_v28 = vsub.f32 %v9263_v13, %v2681_v21  ;;  %2755 = vadd.xlane.f32.xlu1 %v2754_v18 }
 0x3d4   : > { %8352 = vpow2.f32 %v2727_v46 }
 0x3d5   : > { %v9334_v24 = vpop.eup %8344  ;;  %v2729_v2 = vmul.f32 1.442695, %v2702_v23  ;;  %v2731_v45 = vmul.f32 1.442695, %v2703_v28 }
 0x3d6   : > { %v2684_v3 = vpop.xlane.xlu1 %2683  ;;  %v2687_v41 = vpop.xlane.xlu0 %2686  ;;  %v2757_v14 = vsel %vm2642_vm2, %v9334_v24, 0.0 }
 0x3d7   : > { %8354 = vpow2.f32 %v2729_v2  ;;  %v2704_v50 = vsub.f32 %v9287_v6, %v2684_v3  ;;  %v2705_v12 = vsub.f32 %v9269_v59, %v2687_v41  ;;  %2758 = vadd.xlane.f32.xlu0 %v2757_v14 }
 0x3d8   : > { %8356 = vpow2.f32 %v2731_v45 }
 0x3d9   : > { %v9340_v56 = vpop.eup %8346  ;;  %v2733_v13 = vmul.f32 1.442695, %v2704_v50  ;;  %v2735_v16 = vmul.f32 1.442695, %v2705_v12 }
 0x3da   : > { %v9342_v63 = vpop.eup %8348  ;;  %v2690_v20 = vpop.xlane.xlu1 %2689  ;;  %v2760_v0 = vsel %vm2642_vm2, %v9340_v56, 0.0 }
 0x3db   : > { %8358 = vpow2.f32 %v2733_v13  ;;  %v2706_v52 = vsub.f32 %v9293_v17, %v2690_v20  ;;  %2761 = vadd.xlane.f32.xlu1 %v2760_v0  ;;  %v2763_v6 = vsel %vm2642_vm2, %v9342_v63, 0.0 }
 0x3dc   : > { %8360 = vpow2.f32 %v2735_v16  ;;  %2764 = vadd.xlane.f32.xlu0 %v2763_v6  ;;  %v3988_v6 = vld [vmem:[%s10227_s4 + $0x8] sm:$0xff] }
 0x3dd   : > { %v9349_v59 = vpop.eup %8350  ;;  %v2737_v33 = vmul.f32 1.442695, %v2706_v52 }
 0x3de   : > { %v9351_v22 = vpop.eup %8352  ;;  %v2766_v1 = vsel %vm2642_vm2, %v9349_v59, 0.0 }
 0x3df   : > { %8362 = vpow2.f32 %v2737_v33  ;;  %2767 = vadd.xlane.f32.xlu1 %v2766_v1  ;;  %v2769_v26 = vsel %vm2642_vm2, %v9351_v22, 0.0 }
 0x3e0   : > { %2770 = vadd.xlane.f32.xlu0 %v2769_v26 }
 0x3e1   : > { %v9357_v17 = vpop.eup %8354 }
 0x3e2   : > { %v9359_v57 = vpop.eup %8356  ;;  %v2772_v27 = vsel %vm2642_vm2, %v9357_v17, 0.0 }
 0x3e3   : > { %2773 = vadd.xlane.f32.xlu1 %v2772_v27  ;;  %v2775_v51 = vsel %vm2642_vm2, %v9359_v57, 0.0  ;;  %v3990_v27 = vld [vmem:[%s10227_s4 + $0x18] sm:$0xff] }
 0x3e4   : > { %2776 = vadd.xlane.f32.xlu0 %v2775_v51 }
 0x3e5   : > { %v9365_v5 = vpop.eup %8358 }
 0x3e6   : > { %v9367_v30 = vpop.eup %8360  ;;  %v2778_v4 = vsel %vm2642_vm2, %v9365_v5, 0.0 }
 0x3e7   : > { %2779 = vadd.xlane.f32.xlu1 %v2778_v4  ;;  %v2781_v9 = vsel %vm2642_vm2, %v9367_v30, 0.0 }
 0x3e8   : > { %2782 = vadd.xlane.f32.xlu0 %v2781_v9 }
 0x3e9   : > { %v9373_v60 = vpop.eup %8362 }
 0x3ea   : > { %v2784_v38 = vsel %vm2642_vm2, %v9373_v60, 0.0 }
 0x3eb   : > { %2785 = vadd.xlane.f32.xlu1 %v2784_v38 }
 0x44c   : > { %v2741_v54 = vpop.xlane.xlu0 %2740 }
 0x44d   : > { %8364 = vrcp.f32 %v2741_v54 }
 0x450   : > { %v2744_v37 = vpop.xlane.xlu1 %2743 }
 0x451   : > { %8366 = vrcp.f32 %v2744_v37 }
 0x454   : > { %v2747_v62 = vpop.xlane.xlu0 %2746 }
 0x455   : > { %8368 = vrcp.f32 %v2747_v62 }
 0x457   : > { %v8365_v15 = vpop.eup %8364 }
 0x458   : > { %v2803_v46 = vmul.f32 %v8365_v15, %v9301_v11  ;;  %v2750_v39 = vpop.xlane.xlu1 %2749 }
 0x459   : > { %8370 = vrcp.f32 %v2750_v39 }
 0x45a   : > { %7758 = vmatmul.mubr.msk.f32.vlgmr.msra.gmra.mrb[32].mxu0 %vm2642_vm2, %v2803_v46 }
 0x45b   : > { %v8367_v21 = vpop.eup %8366  ;;  %7766 = vmatpush3.msra.mxu0 %v9142_v31  ;;  %7767 = vmatprep.mubr.msk.f32.mxu0 %vm8559_vm1, %v8558_v53 }
 0x45c   : > { %v2804_v18 = vmul.f32 %v8367_v21, %v9306_v34  ;;  %v2753_v23 = vpop.xlane.xlu0 %2752  ;;  %7775 = vmatprep.subr.mxu0 %v8558_v53 }
 0x45d   : > { %8372 = vrcp.f32 %v2753_v23 }
 0x45e   : > { %7763 = vmatmul.mubr.msk.f32.vlgmr.msra.gmra.mrb[48].mxu1 %vm2642_vm2, %v2804_v18 }
 0x45f   : > { %v8369_v28 = vpop.eup %8368  ;;  %7771 = vmatpush3.msra.mxu1 %v9139_v29  ;;  %7772 = vmatprep.mubr.msk.f32.mxu1 %vm8559_vm1, %v8558_v53 }
 0x460   : > { %v2805_v11 = vmul.f32 %v8369_v28, %v9311_v61  ;;  %v2756_v31 = vpop.xlane.xlu1 %2755  ;;  %7780 = vmatprep.subr.mxu1 %v8558_v53 }
 0x461   : > { %8374 = vrcp.f32 %v2756_v31 }
 0x462   : > { %7768 = vmatmul.mubr.msk.f32.vlgmr.msra.gmra.mrb[34].mxu0 %vm2642_vm2, %v2805_v11 }
 0x463   : > { %v8371_v34 = vpop.eup %8370  ;;  %7776 = vmatpush3.msra.mxu0 %v9156_v35  ;;  %7777 = vmatprep.mubr.msk.f32.mxu0 %vm8559_vm1, %v8558_v53 }
 0x464   : > { %v2806_v2 = vmul.f32 %v8371_v34, %v9316_v25  ;;  %v2759_v29 = vpop.xlane.xlu0 %2758  ;;  %7785 = vmatprep.subr.mxu0 %v8558_v53 }
 0x465   : > { %8376 = vrcp.f32 %v2759_v29 }
 0x466   : > { %7773 = vmatmul.mubr.msk.f32.vlgmr.msra.gmra.mrb[50].mxu1 %vm2642_vm2, %v2806_v2 }
 0x467   : > { %v8373_v61 = vpop.eup %8372  ;;  %7781 = vmatpush3.msra.mxu1 %v9152_v32  ;;  %7782 = vmatprep.mubr.msk.f32.mxu1 %vm8559_vm1, %v8558_v53 }
 0x468   : > { %v2807_v45 = vmul.f32 %v8373_v61, %v9322_v44  ;;  %v2762_v35 = vpop.xlane.xlu1 %2761  ;;  %7790 = vmatprep.subr.mxu1 %v8558_v53 }
 0x469   : > { %8378 = vrcp.f32 %v2762_v35  ;;  %v2765_v3 = vpop.xlane.xlu0 %2764 }
 0x46a   : > { %8380 = vrcp.f32 %v2765_v3  ;;  %7778 = vmatmul.mubr.msk.f32.vlgmr.msra.gmra.mrb[36].mxu0 %vm2642_vm2, %v2807_v45 }
 0x46b   : > { %v8375_v25 = vpop.eup %8374  ;;  %7786 = vmatpush3.msra.mxu0 %v9170_v55  ;;  %7787 = vmatprep.mubr.msk.f32.mxu0 %vm8559_vm1, %v8558_v53 }
 0x46c   : > { %v2808_v32 = vmul.f32 %v8375_v25, %v9328_v58  ;;  %v2768_v41 = vpop.xlane.xlu1 %2767  ;;  %7795 = vmatprep.subr.mxu0 %v8558_v53 }
 0x46d   : > { %8382 = vrcp.f32 %v2768_v41  ;;  %v2771_v44 = vpop.xlane.xlu0 %2770 }
 0x46e   : > { %8384 = vrcp.f32 %v2771_v44  ;;  %7783 = vmatmul.mubr.msk.f32.vlgmr.msra.gmra.mrb[52].mxu1 %vm2642_vm2, %v2808_v32 }
 0x46f   : > { %v8377_v14 = vpop.eup %8376  ;;  %7791 = vmatpush3.msra.mxu1 %v9166_v36  ;;  %7792 = vmatprep.mubr.msk.f32.mxu1 %vm8559_vm1, %v8558_v53 }
 0x470   : > { %v2809_v55 = vmul.f32 %v8377_v14, %v9334_v24  ;;  %v2774_v50 = vpop.xlane.xlu1 %2773  ;;  %7800 = vmatprep.subr.mxu1 %v8558_v53 }
 0x471   : > { %8386 = vrcp.f32 %v2774_v50  ;;  %v2777_v58 = vpop.xlane.xlu0 %2776 }
 0x472   : > { %8388 = vrcp.f32 %v2777_v58  ;;  %7788 = vmatmul.mubr.msk.f32.vlgmr.msra.gmra.mrb[38].mxu0 %vm2642_vm2, %v2809_v55  ;;  %v9494_v58 = vld [vmem:[%s10228_s5] ss:$0 sm:$0xff] }
 0x473   : > { %v8379_v12 = vpop.eup %8378  ;;  %7796 = vmatpush3.msra.mxu0 %v9185_v42  ;;  %7797 = vmatprep.mubr.msk.f32.mxu0 %vm8559_vm1, %v8558_v53 }
 0x474   : > { %v8381_v36 = vpop.eup %8380  ;;  %v2810_v13 = vmul.f32 %v8379_v12, %v9340_v56  ;;  %v2780_v16 = vpop.xlane.xlu1 %2779  ;;  %7805 = vmatprep.subr.mxu0 %v8558_v53 }
 0x475   : > { %v2811_v24 = vmul.f32 %v8381_v36, %v9342_v63  ;;  %8390 = vrcp.f32 %v2780_v16  ;;  %v2783_v20 = vpop.xlane.xlu0 %2782 }
 0x476   : > { %8392 = vrcp.f32 %v2783_v20  ;;  %7793 = vmatmul.mubr.msk.f32.vlgmr.msra.gmra.mrb[54].mxu1 %vm2642_vm2, %v2810_v13 }
 0x477   : > { %v8383_v0 = vpop.eup %8382  ;;  %7798 = vmatmul.mubr.msk.f32.vlgmr.msra.gmra.mrb[40].mxu0 %vm2642_vm2, %v2811_v24  ;;  %7801 = vmatpush3.msra.mxu1 %v9181_v40 }
 0x478   : > { %v8385_v42 = vpop.eup %8384  ;;  %v2812_v52 = vmul.f32 %v8383_v0, %v9349_v59  ;;  %7806 = vmatpush3.msra.mxu0 %v9199_v43  ;;  %v2786_v56 = vpop.xlane.xlu1 %2785  ;;  %7802 = vmatprep.mubr.msk.f32.mxu1 %vm8559_vm1, %v8558_v53  ;;  %v3987_v43 = vld [vmem:[%s10227_s4] sm:$0xff] }
 0x479   : > { %v2813_v63 = vmul.f32 %v8385_v42, %v9351_v22  ;;  %8394 = vrcp.f32 %v2786_v56  ;;  %7807 = vmatprep.mubr.msk.f32.mxu0 %vm8559_vm1, %v8558_v53  ;;  %7810 = vmatprep.subr.mxu1 %v8558_v53 }
 0x47a   : > { %7815 = vmatprep.subr.mxu0 %v8558_v53  ;;  %7803 = vmatmul.mubr.msk.f32.vlgmr.msra.gmra.mrb[56].mxu1 %vm2642_vm2, %v2812_v52 }
 0x47b   : > { %v8387_v40 = vpop.eup %8386  ;;  %7808 = vmatmul.mubr.msk.f32.vlgmr.msra.gmra.mrb[42].mxu0 %vm2642_vm2, %v2813_v63  ;;  %7811 = vmatpush3.msra.mxu1 %v9194_v10  ;;  %v8131_v10 = vpack.c.bf16 %v3988_v6, %v3987_v43 }
 0x47c   : > { %v8389_v59 = vpop.eup %8388  ;;  %v2814_v33 = vmul.f32 %v8387_v40, %v9357_v17  ;;  %7816 = vmatpush3.msra.mxu0 %v9209_v47  ;;  %7812 = vmatprep.mubr.msk.f32.mxu1 %vm8559_vm1, %v8558_v53 }
 0x47d   : > { %v2815_v22 = vmul.f32 %v8389_v59, %v9359_v57  ;;  %7817 = vmatprep.mubr.msk.f32.mxu0 %vm8559_vm1, %v8558_v53  ;;  %7820 = vmatprep.subr.mxu1 %v8558_v53 }
 0x47e   : > { %7825 = vmatprep.subr.mxu0 %v8558_v53  ;;  %7813 = vmatmul.mubr.msk.f32.vlgmr.msra.gmra.mrb[58].mxu1 %vm2642_vm2, %v2814_v33 }
 0x47f   : > { %v8391_v1 = vpop.eup %8390  ;;  %7818 = vmatmul.mubr.msk.f32.vlgmr.msra.gmra.mrb[44].mxu0 %vm2642_vm2, %v2815_v22  ;;  %7821 = vmatpush3.msra.mxu1 %v9207_v7 }
 0x480   : > { %v8393_v47 = vpop.eup %8392  ;;  %v2816_v26 = vmul.f32 %v8391_v1, %v9365_v5  ;;  %7826 = vmatpush3.msra.mxu0 %v9219_v49  ;;  %7822 = vmatprep.mubr.msk.f32.mxu1 %vm8559_vm1, %v8558_v53  ;;  %v3989_v49 = vld [vmem:[%s10227_s4 + $0x10] sm:$0xff] }
 0x481   : > { %v2817_v17 = vmul.f32 %v8393_v47, %v9367_v30  ;;  %7827 = vmatprep.mubr.msk.f32.mxu0 %vm8559_vm1, %v8558_v53  ;;  %7830 = vmatprep.subr.mxu1 %v8558_v53  ;;  %v8135_v51 = vpack.c.bf16 %v3990_v27, %v3989_v49 }
 0x482   : > { %7823 = vmatmul.mubr.msk.f32.vlgmr.msra.gmra.mrb[60].mxu1 %vm2642_vm2, %v2816_v26  ;;  %8132 = vmatprep.subr.bf16.mxu0 %v8131_v10 }
 0x483   : > { %v8395_v57 = vpop.eup %8394  ;;  %7828 = vmatmul.mubr.msk.f32.vlgmr.msra.gmra.mrb[46].mxu0 %vm2642_vm2, %v2817_v17  ;;  %7831 = vmatpush3.msra.mxu1 %v9217_v48 }
 0x484   : > { %v2818_v7 = vmul.f32 %v8395_v57, %v9373_v60  ;;  %7832 = vmatprep.mubr.msk.f32.mxu1 %vm8559_vm1, %v8558_v53  ;;  %8134 = vmatpush3.bf16.msra.mxu0 %v8131_v10 }
 0x485   : > { %8136 = vmatprep.subr.bf16.mxu0 %v8135_v51 }
 0x486   : > { %7833 = vmatmul.mubr.msk.f32.vlgmr.msra.gmra.mrb[62].mxu1 %vm2642_vm2, %v2818_v7 }
 0x488   : > { %8138 = vmatpush3.bf16.msra.mxu0 %v8135_v51 }
 0x52d   : > { %v2888_v48 = vpop.f32.mrb[32].mxu0 }
 0x52e   : > { %v7759_v5 = vpop.f32.mrb[33].mxu0  ;;  %7843 = vmatprep.mubr.msk.f32.mxu0 %vm673_vm0, %v2888_v48 }
 0x531   : > { %v2961_v30 = vpop.f32.mrb[48].mxu1 }
 0x532   : > { %v7764_v53 = vpop.f32.mrb[49].mxu1  ;;  %7844 = vmatmul.mubr.msk.f32.vlgmr.msra.gmra.mrb[48].mxu0 %vm673_vm0, %v2961_v30 }
 0x535   : > { %v3034_v4 = vpop.f32.mrb[34].mxu0 }
 0x536   : > { %v7769_v9 = vpop.f32.mrb[35].mxu0  ;;  %7846 = vmatprep.mubr.msk.f32.mxu0 %vm673_vm0, %v3034_v4 }
 0x539   : > { %v3107_v60 = vpop.f32.mrb[50].mxu1 }
 0x53a   : > { %v7774_v38 = vpop.f32.mrb[51].mxu1  ;;  %7847 = vmatmul.mubr.msk.f32.gmra.mrb[50].mxu0 %vm673_vm0, %v3107_v60 }
 0x53d   : > { %v3180_v54 = vpop.f32.mrb[36].mxu0 }
 0x53e   : > { %v7779_v37 = vpop.f32.mrb[37].mxu0  ;;  %7849 = vmatprep.mubr.msk.f32.mxu0 %vm673_vm0, %v3180_v54 }
 0x541   : > { %v3253_v62 = vpop.f32.mrb[52].mxu1 }
 0x542   : > { %v7784_v15 = vpop.f32.mrb[53].mxu1  ;;  %7850 = vmatmul.mubr.msk.f32.gmra.mrb[52].mxu0 %vm673_vm0, %v3253_v62 }
 0x545   : > { %v3326_v46 = vpop.f32.mrb[38].mxu0 }
 0x546   : > { %v7789_v39 = vpop.f32.mrb[39].mxu0  ;;  %7852 = vmatprep.mubr.msk.f32.mxu0 %vm673_vm0, %v3326_v46 }
 0x549   : > { %v3399_v21 = vpop.f32.mrb[54].mxu1 }
 0x54a   : > { %v3472_v18 = vpop.f32.mrb[40].mxu0  ;;  %v7794_v23 = vpop.f32.mrb[55].mxu1  ;;  %7853 = vmatmul.mubr.msk.f32.gmra.mrb[54].mxu0 %vm673_vm0, %v3399_v21 }
 0x54b   : > { %v7799_v28 = vpop.f32.mrb[41].mxu0  ;;  %7855 = vmatprep.mubr.msk.f32.mxu0 %vm673_vm0, %v3472_v18 }
 0x54d   : > { %v3545_v11 = vpop.f32.mrb[56].mxu1 }
 0x54e   : > { %v3618_v31 = vpop.f32.mrb[42].mxu0  ;;  %v7804_v34 = vpop.f32.mrb[57].mxu1  ;;  %7856 = vmatmul.mubr.msk.f32.gmra.mrb[56].mxu0 %vm673_vm0, %v3545_v11 }
 0x54f   : > { %v7809_v2 = vpop.f32.mrb[43].mxu0  ;;  %7858 = vmatprep.mubr.msk.f32.mxu0 %vm673_vm0, %v3618_v31 }
 0x551   : > { %v3691_v29 = vpop.f32.mrb[58].mxu1 }
 0x552   : > { %v3764_v61 = vpop.f32.mrb[44].mxu0  ;;  %v7814_v45 = vpop.f32.mrb[59].mxu1  ;;  %7859 = vmatmul.mubr.msk.f32.gmra.mrb[58].mxu0 %vm673_vm0, %v3691_v29 }
 0x553   : > { %v7819_v35 = vpop.f32.mrb[45].mxu0  ;;  %7861 = vmatprep.mubr.msk.f32.mxu0 %vm673_vm0, %v3764_v61 }
 0x555   : > { %v3837_v3 = vpop.f32.mrb[60].mxu1 }
 0x556   : > { %v3910_v25 = vpop.f32.mrb[46].mxu0  ;;  %v7824_v32 = vpop.f32.mrb[61].mxu1  ;;  %7862 = vmatmul.mubr.msk.f32.gmra.mrb[60].mxu0 %vm673_vm0, %v3837_v3 }
 0x557   : > { %v7829_v41 = vpop.f32.mrb[47].mxu0  ;;  %7864 = vmatprep.mubr.msk.f32.mxu0 %vm673_vm0, %v3910_v25 }
 0x559   : > { %v3983_v44 = vpop.f32.mrb[62].mxu1 }
 0x55a   : > { %v7834_v14 = vpop.f32.mrb[63].mxu1  ;;  %7865 = vmatmul.mubr.msk.f32.gmra.mrb[62].mxu0 %vm673_vm0, %v3983_v44 }
 0x605   : > { %v7845_v55 = vpop.f32.mrb[48].mxu0 }
 0x606   : > { %v4112_v50 = vpop.f32.mrb[49].mxu0  ;;  %v4118_v36 = vadd.f32 %v7845_v55, %v9494_v58 }
 0x607   : > { %v4113_v24 = vadd.f32 %v9494_v58, %v4112_v50 }
 0x60d   : > { %v7848_v12 = vpop.f32.mrb[50].mxu0 }
 0x60e   : > { %v4128_v13 = vadd.f32 %v7848_v12, %v9494_v58  ;;  %v4122_v16 = vpop.f32.mrb[51].mxu0 }
 0x60f   : > { %v4123_v20 = vadd.f32 %v9494_v58, %v4122_v16 }
 0x610   : > { %v4207_v0 = vcombine.low %v4118_v36, %v4128_v13  ;;  %v4208_v42 = vcombine.high %v4118_v36, %v4128_v13 }
 0x611   : > { %v4191_v52 = vcombine.low %v4113_v24, %v4123_v20  ;;  %v4192_v56 = vcombine.high %v4113_v24, %v4123_v20 }
 0x612   : > { %v4215_v63 = vrot.slane %v4207_v0, %v8678_v8  ;;  %v4222_v40 = vrot.slane %v4208_v42, %v8678_v8 }
 0x613   : > { %v4199_v43 = vrot.slane %v4191_v52, %v8678_v8  ;;  %v4206_v6 = vrot.slane %v4192_v56, %v8678_v8 }
 0x615   : > { %v7851_v59 = vpop.f32.mrb[52].mxu0  ;;  %v4255_v33 = vcombine.low %v4199_v43, %v4215_v63  ;;  %v4256_v22 = vcombine.high %v4199_v43, %v4215_v63  ;;  %v4271_v10 = vcombine.low %v4206_v6, %v4222_v40  ;;  %v4272_v1 = vcombine.high %v4206_v6, %v4222_v40 }
 0x616   : > { %v4132_v47 = vpop.f32.mrb[53].mxu0  ;;  %v4138_v17 = vadd.f32 %v7851_v59, %v9494_v58 }
 0x617   : > { %v4133_v49 = vadd.f32 %v9494_v58, %v4132_v47  ;;  %v4263_v28 = vrot.slane %v4255_v33, %v8688_v19  ;;  %v4270_v11 = vrot.slane %v4256_v22, %v8688_v19  ;;  %v4279_v36 = vrot.slane %v4271_v10, %v8688_v19 }
 0x618   : > { %v4286_v24 = vrot.slane %v4272_v1, %v8688_v19 }
 0x61d   : > { %v7854_v26 = vpop.f32.mrb[54].mxu0 }
 0x61e   : > { %v4148_v57 = vadd.f32 %v7854_v26, %v9494_v58  ;;  %v4142_v7 = vpop.f32.mrb[55].mxu0 }
 0x61f   : > { %v4143_v27 = vadd.f32 %v9494_v58, %v4142_v7 }
 0x620   : > { %v4239_v51 = vcombine.low %v4138_v17, %v4148_v57  ;;  %v4240_v48 = vcombine.high %v4138_v17, %v4148_v57 }
 0x621   : > { %v4223_v5 = vcombine.low %v4133_v49, %v4143_v27  ;;  %v4224_v30 = vcombine.high %v4133_v49, %v4143_v27  ;;  %v7857_v53 = vpop.f32.mrb[56].mxu0 }
 0x622   : > { %v4247_v4 = vrot.slane %v4239_v51, %v8678_v8  ;;  %v4254_v9 = vrot.slane %v4240_v48, %v8678_v8  ;;  %v4152_v60 = vpop.f32.mrb[57].mxu0  ;;  %v4158_v21 = vadd.f32 %v7857_v53, %v9494_v58 }
 0x623   : > { %v4231_v38 = vrot.slane %v4223_v5, %v8678_v8  ;;  %v4238_v54 = vrot.slane %v4224_v30, %v8678_v8  ;;  %v4153_v31 = vadd.f32 %v9494_v58, %v4152_v60 }
 0x625   : > { %v7860_v37 = vpop.f32.mrb[58].mxu0  ;;  %v4287_v62 = vcombine.low %v4231_v38, %v4247_v4  ;;  %v4288_v15 = vcombine.high %v4231_v38, %v4247_v4  ;;  %v4303_v46 = vcombine.low %v4238_v54, %v4254_v9  ;;  %v4304_v39 = vcombine.high %v4238_v54, %v4254_v9 }
 0x626   : > { %v4168_v18 = vadd.f32 %v7860_v37, %v9494_v58  ;;  %v4162_v23 = vpop.f32.mrb[59].mxu0 }
 0x627   : > { %v4163_v34 = vadd.f32 %v9494_v58, %v4162_v23  ;;  %v4295_v2 = vrot.slane %v4287_v62, %v8688_v19  ;;  %v4302_v29 = vrot.slane %v4288_v15, %v8688_v19  ;;  %v4311_v35 = vrot.slane %v4303_v46, %v8688_v19 }
 0x628   : > { %v4343_v61 = vcombine.low %v4158_v21, %v4168_v18  ;;  %v4344_v45 = vcombine.high %v4158_v21, %v4168_v18  ;;  %v4318_v3 = vrot.slane %v4304_v39, %v8688_v19 }
 0x629   : > { %v4327_v25 = vcombine.low %v4153_v31, %v4163_v34  ;;  %v4328_v32 = vcombine.high %v4153_v31, %v4163_v34  ;;  %v7863_v41 = vpop.f32.mrb[60].mxu0  ;;  %v9522_v44 = vcombine.low %v4263_v28, %v4295_v2  ;;  %v9524_v14 = vcombine.high %v4263_v28, %v4295_v2 }
 0x62a   : > { %v4351_v55 = vrot.slane %v4343_v61, %v8678_v8  ;;  %v4172_v50 = vpop.f32.mrb[61].mxu0  ;;  %v9527_v12 = vcombine.low %v4270_v11, %v4302_v29  ;;  %v4358_v20 = vrot.slane %v4344_v45, %v8678_v8  ;;  %v9536_v42 = vcombine.high %v4270_v11, %v4302_v29 }
 0x62b   : > { %v4335_v13 = vrot.slane %v4327_v25, %v8678_v8  ;;  %v4463_v16 = vsel %vm673_vm0, %v9522_v44, 0.0  ;;  %v4342_v0 = vrot.slane %v4328_v32, %v8678_v8  ;;  %v9538_v52 = vcombine.low %v4279_v36, %v4311_v35 }
 0x62c   : > { %4464 = vadd.xlane.f32.xlu0 %v4463_v16  ;;  %v9540_v40 = vcombine.high %v4279_v36, %v4311_v35  ;;  %v9542_v6 = vcombine.low %v4286_v24, %v4318_v3  ;;  %v4178_v59 = vadd.f32 %v7863_v41, %v9494_v58  ;;  %v9546_v10 = vcombine.high %v4286_v24, %v4318_v3 }
 0x62d   : > { %v7866_v56 = vpop.f32.mrb[62].mxu0  ;;  %v4391_v63 = vcombine.low %v4335_v13, %v4351_v55  ;;  %v4392_v43 = vcombine.high %v4335_v13, %v4351_v55  ;;  %v4173_v1 = vadd.f32 %v9494_v58, %v4172_v50  ;;  %v4469_v26 = vsel %vm673_vm0, %v9524_v14, 0.0 }
 0x62e   : > { %v4188_v33 = vadd.f32 %v7866_v56, %v9494_v58  ;;  %v4182_v22 = vpop.f32.mrb[63].mxu0  ;;  %v4407_v27 = vcombine.low %v4342_v0, %v4358_v20  ;;  %v4408_v51 = vcombine.high %v4342_v0, %v4358_v20  ;;  %v4481_v54 = vsel %vm673_vm0, %v9536_v42, 0.0 }
 0x62f   : > { %v4183_v47 = vadd.f32 %v9494_v58, %v4182_v22  ;;  %v4475_v58 = vsel %vm673_vm0, %v9527_v12, 0.0  ;;  %v4399_v37 = vrot.slane %v4391_v63, %v8688_v19  ;;  %v4406_v62 = vrot.slane %v4392_v43, %v8688_v19 }
 0x630   : > { %v4375_v17 = vcombine.low %v4178_v59, %v4188_v33  ;;  %v4376_v57 = vcombine.high %v4178_v59, %v4188_v33  ;;  %4470 = vadd.xlane.f32.xlu0 %v4469_v26  ;;  %v4415_v21 = vrot.slane %v4407_v27, %v8688_v19  ;;  %v4422_v18 = vrot.slane %v4408_v51, %v8688_v19 }
 0x631   : > { %v4359_v7 = vcombine.low %v4173_v1, %v4183_v47  ;;  %v4360_v49 = vcombine.high %v4173_v1, %v4183_v47  ;;  %v4493_v3 = vsel %vm673_vm0, %v9540_v40, 0.0  ;;  %v4499_v32 = vsel %vm673_vm0, %v9542_v6, 0.0 }
 0x632   : > { %v4383_v48 = vrot.slane %v4375_v17, %v8678_v8  ;;  %v4390_v5 = vrot.slane %v4376_v57, %v8678_v8  ;;  %v4505_v55 = vsel %vm673_vm0, %v9546_v10, 0.0 }
 0x633   : > { %v4367_v30 = vrot.slane %v4359_v7, %v8678_v8  ;;  %v4374_v53 = vrot.slane %v4360_v49, %v8678_v8 }
 0x634   : > { %4476 = vadd.xlane.f32.xlu0 %v4475_v58 }
 0x635   : > { %v4423_v4 = vcombine.low %v4367_v30, %v4383_v48  ;;  %v4424_v9 = vcombine.high %v4367_v30, %v4383_v48  ;;  %v4439_v60 = vcombine.low %v4374_v53, %v4390_v5  ;;  %v4440_v38 = vcombine.high %v4374_v53, %v4390_v5 }
 0x637   : > { %v4431_v15 = vrot.slane %v4423_v4, %v8688_v19  ;;  %v4438_v46 = vrot.slane %v4424_v9, %v8688_v19  ;;  %v4447_v8 = vrot.slane %v4439_v60, %v8688_v19  ;;  %v4454_v39 = vrot.slane %v4440_v38, %v8688_v19 }
 0x638   : > { %4482 = vadd.xlane.f32.xlu0 %v4481_v54  ;;  %v4487_v19 = vsel %vm673_vm0, %v9538_v52, 0.0 }
 0x639   : > { %v4455_v23 = vcombine.low %v4399_v37, %v4431_v15  ;;  %v9568_v28 = vcombine.high %v4399_v37, %v4431_v15  ;;  %v9570_v11 = vcombine.low %v4406_v62, %v4438_v46  ;;  %v9572_v31 = vcombine.high %v4406_v62, %v4438_v46 }
 0x63a   : > { %v9574_v34 = vcombine.low %v4415_v21, %v4447_v8  ;;  %v9576_v2 = vcombine.high %v4415_v21, %v4447_v8  ;;  %v9578_v29 = vcombine.low %v4422_v18, %v4454_v39  ;;  %v9580_v61 = vcombine.high %v4422_v18, %v4454_v39 }
 0x63b   : > { %v4466_v45 = vsel %vm673_vm0, %v4455_v23, 0.0  ;;  %v4472_v35 = vsel %vm673_vm0, %v9568_v28, 0.0  ;;  %v4478_v25 = vsel %vm673_vm0, %v9570_v11, 0.0  ;;  %v4484_v41 = vsel %vm673_vm0, %v9572_v31, 0.0 }
 0x63c   : > { %4467 = vadd.xlane.f32.xlu1 %v4466_v45  ;;  %4488 = vadd.xlane.f32.xlu0 %v4487_v19  ;;  %v4490_v50 = vsel %vm673_vm0, %v9574_v34, 0.0  ;;  %v4496_v36 = vsel %vm673_vm0, %v9576_v2, 0.0  ;;  %v4502_v13 = vsel %vm673_vm0, %v9578_v29, 0.0  ;;  %v4508_v16 = vsel %vm673_vm0, %v9580_v61, 0.0 }
 0x640   : > { %4473 = vadd.xlane.f32.xlu1 %v4472_v35  ;;  %4494 = vadd.xlane.f32.xlu0 %v4493_v3 }
 0x644   : > { %4479 = vadd.xlane.f32.xlu1 %v4478_v25  ;;  %4500 = vadd.xlane.f32.xlu0 %v4499_v32 }
 0x648   : > { %4485 = vadd.xlane.f32.xlu1 %v4484_v41  ;;  %4506 = vadd.xlane.f32.xlu0 %v4505_v55 }
 0x64c   : > { %4491 = vadd.xlane.f32.xlu1 %v4490_v50 }
 0x650   : > { %4497 = vadd.xlane.f32.xlu1 %v4496_v36 }
 0x654   : > { %4503 = vadd.xlane.f32.xlu1 %v4502_v13 }
 0x658   : > { %4509 = vadd.xlane.f32.xlu1 %v4508_v16 }
 0x6b9   : > { %v4465_v24 = vpop.xlane.xlu0 %4464 }
 0x6ba   : > { %v4511_v20 = vmul.f32 0.03125, %v4465_v24 }
 0x6bc   : > { %v9606_v0 = vsub.f32 %v9522_v44, %v4511_v20 }
 0x6bd   : > { %v4471_v56 = vpop.xlane.xlu0 %4470 }
 0x6be   : > { %v4513_v63 = vmul.f32 0.03125, %v4471_v56  ;;  %v4543_v43 = vmul.f32 %v9606_v0, %v9606_v0 }
 0x6c0   : > { %v9611_v59 = vsub.f32 %v9524_v14, %v4513_v63  ;;  %v4559_v33 = vsel %vm673_vm0, %v4543_v43, 0.0 }
 0x6c1   : > { %4560 = vadd.xlane.f32.xlu0 %v4559_v33  ;;  %v4477_v22 = vpop.xlane.xlu0 %4476 }
 0x6c2   : > { %v4515_v1 = vmul.f32 0.03125, %v4477_v22  ;;  %v4545_v47 = vmul.f32 %v9611_v59, %v9611_v59 }
 0x6c4   : > { %v9617_v26 = vsub.f32 %v9527_v12, %v4515_v1  ;;  %v4565_v44 = vsel %vm673_vm0, %v4545_v47, 0.0 }
 0x6c5   : > { %4566 = vadd.xlane.f32.xlu0 %v4565_v44  ;;  %v4483_v17 = vpop.xlane.xlu0 %4482 }
 0x6c6   : > { %v4517_v57 = vmul.f32 0.03125, %v4483_v17  ;;  %v4547_v14 = vmul.f32 %v9617_v26, %v9617_v26 }
 0x6c8   : > { %v9623_v7 = vsub.f32 %v9536_v42, %v4517_v57  ;;  %v4571_v49 = vsel %vm673_vm0, %v4547_v14, 0.0 }
 0x6c9   : > { %v4468_v27 = vpop.xlane.xlu1 %4467  ;;  %4572 = vadd.xlane.f32.xlu0 %v4571_v49  ;;  %v4489_v51 = vpop.xlane.xlu0 %4488 }
 0x6ca   : > { %v4512_v48 = vmul.f32 0.03125, %v4468_v27  ;;  %v4519_v5 = vmul.f32 0.03125, %v4489_v51  ;;  %v4549_v12 = vmul.f32 %v9623_v7, %v9623_v7 }
 0x6cc   : > { %v9628_v30 = vsub.f32 %v4455_v23, %v4512_v48  ;;  %v9631_v53 = vsub.f32 %v9538_v52, %v4519_v5  ;;  %v4577_v58 = vsel %vm673_vm0, %v4549_v12, 0.0  ;;  %v4717_v5 = vld [vmem:[%s10231_s8] sm:$0xff]  ;;  %v4718_v12 = vld [vmem:[%s10231_s8 + $0x8] sm:$0xff] }
 0x6cd   : > { %v4474_v4 = vpop.xlane.xlu1 %4473  ;;  %4578 = vadd.xlane.f32.xlu0 %v4577_v58  ;;  %v4495_v42 = vpop.xlane.xlu0 %4494  ;;  %v8139_v58 = vpack.c.bf16 %v4718_v12, %v4717_v5 }
 0x6ce   : > { %v4514_v9 = vmul.f32 0.03125, %v4474_v4  ;;  %v4521_v60 = vmul.f32 0.03125, %v4495_v42  ;;  %v4544_v38 = vmul.f32 %v9628_v30, %v9628_v30  ;;  %v4551_v54 = vmul.f32 %v9631_v53, %v9631_v53  ;;  %v7180_v4 = vld [vmem:[%s10231_s8 + $0x28] sm:$0xff] }
 0x6cf   : > { %8140 = vmatprep.subr.bf16.mxu1 %v8139_v58 }
 0x6d0   : > { %v9639_v37 = vsub.f32 %v9568_v28, %v4514_v9  ;;  %v9642_v62 = vsub.f32 %v9540_v40, %v4521_v60  ;;  %v4562_v52 = vsel %vm673_vm0, %v4544_v38, 0.0  ;;  %v4583_v15 = vsel %vm673_vm0, %v4551_v54, 0.0  ;;  %8142 = vmatpush3.bf16.msra.mxu1 %v8139_v58  ;;  %v4719_v9 = vld [vmem:[%s10231_s8 + $0x10] sm:$0xff]  ;;  %v4720_v60 = vld [vmem:[%s10231_s8 + $0x18] sm:$0xff] }
 0x6d1   : > { %4563 = vadd.xlane.f32.xlu1 %v4562_v52  ;;  %v4480_v46 = vpop.xlane.xlu1 %4479  ;;  %4584 = vadd.xlane.f32.xlu0 %v4583_v15  ;;  %v4501_v8 = vpop.xlane.xlu0 %4500  ;;  %v7181_v38 = vld [vmem:[%s10231_s8 + $0x30] sm:$0xff]  ;;  %v8143_v54 = vpack.c.bf16 %v4720_v60, %v4719_v9  ;;  %v7182_v52 = vld [vmem:[%s10231_s8 + $0x38] sm:$0xff] }
 0x6d2   : > { %v4516_v39 = vmul.f32 0.03125, %v4480_v46  ;;  %v4523_v21 = vmul.f32 0.03125, %v4501_v8  ;;  %v4546_v18 = vmul.f32 %v9639_v37, %v9639_v37  ;;  %v4553_v23 = vmul.f32 %v9642_v62, %v9642_v62  ;;  %v7199_v46 = vld [vmem:[%s10231_s8 + $0x40] sm:$0xff]  ;;  %v7200_v8 = vld [vmem:[%s10231_s8 + $0x48] sm:$0xff] }
 0x6d3   : > { %v8151_v15 = vpack.c.bf16 %v7182_v52, %v7181_v38  ;;  %8144 = vmatprep.subr.bf16.mxu1 %v8143_v54 }
 0x6d4   : > { %v9651_v28 = vsub.f32 %v9570_v11, %v4516_v39  ;;  %v9654_v40 = vsub.f32 %v9542_v6, %v4523_v21  ;;  %v4568_v45 = vsel %vm673_vm0, %v4546_v18, 0.0  ;;  %v4589_v19 = vsel %vm673_vm0, %v4553_v23, 0.0  ;;  %8146 = vmatpush3.bf16.msra.mxu1 %v8143_v54 }
 0x6d5   : > { %4569 = vadd.xlane.f32.xlu1 %v4568_v45  ;;  %v4486_v35 = vpop.xlane.xlu1 %4485  ;;  %4590 = vadd.xlane.f32.xlu0 %v4589_v19  ;;  %v4507_v3 = vpop.xlane.xlu0 %4506  ;;  %v9730_v39 = vpack.c.bf16 %v7200_v8, %v7199_v46 }
 0x6d6   : > { %v4518_v25 = vmul.f32 0.03125, %v4486_v35  ;;  %v4525_v32 = vmul.f32 0.03125, %v4507_v3  ;;  %v4548_v41 = vmul.f32 %v9651_v28, %v9651_v28  ;;  %v4555_v11 = vmul.f32 %v9654_v40, %v9654_v40 }
 0x6d7   : > { %8156 = vmatprep.subr.bf16.mxu1 %v9730_v39 }
 0x6d8   : > { %v9663_v55 = vsub.f32 %v9572_v31, %v4518_v25  ;;  %v9666_v6 = vsub.f32 %v9546_v10, %v4525_v32  ;;  %v4574_v50 = vsel %vm673_vm0, %v4548_v41, 0.0  ;;  %v4595_v36 = vsel %vm673_vm0, %v4555_v11, 0.0 }
 0x6d9   : > { %4575 = vadd.xlane.f32.xlu1 %v4574_v50  ;;  %v4492_v13 = vpop.xlane.xlu1 %4491  ;;  %4596 = vadd.xlane.f32.xlu0 %v4595_v36  ;;  %v9736_v50 = vld [vmem:[%s10229_s6] ss:$0 sm:$0xff] }
 0x6da   : > { %v4520_v16 = vmul.f32 0.03125, %v4492_v13  ;;  %v4550_v24 = vmul.f32 %v9663_v55, %v9663_v55  ;;  %v4557_v20 = vmul.f32 %v9666_v6, %v9666_v6 }
 0x6dc   : > { %v9675_v31 = vsub.f32 %v9574_v34, %v4520_v16  ;;  %v4580_v10 = vsel %vm673_vm0, %v4550_v24, 0.0  ;;  %v4601_v56 = vsel %vm673_vm0, %v4557_v20, 0.0 }
 0x6dd   : > { %4581 = vadd.xlane.f32.xlu1 %v4580_v10  ;;  %v4498_v63 = vpop.xlane.xlu1 %4497  ;;  %4602 = vadd.xlane.f32.xlu0 %v4601_v56  ;;  %v9742_v10 = vld [vmem:[%s10230_s7] ss:$0 sm:$0xff] }
 0x6de   : > { %v4522_v43 = vmul.f32 0.03125, %v4498_v63  ;;  %v4552_v33 = vmul.f32 %v9675_v31, %v9675_v31 }
 0x6e0   : > { %v9682_v22 = vsub.f32 %v9576_v2, %v4522_v43  ;;  %v4586_v1 = vsel %vm673_vm0, %v4552_v33, 0.0 }
 0x6e1   : > { %4587 = vadd.xlane.f32.xlu1 %v4586_v1  ;;  %v4504_v47 = vpop.xlane.xlu1 %4503 }
 0x6e2   : > { %v4524_v34 = vmul.f32 0.03125, %v4504_v47  ;;  %v4554_v44 = vmul.f32 %v9682_v22, %v9682_v22 }
 0x6e4   : > { %v9688_v17 = vsub.f32 %v9578_v29, %v4524_v34  ;;  %v4592_v57 = vsel %vm673_vm0, %v4554_v44, 0.0 }
 0x6e5   : > { %4593 = vadd.xlane.f32.xlu1 %v4592_v57  ;;  %v4510_v14 = vpop.xlane.xlu1 %4509 }
 0x6e6   : > { %v4526_v49 = vmul.f32 0.03125, %v4510_v14  ;;  %v4556_v2 = vmul.f32 %v9688_v17, %v9688_v17 }
 0x6e8   : > { %v9694_v27 = vsub.f32 %v9580_v61, %v4526_v49  ;;  %v4598_v51 = vsel %vm673_vm0, %v4556_v2, 0.0  ;;  %v7179_v61 = vld [vmem:[%s10231_s8 + $0x20] sm:$0xff] }
 0x6e9   : > { %4599 = vadd.xlane.f32.xlu1 %v4598_v51  ;;  %v8147_v42 = vpack.c.bf16 %v7180_v4, %v7179_v61 }
 0x6ea   : > { %v4558_v48 = vmul.f32 %v9694_v27, %v9694_v27 }
 0x6eb   : > { %8148 = vmatprep.subr.bf16.mxu0 %v8147_v42 }
 0x6ec   : > { %v4604_v29 = vsel %vm673_vm0, %v4558_v48, 0.0  ;;  %8150 = vmatpush3.bf16.msra.mxu0 %v8147_v42 }
 0x6ed   : > { %4605 = vadd.xlane.f32.xlu1 %v4604_v29  ;;  %8152 = vmatprep.subr.bf16.mxu0 %v8151_v15 }
 0x6f0   : > { %8154 = vmatpush3.bf16.msra.mxu0 %v8151_v15 }
 0x74e   : > { %v4561_v21 = vpop.xlane.xlu0 %4560 }
 0x74f   : > { %v4607_v18 = vmul.f32 0.03125, %v4561_v21  ;;  %v7201_v21 = vld [vmem:[%s10231_s8 + $0x50] sm:$0xff] }
 0x751   : > { %v4623_v23 = vadd.f32 1e-05, %v4607_v18  ;;  %v7202_v18 = vld [vmem:[%s10231_s8 + $0x58] sm:$0xff] }
 0x752   : > { %v4567_v45 = vpop.xlane.xlu0 %4566 }
 0x753   : > { %8396 = vrsqrt.f32 %v4623_v23  ;;  %v4609_v19 = vmul.f32 0.03125, %v4567_v45 }
 0x755   : > { %v4625_v3 = vadd.f32 1e-05, %v4609_v19 }
 0x756   : > { %v4573_v35 = vpop.xlane.xlu0 %4572 }
 0x757   : > { %v4611_v25 = vmul.f32 0.03125, %v4573_v35  ;;  %8398 = vrsqrt.f32 %v4625_v3 }
 0x759   : > { %v4627_v36 = vadd.f32 1e-05, %v4611_v25  ;;  %v8159_v25 = vpack.c.bf16 %v7202_v18, %v7201_v21 }
 0x75a   : > { %v4579_v32 = vpop.xlane.xlu0 %4578 }
 0x75b   : > { %v4613_v41 = vmul.f32 0.03125, %v4579_v32  ;;  %8400 = vrsqrt.f32 %v4627_v36 }
 0x75d   : > { %v8397_v11 = vpop.eup %8396  ;;  %v4629_v56 = vadd.f32 1e-05, %v4613_v41 }
 0x75e   : > { %v4564_v13 = vpop.xlane.xlu1 %4563  ;;  %v4585_v16 = vpop.xlane.xlu0 %4584  ;;  %v4655_v24 = vmul.f32 %v8397_v11, %v9606_v0 }
 0x75f   : > { %v4608_v20 = vmul.f32 0.03125, %v4564_v13  ;;  %v4615_v33 = vmul.f32 0.03125, %v4585_v16 }
 0x760   : > { %v4678_v63 = vmul.f32 %v9736_v50, %v4655_v24 }
 0x761   : > { %v4624_v43 = vadd.f32 1e-05, %v4608_v20  ;;  %v4631_v57 = vadd.f32 1e-05, %v4615_v33  ;;  %v8399_v48 = vpop.eup %8398 }
 0x762   : > { %v4570_v1 = vpop.xlane.xlu1 %4569  ;;  %v4591_v47 = vpop.xlane.xlu0 %4590  ;;  %v9746_v34 = vadd.f32 %v9742_v10, %v4678_v63  ;;  %v4657_v42 = vmul.f32 %v8399_v48, %v9611_v59 }
 0x763   : > { %8402 = vrsqrt.f32 %v4624_v43  ;;  %v4610_v44 = vmul.f32 0.03125, %v4570_v1  ;;  %v4617_v14 = vmul.f32 0.03125, %v4591_v47 }
 0x764   : > { %8404 = vrsqrt.f32 %v4629_v56  ;;  %7875 = vmatprep.mubr.msk.f32.mxu1 %vm673_vm0, %v9746_v34  ;;  %7907 = vmatprep.mubr.msk.f32.mxu0 %vm673_vm0, %v9746_v34  ;;  %v4680_v23 = vmul.f32 %v9736_v50, %v4657_v42 }
 0x765   : > { %v4626_v0 = vadd.f32 1e-05, %v4610_v44  ;;  %v4633_v5 = vadd.f32 1e-05, %v4617_v14  ;;  %v8401_v9 = vpop.eup %8400 }
 0x766   : > { %v4576_v49 = vpop.xlane.xlu1 %4575  ;;  %v4597_v2 = vpop.xlane.xlu0 %4596  ;;  %v4659_v45 = vmul.f32 %v8401_v9, %v9617_v26  ;;  %v9769_v16 = vadd.f32 %v9742_v10, %v4680_v23 }
 0x767   : > { %8406 = vrsqrt.f32 %v4626_v0  ;;  %v4612_v51 = vmul.f32 0.03125, %v4576_v49  ;;  %v4619_v12 = vmul.f32 0.03125, %v4597_v2 }
 0x768   : > { %8408 = vrsqrt.f32 %v4631_v57  ;;  %v4682_v26 = vmul.f32 %v9736_v50, %v4659_v45 }
 0x769   : > { %v4628_v29 = vadd.f32 1e-05, %v4612_v51  ;;  %v4635_v15 = vadd.f32 1e-05, %v4619_v12 }
 0x76a   : > { %v4582_v61 = vpop.xlane.xlu1 %4581  ;;  %v4603_v4 = vpop.xlane.xlu0 %4602  ;;  %v9788_v47 = vadd.f32 %v9742_v10, %v4682_v26 }
 0x76b   : > { %8410 = vrsqrt.f32 %v4628_v29  ;;  %v4614_v58 = vmul.f32 0.03125, %v4582_v61  ;;  %v4621_v46 = vmul.f32 0.03125, %v4603_v4 }
 0x76c   : > { %8412 = vrsqrt.f32 %v4633_v5 }
 0x76d   : > { %v8403_v60 = vpop.eup %8402  ;;  %v4630_v38 = vadd.f32 1e-05, %v4614_v58  ;;  %v4637_v32 = vadd.f32 1e-05, %v4621_v46 }
 0x76e   : > { %v8405_v54 = vpop.eup %8404  ;;  %v4656_v52 = vmul.f32 %v8403_v60, %v9628_v30  ;;  %v4588_v8 = vpop.xlane.xlu1 %4587 }
 0x76f   : > { %8414 = vrsqrt.f32 %v4630_v38  ;;  %v4616_v59 = vmul.f32 0.03125, %v4588_v8  ;;  %v4661_v3 = vmul.f32 %v8405_v54, %v9623_v7 }
 0x770   : > { %v4679_v30 = vmul.f32 %v9736_v50, %v4656_v52  ;;  %8416 = vrsqrt.f32 %v4635_v15 }
 0x771   : > { %v8407_v19 = vpop.eup %8406  ;;  %v4632_v35 = vadd.f32 1e-05, %v4616_v59  ;;  %v4684_v33 = vmul.f32 %v9736_v50, %v4661_v3 }
 0x772   : > { %v4594_v41 = vpop.xlane.xlu1 %4593  ;;  %v9765_v11 = vadd.f32 %v9742_v10, %v4679_v30  ;;  %v4658_v36 = vmul.f32 %v8407_v19, %v9639_v37  ;;  %v8409_v24 = vpop.eup %8408 }
 0x773   : > { %8418 = vrsqrt.f32 %v4632_v35  ;;  %v4618_v13 = vmul.f32 0.03125, %v4594_v41  ;;  %v4663_v44 = vmul.f32 %v8409_v24, %v9631_v53  ;;  %v9804_v49 = vadd.f32 %v9742_v10, %v4684_v33 }
 0x774   : > { %7876 = vmatmul.mubr.msk.f32.vlgmr.msra.gmra.mrb[64].mxu1 %vm673_vm0, %v9765_v11  ;;  %7908 = vmatmul.mubr.msk.f32.vlgmr.msra.gmra.mrb[64].mxu0 %vm673_vm0, %v9765_v11  ;;  %v4681_v7 = vmul.f32 %v9736_v50, %v4658_v36  ;;  %8420 = vrsqrt.f32 %v4637_v32 }
 0x775   : > { %v8411_v20 = vpop.eup %8410  ;;  %v4634_v56 = vadd.f32 1e-05, %v4618_v13  ;;  %7878 = vmatprep.mubr.msk.f32.mxu1 %vm673_vm0, %v9769_v16  ;;  %7910 = vmatprep.mubr.msk.f32.mxu0 %vm673_vm0, %v9769_v16  ;;  %v4686_v48 = vmul.f32 %v9736_v50, %v4663_v44 }
 0x776   : > { %v4600_v37 = vpop.xlane.xlu1 %4599  ;;  %v9782_v63 = vadd.f32 %v9742_v10, %v4681_v7  ;;  %v4660_v43 = vmul.f32 %v8411_v20, %v9651_v28  ;;  %8158 = vmatpush3.bf16.msra.mxu1 %v9730_v39  ;;  %v8413_v0 = vpop.eup %8412 }
 0x777   : > { %8422 = vrsqrt.f32 %v4634_v56  ;;  %v4620_v1 = vmul.f32 0.03125, %v4600_v37  ;;  %8160 = vmatprep.subr.bf16.mxu1 %v8159_v25  ;;  %v4665_v29 = vmul.f32 %v8413_v0, %v9642_v62  ;;  %v4709_v4 = vadd.f32 %v9742_v10, %v4686_v48 }
 0x778   : > { %7879 = vmatmul.mubr.msk.f32.gmra.mrb[66].mxu1 %vm673_vm0, %v9782_v63  ;;  %7911 = vmatmul.mubr.msk.f32.gmra.mrb[66].mxu0 %vm673_vm0, %v9782_v63  ;;  %v4683_v28 = vmul.f32 %v9736_v50, %v4660_v43 }
 0x779   : > { %v8415_v57 = vpop.eup %8414  ;;  %v4636_v14 = vadd.f32 1e-05, %v4620_v1  ;;  %7881 = vmatprep.mubr.msk.f32.mxu1 %vm673_vm0, %v9788_v47  ;;  %7913 = vmatprep.mubr.msk.f32.mxu0 %vm673_vm0, %v9788_v47  ;;  %v4688_v42 = vmul.f32 %v9736_v50, %v4665_v29 }
 0x77a   : > { %v4606_v39 = vpop.xlane.xlu1 %4605  ;;  %v9801_v53 = vadd.f32 %v9742_v10, %v4683_v28  ;;  %v4662_v2 = vmul.f32 %v8415_v57, %v9663_v55  ;;  %8162 = vmatpush3.bf16.msra.mxu1 %v8159_v25  ;;  %v8417_v5 = vpop.eup %8416 }
 0x77b   : > { %8424 = vrsqrt.f32 %v4636_v14  ;;  %v4622_v51 = vmul.f32 0.03125, %v4606_v39  ;;  %v4667_v9 = vmul.f32 %v8417_v5, %v9654_v40  ;;  %v4711_v15 = vadd.f32 %v9742_v10, %v4688_v42 }
 0x77c   : > { %7882 = vmatmul.mubr.msk.f32.gmra.mrb[68].mxu1 %vm673_vm0, %v9801_v53  ;;  %7914 = vmatmul.mubr.msk.f32.gmra.mrb[68].mxu0 %vm673_vm0, %v9801_v53  ;;  %v4685_v12 = vmul.f32 %v9736_v50, %v4662_v2 }
 0x77d   : > { %v8419_v61 = vpop.eup %8418  ;;  %v4638_v58 = vadd.f32 1e-05, %v4622_v51  ;;  %7884 = vmatprep.mubr.msk.f32.mxu1 %vm673_vm0, %v9804_v49  ;;  %7916 = vmatprep.mubr.msk.f32.mxu0 %vm673_vm0, %v9804_v49  ;;  %v4690_v40 = vmul.f32 %v9736_v50, %v4667_v9 }
 0x77e   : > { %v4708_v55 = vadd.f32 %v9742_v10, %v4685_v12  ;;  %v4664_v62 = vmul.f32 %v8419_v61, %v9675_v31  ;;  %v8421_v60 = vpop.eup %8420 }
 0x77f   : > { %8426 = vrsqrt.f32 %v4638_v58  ;;  %v4669_v46 = vmul.f32 %v8421_v60, %v9666_v6  ;;  %v4713_v59 = vadd.f32 %v9742_v10, %v4690_v40 }
 0x780   : > { %7885 = vmatmul.mubr.msk.f32.gmra.mrb[70].mxu1 %vm673_vm0, %v4708_v55  ;;  %7917 = vmatmul.mubr.msk.f32.gmra.mrb[70].mxu0 %vm673_vm0, %v4708_v55  ;;  %v4687_v38 = vmul.f32 %v9736_v50, %v4664_v62 }
 0x781   : > { %v8423_v54 = vpop.eup %8422  ;;  %7887 = vmatprep.mubr.msk.f32.mxu1 %vm673_vm0, %v4709_v4  ;;  %7919 = vmatprep.mubr.msk.f32.mxu0 %vm673_vm0, %v4709_v4  ;;  %v4692_v23 = vmul.f32 %v9736_v50, %v4669_v46 }
 0x782   : > { %v4710_v31 = vadd.f32 %v9742_v10, %v4687_v38  ;;  %v4666_v52 = vmul.f32 %v8423_v54, %v9682_v22 }
 0x784   : > { %7888 = vmatmul.mubr.msk.f32.gmra.mrb[72].mxu1 %vm673_vm0, %v4710_v31  ;;  %7920 = vmatmul.mubr.msk.f32.gmra.mrb[72].mxu0 %vm673_vm0, %v4710_v31  ;;  %v4689_v8 = vmul.f32 %v9736_v50, %v4666_v52 }
 0x785   : > { %v8425_v21 = vpop.eup %8424  ;;  %7890 = vmatprep.mubr.msk.f32.mxu1 %vm673_vm0, %v4711_v15  ;;  %7922 = vmatprep.mubr.msk.f32.mxu0 %vm673_vm0, %v4711_v15 }
 0x786   : > { %v4712_v18 = vadd.f32 %v9742_v10, %v4689_v8  ;;  %v4668_v22 = vmul.f32 %v8425_v21, %v9688_v17  ;;  %v4715_v17 = vadd.f32 %v9742_v10, %v4692_v23 }
 0x788   : > { %7891 = vmatmul.mubr.msk.f32.gmra.mrb[74].mxu1 %vm673_vm0, %v4712_v18  ;;  %7923 = vmatmul.mubr.msk.f32.gmra.mrb[74].mxu0 %vm673_vm0, %v4712_v18  ;;  %v4691_v6 = vmul.f32 %v9736_v50, %v4668_v22 }
 0x789   : > { %v8427_v45 = vpop.eup %8426  ;;  %7893 = vmatprep.mubr.msk.f32.mxu1 %vm673_vm0, %v4713_v59  ;;  %7925 = vmatprep.mubr.msk.f32.mxu0 %vm673_vm0, %v4713_v59 }
 0x78a   : > { %v4714_v30 = vadd.f32 %v9742_v10, %v4691_v6  ;;  %v4670_v19 = vmul.f32 %v8427_v45, %v9694_v27 }
 0x78c   : > { %7894 = vmatmul.mubr.msk.f32.gmra.mrb[76].mxu1 %vm673_vm0, %v4714_v30  ;;  %7926 = vmatmul.mubr.msk.f32.gmra.mrb[76].mxu0 %vm673_vm0, %v4714_v30  ;;  %v4693_v35 = vmul.f32 %v9736_v50, %v4670_v19 }
 0x78d   : > { %7896 = vmatprep.mubr.msk.f32.mxu1 %vm673_vm0, %v4715_v17  ;;  %7928 = vmatprep.mubr.msk.f32.mxu0 %vm673_vm0, %v4715_v17 }
 0x78e   : > { %v4716_v3 = vadd.f32 %v9742_v10, %v4693_v35 }
 0x790   : > { %7897 = vmatmul.mubr.msk.f32.gmra.mrb[78].mxu1 %vm673_vm0, %v4716_v3  ;;  %7929 = vmatmul.mubr.msk.f32.gmra.mrb[78].mxu0 %vm673_vm0, %v4716_v3 }
 0x791   : > { %7939 = vmatprep.mubr.msk.f32.mxu1 %vm673_vm0, %v9746_v34 }
 0x794   : > { %7940 = vmatmul.mubr.msk.f32.vlgmr.msra.gmra.mrb[80].mxu1 %vm673_vm0, %v9765_v11 }
 0x795   : > { %7942 = vmatprep.mubr.msk.f32.mxu1 %vm673_vm0, %v9769_v16 }
 0x798   : > { %7943 = vmatmul.mubr.msk.f32.gmra.mrb[82].mxu1 %vm673_vm0, %v9782_v63 }
 0x799   : > { %7945 = vmatprep.mubr.msk.f32.mxu1 %vm673_vm0, %v9788_v47 }
 0x79c   : > { %7946 = vmatmul.mubr.msk.f32.gmra.mrb[84].mxu1 %vm673_vm0, %v9801_v53 }
 0x79d   : > { %7948 = vmatprep.mubr.msk.f32.mxu1 %vm673_vm0, %v9804_v49 }
 0x7a0   : > { %7949 = vmatmul.mubr.msk.f32.gmra.mrb[86].mxu1 %vm673_vm0, %v4708_v55 }
 0x7a1   : > { %7951 = vmatprep.mubr.msk.f32.mxu1 %vm673_vm0, %v4709_v4 }
 0x7a4   : > { %7952 = vmatmul.mubr.msk.f32.gmra.mrb[88].mxu1 %vm673_vm0, %v4710_v31 }
 0x7a5   : > { %7954 = vmatprep.mubr.msk.f32.mxu1 %vm673_vm0, %v4711_v15 }
 0x7a8   : > { %7955 = vmatmul.mubr.msk.f32.gmra.mrb[90].mxu1 %vm673_vm0, %v4712_v18 }
 0x7a9   : > { %7957 = vmatprep.mubr.msk.f32.mxu1 %vm673_vm0, %v4713_v59 }
 0x7ac   : > { %7958 = vmatmul.mubr.msk.f32.gmra.mrb[92].mxu1 %vm673_vm0, %v4714_v30 }
 0x7ad   : > { %7960 = vmatprep.mubr.msk.f32.mxu1 %vm673_vm0, %v4715_v17 }
 0x7b0   : > { %7961 = vmatmul.mubr.msk.f32.gmra.mrb[94].mxu1 %vm673_vm0, %v4716_v3 }
 0x847   : > { %v7877_v27 = vpop.f32.mrb[64].mxu1  ;;  %v7909_v50 = vpop.f32.mrb[64].mxu0 }
 0x848   : > { %v4835_v10 = vpop.f32.mrb[65].mxu1  ;;  %v4985_v34 = vpop.f32.mrb[65].mxu0 }
 0x849   : > { %v8163_v32 = vpack.c.bf16 %v7909_v50, %v4985_v34  ;;  %7967 = vmatprep.mubr.msk.f32.mxu0 %vm673_vm0, %v4835_v10 }
 0x84b   : > { %v7880_v41 = vpop.f32.mrb[66].mxu1  ;;  %v7912_v11 = vpop.f32.mrb[66].mxu0  ;;  %8165 = vmatprep.subr.msk.bf16.mxu0 %vm9883_vm3, %v8163_v32 }
 0x84c   : > { %v4845_v36 = vpop.f32.mrb[67].mxu1  ;;  %v4995_v13 = vpop.f32.mrb[67].mxu0  ;;  %8168 = vmatpush3.bf16.xpose.msk.msra.mxu0 %vm9883_vm3, %v8163_v32 }
 0x84d   : > { %v8169_v16 = vpack.c.bf16 %v7912_v11, %v4995_v13  ;;  %7974 = vmatprep.mubr.msk.f32.mxu1 %vm673_vm0, %v4845_v36 }
 0x84f   : > { %v7883_v26 = vpop.f32.mrb[68].mxu1  ;;  %v7915_v24 = vpop.f32.mrb[68].mxu0  ;;  %8171 = vmatprep.subr.msk.bf16.mxu1 %vm9883_vm3, %v8169_v16 }
 0x850   : > { %v4855_v7 = vpop.f32.mrb[69].mxu1  ;;  %v5005_v20 = vpop.f32.mrb[69].mxu0  ;;  %8174 = vmatpush3.bf16.xpose.msk.msra.mxu1 %vm9883_vm3, %v8169_v16 }
 0x851   : > { %v8175_v56 = vpack.c.bf16 %v7915_v24, %v5005_v20 }
 0x853   : > { %v7886_v37 = vpop.f32.mrb[70].mxu1  ;;  %v7918_v63 = vpop.f32.mrb[70].mxu0  ;;  %7968 = vmatmul.mubr.msk.f32.vlgmr.msra.gmra.mrb[80].mxu0 %vm673_vm0, %v7877_v27  ;;  %8177 = vmatprep.subr.msk.bf16.mxu0 %vm9883_vm3, %v8175_v56 }
 0x854   : > { %v4865_v43 = vpop.f32.mrb[71].mxu1  ;;  %v5015_v33 = vpop.f32.mrb[71].mxu0  ;;  %8180 = vmatpush3.bf16.xpose.msk.msra.mxu0 %vm9883_vm3, %v8175_v56  ;;  %7981 = vmatprep.mubr.msk.f32.mxu0 %vm673_vm0, %v4855_v7 }
 0x855   : > { %v8181_v1 = vpack.c.bf16 %v7918_v63, %v5015_v33 }
 0x857   : > { %v7889_v47 = vpop.f32.mrb[72].mxu1  ;;  %v7921_v44 = vpop.f32.mrb[72].mxu0  ;;  %7975 = vmatmul.mubr.msk.f32.vlgmr.msra.gmra.mrb[96].mxu1 %vm673_vm0, %v7880_v41  ;;  %8183 = vmatprep.subr.msk.bf16.mxu1 %vm9883_vm3, %v8181_v1 }
 0x858   : > { %v4875_v0 = vpop.f32.mrb[73].mxu1  ;;  %v5025_v28 = vpop.f32.mrb[73].mxu0  ;;  %8186 = vmatpush3.bf16.xpose.msk.msra.mxu1 %vm9883_vm3, %v8181_v1  ;;  %7988 = vmatprep.mubr.msk.f32.mxu1 %vm673_vm0, %v4865_v43 }
 0x859   : > { %v8187_v57 = vpack.c.bf16 %v7921_v44, %v5025_v28 }
 0x85b   : > { %v7892_v14 = vpop.f32.mrb[74].mxu1  ;;  %v7924_v39 = vpop.f32.mrb[74].mxu0  ;;  %7982 = vmatmul.mubr.msk.f32.vlgmr.msra.gmra.mrb[82].mxu0 %vm673_vm0, %v7883_v26  ;;  %8189 = vmatprep.subr.msk.bf16.mxu0 %vm9883_vm3, %v8187_v57 }
 0x85c   : > { %v4885_v53 = vpop.f32.mrb[75].mxu1  ;;  %v5035_v49 = vpop.f32.mrb[75].mxu0  ;;  %8192 = vmatpush3.bf16.xpose.msk.msra.mxu0 %vm9883_vm3, %v8187_v57  ;;  %7995 = vmatprep.mubr.msk.f32.mxu0 %vm673_vm0, %v4875_v0 }
 0x85d   : > { %v8193_v2 = vpack.c.bf16 %v7924_v39, %v5035_v49 }
 0x85f   : > { %v7895_v51 = vpop.f32.mrb[76].mxu1  ;;  %v7927_v48 = vpop.f32.mrb[76].mxu0  ;;  %7989 = vmatmul.mubr.msk.f32.vlgmr.msra.gmra.mrb[98].mxu1 %vm673_vm0, %v7886_v37  ;;  %8195 = vmatprep.subr.msk.bf16.mxu1 %vm9883_vm3, %v8193_v2 }
 0x860   : > { %v4895_v29 = vpop.f32.mrb[77].mxu1  ;;  %v5045_v5 = vpop.f32.mrb[77].mxu0  ;;  %8198 = vmatpush3.bf16.xpose.msk.msra.mxu1 %vm9883_vm3, %v8193_v2  ;;  %8002 = vmatprep.mubr.msk.f32.mxu1 %vm673_vm0, %v4885_v53 }
 0x861   : > { %v8199_v12 = vpack.c.bf16 %v7927_v48, %v5045_v5 }
 0x863   : > { %v7898_v61 = vpop.f32.mrb[78].mxu1  ;;  %v7930_v58 = vpop.f32.mrb[78].mxu0  ;;  %7996 = vmatmul.mubr.msk.f32.vlgmr.msra.gmra.mrb[84].mxu0 %vm673_vm0, %v7889_v47  ;;  %8201 = vmatprep.subr.msk.bf16.mxu0 %vm9883_vm3, %v8199_v12 }
 0x864   : > { %v4905_v55 = vpop.f32.mrb[79].mxu1  ;;  %v5055_v62 = vpop.f32.mrb[79].mxu0  ;;  %8204 = vmatpush3.bf16.xpose.msk.msra.mxu0 %vm9883_vm3, %v8199_v12  ;;  %8009 = vmatprep.mubr.msk.f32.mxu0 %vm673_vm0, %v4895_v29 }
 0x865   : > { %v8205_v4 = vpack.c.bf16 %v7930_v58, %v5055_v62 }
 0x867   : > { %v7941_v42 = vpop.f32.mrb[80].mxu1  ;;  %8003 = vmatmul.mubr.msk.f32.vlgmr.msra.gmra.mrb[100].mxu1 %vm673_vm0, %v7892_v14  ;;  %8207 = vmatprep.subr.msk.bf16.mxu1 %vm9883_vm3, %v8205_v4 }
 0x868   : > { %v5135_v9 = vpop.f32.mrb[81].mxu1  ;;  %8210 = vmatpush3.bf16.xpose.msk.msra.mxu1 %vm9883_vm3, %v8205_v4  ;;  %8016 = vmatprep.mubr.msk.f32.mxu1 %vm673_vm0, %v4905_v55 }
 0x869   : > { %v8211_v60 = vpack.c.bf16 %v7941_v42, %v5135_v9 }
 0x86b   : > { %v7944_v38 = vpop.f32.mrb[82].mxu1  ;;  %8010 = vmatmul.mubr.msk.f32.vlgmr.msra.gmra.mrb[86].mxu0 %vm673_vm0, %v7895_v51  ;;  %8212 = vmatprep.subr.bf16.mxu0 %v8211_v60 }
 0x86c   : > { %v5145_v54 = vpop.f32.mrb[83].mxu1  ;;  %8214 = vmatpush3.bf16.msra.mxu0 %v8211_v60 }
 0x86d   : > { %v8215_v31 = vpack.c.bf16 %v7944_v38, %v5145_v54 }
 0x86f   : > { %v7947_v52 = vpop.f32.mrb[84].mxu1  ;;  %8017 = vmatmul.mubr.msk.f32.vlgmr.msra.gmra.mrb[102].mxu1 %vm673_vm0, %v7898_v61  ;;  %8216 = vmatprep.subr.bf16.mxu1 %v8215_v31 }
 0x870   : > { %v5155_v15 = vpop.f32.mrb[85].mxu1  ;;  %8218 = vmatpush3.bf16.msra.mxu1 %v8215_v31 }
 0x871   : > { %v9935_v40 = vpack.c.bf16 %v7947_v52, %v5155_v15 }
 0x873   : > { %v7950_v46 = vpop.f32.mrb[86].mxu1  ;;  %8220 = vmatprep.subr.bf16.mxu0 %v9935_v40 }
 0x874   : > { %v5165_v8 = vpop.f32.mrb[87].mxu1 }
 0x875   : > { %v9938_v21 = vpack.c.bf16 %v7950_v46, %v5165_v8 }
 0x877   : > { %v7953_v18 = vpop.f32.mrb[88].mxu1  ;;  %8224 = vmatprep.subr.bf16.mxu1 %v9938_v21 }
 0x878   : > { %v5175_v22 = vpop.f32.mrb[89].mxu1 }
 0x879   : > { %v9941_v59 = vpack.c.bf16 %v7953_v18, %v5175_v22 }
 0x87b   : > { %v7956_v23 = vpop.f32.mrb[90].mxu1 }
 0x87c   : > { %v5185_v6 = vpop.f32.mrb[91].mxu1 }
 0x87d   : > { %v9943_v45 = vpack.c.bf16 %v7956_v23, %v5185_v6 }
 0x87f   : > { %v7959_v30 = vpop.f32.mrb[92].mxu1 }
 0x880   : > { %v5195_v19 = vpop.f32.mrb[93].mxu1 }
 0x881   : > { %v9945_v17 = vpack.c.bf16 %v7959_v30, %v5195_v19 }
 0x883   : > { %v7962_v35 = vpop.f32.mrb[94].mxu1 }
 0x884   : > { %v5205_v3 = vpop.f32.mrb[95].mxu1 }
 0x885   : > { %v9947_v27 = vpack.c.bf16 %v7962_v35, %v5205_v3 }
 0x926   : > { %v7969_v50 = vpop.f32.mrb[80].mxu0 }
 0x927   : > { %v5292_v10 = vpop.f32.mrb[81].mxu0  ;;  %v5914_v34 = vsel %vm5910_vm4, %v7969_v50, -inf }
 0x928   : > { %5915 = vmax.xlane.f32.xlu1 %v5914_v34  ;;  %v5911_v25 = vsel %vm5910_vm4, %v5292_v10, -inf }
 0x929   : > { %5912 = vmax.xlane.f32.xlu0 %v5911_v25 }
 0x92a   : > { %v7976_v32 = vpop.f32.mrb[96].mxu1 }
 0x92b   : > { %v5379_v41 = vpop.f32.mrb[97].mxu1  ;;  %v5920_v11 = vsel %vm5910_vm4, %v7976_v32, -inf }
 0x92c   : > { %5921 = vmax.xlane.f32.xlu1 %v5920_v11  ;;  %v5917_v36 = vsel %vm5910_vm4, %v5379_v41, -inf }
 0x92d   : > { %5918 = vmax.xlane.f32.xlu0 %v5917_v36 }
 0x92e   : > { %v7983_v13 = vpop.f32.mrb[82].mxu0 }
 0x92f   : > { %v5466_v16 = vpop.f32.mrb[83].mxu0  ;;  %v5926_v26 = vsel %vm5910_vm4, %v7983_v13, -inf }
 0x930   : > { %5927 = vmax.xlane.f32.xlu1 %v5926_v26  ;;  %v5923_v24 = vsel %vm5910_vm4, %v5466_v16, -inf }
 0x931   : > { %5924 = vmax.xlane.f32.xlu0 %v5923_v24 }
 0x932   : > { %v7990_v7 = vpop.f32.mrb[98].mxu1 }
 0x933   : > { %v5553_v20 = vpop.f32.mrb[99].mxu1  ;;  %v5932_v56 = vsel %vm5910_vm4, %v7990_v7, -inf }
 0x934   : > { %5933 = vmax.xlane.f32.xlu1 %v5932_v56  ;;  %v5929_v37 = vsel %vm5910_vm4, %v5553_v20, -inf }
 0x935   : > { %5930 = vmax.xlane.f32.xlu0 %v5929_v37 }
 0x936   : > { %v9957_v63 = vpop.f32.mrb[84].mxu0 }
 0x937   : > { %v9959_v43 = vpop.f32.mrb[85].mxu0  ;;  %v5938_v33 = vsel %vm5910_vm4, %v9957_v63, -inf }
 0x938   : > { %5939 = vmax.xlane.f32.xlu1 %v5938_v33  ;;  %v5935_v1 = vsel %vm5910_vm4, %v9959_v43, -inf }
 0x939   : > { %5936 = vmax.xlane.f32.xlu0 %v5935_v1 }
 0x93a   : > { %v9965_v47 = vpop.f32.mrb[100].mxu1 }
 0x93b   : > { %v9967_v44 = vpop.f32.mrb[101].mxu1  ;;  %v5944_v0 = vsel %vm5910_vm4, %v9965_v47, -inf }
 0x93c   : > { %5945 = vmax.xlane.f32.xlu1 %v5944_v0  ;;  %v5941_v28 = vsel %vm5910_vm4, %v9967_v44, -inf }
 0x93d   : > { %5942 = vmax.xlane.f32.xlu0 %v5941_v28 }
 0x93e   : > { %v9973_v57 = vpop.f32.mrb[86].mxu0 }
 0x93f   : > { %v9975_v14 = vpop.f32.mrb[87].mxu0  ;;  %v5950_v39 = vsel %vm5910_vm4, %v9973_v57, -inf }
 0x940   : > { %5951 = vmax.xlane.f32.xlu1 %v5950_v39  ;;  %v5947_v53 = vsel %vm5910_vm4, %v9975_v14, -inf }
 0x941   : > { %5948 = vmax.xlane.f32.xlu0 %v5947_v53 }
 0x942   : > { %v9981_v49 = vpop.f32.mrb[102].mxu1 }
 0x943   : > { %v9983_v2 = vpop.f32.mrb[103].mxu1  ;;  %v5956_v51 = vsel %vm5910_vm4, %v9981_v49, -inf }
 0x944   : > { %5957 = vmax.xlane.f32.xlu1 %v5956_v51  ;;  %v5953_v48 = vsel %vm5910_vm4, %v9983_v2, -inf }
 0x945   : > { %5954 = vmax.xlane.f32.xlu0 %v5953_v48 }
 0x9b5   : > { %v5916_v29 = vpop.xlane.xlu1 %5915 }
 0x9b6   : > { %v5960_v5 = vsub.f32 %v7969_v50, %v5916_v29  ;;  %v5913_v12 = vpop.xlane.xlu0 %5912 }
 0x9b7   : > { %v5959_v61 = vsub.f32 %v5292_v10, %v5913_v12 }
 0x9b8   : > { %v5977_v58 = vmul.f32 1.442695, %v5960_v5 }
 0x9b9   : > { %v5975_v55 = vmul.f32 1.442695, %v5959_v61  ;;  %v5922_v62 = vpop.xlane.xlu1 %5921 }
 0x9ba   : > { %8428 = vpow2.f32 %v5977_v58  ;;  %v5962_v4 = vsub.f32 %v7976_v32, %v5922_v62  ;;  %v5919_v42 = vpop.xlane.xlu0 %5918 }
 0x9bb   : > { %8430 = vpow2.f32 %v5975_v55  ;;  %v5961_v9 = vsub.f32 %v5379_v41, %v5919_v42 }
 0x9bc   : > { %v5981_v60 = vmul.f32 1.442695, %v5962_v4 }
 0x9bd   : > { %v5979_v38 = vmul.f32 1.442695, %v5961_v9  ;;  %v5928_v54 = vpop.xlane.xlu1 %5927 }
 0x9be   : > { %8432 = vpow2.f32 %v5981_v60  ;;  %v5964_v31 = vsub.f32 %v7983_v13, %v5928_v54  ;;  %v5925_v52 = vpop.xlane.xlu0 %5924 }
 0x9bf   : > { %8434 = vpow2.f32 %v5979_v38  ;;  %v5963_v15 = vsub.f32 %v5466_v16, %v5925_v52 }
 0x9c0   : > { %v5985_v46 = vmul.f32 1.442695, %v5964_v31 }
 0x9c1   : > { %v5983_v8 = vmul.f32 1.442695, %v5963_v15  ;;  %v5934_v18 = vpop.xlane.xlu1 %5933 }
 0x9c2   : > { %8436 = vpow2.f32 %v5985_v46  ;;  %v5966_v22 = vsub.f32 %v7990_v7, %v5934_v18  ;;  %v5931_v23 = vpop.xlane.xlu0 %5930 }
 0x9c3   : > { %8438 = vpow2.f32 %v5983_v8  ;;  %v5965_v6 = vsub.f32 %v5553_v20, %v5931_v23 }
 0x9c4   : > { %v9989_v30 = vpop.eup %8428  ;;  %v5989_v19 = vmul.f32 1.442695, %v5966_v22 }
 0x9c5   : > { %v9991_v35 = vpop.eup %8430  ;;  %v5987_v3 = vmul.f32 1.442695, %v5965_v6  ;;  %v5940_v50 = vpop.xlane.xlu1 %5939  ;;  %v6010_v10 = vsel %vm5910_vm4, %v9989_v30, 0.0 }
 0x9c6   : > { %8440 = vpow2.f32 %v5989_v19  ;;  %v5968_v34 = vsub.f32 %v9957_v63, %v5940_v50  ;;  %v5937_v25 = vpop.xlane.xlu0 %5936  ;;  %6011 = vadd.xlane.f32.xlu1 %v6010_v10  ;;  %v6007_v32 = vsel %vm5910_vm4, %v9991_v35, 0.0 }
 0x9c7   : > { %8442 = vpow2.f32 %v5987_v3  ;;  %v5967_v41 = vsub.f32 %v9959_v43, %v5937_v25  ;;  %6008 = vadd.xlane.f32.xlu0 %v6007_v32 }
 0x9c8   : > { %v9999_v11 = vpop.eup %8432  ;;  %v5993_v36 = vmul.f32 1.442695, %v5968_v34 }
 0x9c9   : > { %v10001_v13 = vpop.eup %8434  ;;  %v5991_v16 = vmul.f32 1.442695, %v5967_v41  ;;  %v5946_v26 = vpop.xlane.xlu1 %5945  ;;  %v6016_v24 = vsel %vm5910_vm4, %v9999_v11, 0.0 }
 0x9ca   : > { %8444 = vpow2.f32 %v5993_v36  ;;  %v5970_v7 = vsub.f32 %v9965_v47, %v5946_v26  ;;  %v5943_v20 = vpop.xlane.xlu0 %5942  ;;  %6017 = vadd.xlane.f32.xlu1 %v6016_v24  ;;  %v6013_v56 = vsel %vm5910_vm4, %v10001_v13, 0.0 }
 0x9cb   : > { %8446 = vpow2.f32 %v5991_v16  ;;  %v5969_v37 = vsub.f32 %v9967_v44, %v5943_v20  ;;  %6014 = vadd.xlane.f32.xlu0 %v6013_v56 }
 0x9cc   : > { %v10009_v63 = vpop.eup %8436  ;;  %v5997_v43 = vmul.f32 1.442695, %v5970_v7 }
 0x9cd   : > { %v10011_v33 = vpop.eup %8438  ;;  %v5995_v1 = vmul.f32 1.442695, %v5969_v37  ;;  %v5952_v0 = vpop.xlane.xlu1 %5951  ;;  %v6022_v28 = vsel %vm5910_vm4, %v10009_v63, 0.0 }
 0x9ce   : > { %8448 = vpow2.f32 %v5997_v43  ;;  %v5972_v47 = vsub.f32 %v9973_v57, %v5952_v0  ;;  %v5949_v39 = vpop.xlane.xlu0 %5948  ;;  %6023 = vadd.xlane.f32.xlu1 %v6022_v28  ;;  %v6019_v53 = vsel %vm5910_vm4, %v10011_v33, 0.0 }
 0x9cf   : > { %8450 = vpow2.f32 %v5995_v1  ;;  %v5971_v44 = vsub.f32 %v9975_v14, %v5949_v39  ;;  %6020 = vadd.xlane.f32.xlu0 %v6019_v53 }
 0x9d0   : > { %v10019_v51 = vpop.eup %8440  ;;  %v6001_v48 = vmul.f32 1.442695, %v5972_v47 }
 0x9d1   : > { %v10021_v29 = vpop.eup %8442  ;;  %v5999_v5 = vmul.f32 1.442695, %v5971_v44  ;;  %v5958_v12 = vpop.xlane.xlu1 %5957  ;;  %v6028_v61 = vsel %vm5910_vm4, %v10019_v51, 0.0  ;;  %v6735_v44 = vld [vmem:[%s10232_s9] sm:$0xff] }
 0x9d2   : > { %8452 = vpow2.f32 %v6001_v48  ;;  %v5974_v57 = vsub.f32 %v9981_v49, %v5958_v12  ;;  %6029 = vadd.xlane.f32.xlu1 %v6028_v61  ;;  %v5955_v58 = vpop.xlane.xlu0 %5954  ;;  %v6025_v55 = vsel %vm5910_vm4, %v10021_v29, 0.0  ;;  %v6736_v48 = vld [vmem:[%s10232_s9 + $0x8] sm:$0xff] }
 0x9d3   : > { %8454 = vpow2.f32 %v5999_v5  ;;  %v5973_v14 = vsub.f32 %v9983_v2, %v5955_v58  ;;  %6026 = vadd.xlane.f32.xlu0 %v6025_v55  ;;  %v8243_v61 = vpack.c.bf16 %v6736_v48, %v6735_v44 }
 0x9d4   : > { %v10029_v62 = vpop.eup %8444  ;;  %v6005_v4 = vmul.f32 1.442695, %v5974_v57 }
 0x9d5   : > { %v10031_v42 = vpop.eup %8446  ;;  %v6003_v9 = vmul.f32 1.442695, %v5973_v14  ;;  %v6034_v60 = vsel %vm5910_vm4, %v10029_v62, 0.0 }
 0x9d6   : > { %8456 = vpow2.f32 %v6005_v4  ;;  %6035 = vadd.xlane.f32.xlu1 %v6034_v60  ;;  %v6031_v49 = vsel %vm5910_vm4, %v10031_v42, 0.0  ;;  %v6738_v4 = vld [vmem:[%s10232_s9 + $0x18] sm:$0xff] }
 0x9d7   : > { %8458 = vpow2.f32 %v6003_v9  ;;  %6032 = vadd.xlane.f32.xlu0 %v6031_v49 }
 0x9d8   : > { %v10037_v38 = vpop.eup %8448 }
 0x9d9   : > { %v10039_v2 = vpop.eup %8450  ;;  %v6040_v54 = vsel %vm5910_vm4, %v10037_v38, 0.0 }
 0x9da   : > { %6041 = vadd.xlane.f32.xlu1 %v6040_v54  ;;  %v6037_v31 = vsel %vm5910_vm4, %v10039_v2, 0.0 }
 0x9db   : > { %6038 = vadd.xlane.f32.xlu0 %v6037_v31 }
 0x9dc   : > { %v10045_v52 = vpop.eup %8452 }
 0x9dd   : > { %v10047_v15 = vpop.eup %8454  ;;  %v6046_v46 = vsel %vm5910_vm4, %v10045_v52, 0.0 }
 0x9de   : > { %6047 = vadd.xlane.f32.xlu1 %v6046_v46  ;;  %v6043_v8 = vsel %vm5910_vm4, %v10047_v15, 0.0 }
 0x9df   : > { %6044 = vadd.xlane.f32.xlu0 %v6043_v8 }
 0x9e0   : > { %v10053_v18 = vpop.eup %8456 }
 0x9e1   : > { %v10055_v22 = vpop.eup %8458  ;;  %v6052_v23 = vsel %vm5910_vm4, %v10053_v18, 0.0 }
 0x9e2   : > { %6053 = vadd.xlane.f32.xlu1 %v6052_v23  ;;  %v6049_v6 = vsel %vm5910_vm4, %v10055_v22, 0.0 }
 0x9e3   : > { %6050 = vadd.xlane.f32.xlu0 %v6049_v6 }
 0xa53   : > { %v6012_v19 = vpop.xlane.xlu1 %6011 }
 0xa54   : > { %8460 = vrcp.f32 %v6012_v19  ;;  %v6009_v3 = vpop.xlane.xlu0 %6008 }
 0xa55   : > { %8462 = vrcp.f32 %v6009_v3 }
 0xa57   : > { %v6018_v50 = vpop.xlane.xlu1 %6017 }
 0xa58   : > { %8464 = vrcp.f32 %v6018_v50  ;;  %v6015_v10 = vpop.xlane.xlu0 %6014 }
 0xa59   : > { %8466 = vrcp.f32 %v6015_v10 }
 0xa5b   : > { %v6024_v34 = vpop.xlane.xlu1 %6023 }
 0xa5c   : > { %8468 = vrcp.f32 %v6024_v34  ;;  %v6021_v25 = vpop.xlane.xlu0 %6020 }
 0xa5d   : > { %8470 = vrcp.f32 %v6021_v25 }
 0xa5e   : > { %v8461_v32 = vpop.eup %8460 }
 0xa5f   : > { %v8463_v41 = vpop.eup %8462  ;;  %v6030_v36 = vpop.xlane.xlu1 %6029  ;;  %v6072_v24 = vmul.f32 %v8461_v32, %v9989_v30  ;;  %v7267_v32 = vld [vmem:[%s10233_s10] ss:$0 sm:$0xff] }
 0xa60   : > { %8472 = vrcp.f32 %v6030_v36  ;;  %v6027_v16 = vpop.xlane.xlu0 %6026  ;;  %v6071_v26 = vmul.f32 %v8463_v41, %v9991_v35 }
 0xa61   : > { %8474 = vrcp.f32 %v6027_v16 }
 0xa62   : > { %v8465_v7 = vpop.eup %8464  ;;  %8023 = vmatprep.mubr.msk.f32.mxu0 %vm5910_vm4, %v6071_v26 }
 0xa63   : > { %v8467_v20 = vpop.eup %8466  ;;  %v6036_v56 = vpop.xlane.xlu1 %6035  ;;  %8024 = vmatmul.mubr.msk.f32.vlgmr.msra.gmra.mrb[88].mxu0 %vm5910_vm4, %v6072_v24  ;;  %v6074_v1 = vmul.f32 %v8465_v7, %v9999_v11 }
 0xa64   : > { %8476 = vrcp.f32 %v6036_v56  ;;  %8222 = vmatpush3.bf16.msra.mxu0 %v9935_v40  ;;  %v6033_v37 = vpop.xlane.xlu0 %6032  ;;  %v6073_v43 = vmul.f32 %v8467_v20, %v10001_v13 }
 0xa65   : > { %8228 = vmatprep.subr.bf16.mxu0 %v9941_v59  ;;  %8478 = vrcp.f32 %v6033_v37 }
 0xa66   : > { %v8469_v30 = vpop.eup %8468  ;;  %8030 = vmatprep.mubr.msk.f32.mxu1 %vm5910_vm4, %v6073_v43 }
 0xa67   : > { %v8471_v35 = vpop.eup %8470  ;;  %v6042_v0 = vpop.xlane.xlu1 %6041  ;;  %8031 = vmatmul.mubr.msk.f32.vlgmr.msra.gmra.mrb[104].mxu1 %vm5910_vm4, %v6074_v1  ;;  %v6076_v13 = vmul.f32 %v8469_v30, %v10009_v63 }
 0xa68   : > { %8480 = vrcp.f32 %v6042_v0  ;;  %8226 = vmatpush3.bf16.msra.mxu1 %v9938_v21  ;;  %v6039_v28 = vpop.xlane.xlu0 %6038  ;;  %v6075_v40 = vmul.f32 %v8471_v35, %v10011_v33 }
 0xa69   : > { %8232 = vmatprep.subr.bf16.mxu1 %v9943_v45  ;;  %8482 = vrcp.f32 %v6039_v28 }
 0xa6a   : > { %v8473_v11 = vpop.eup %8472  ;;  %8037 = vmatprep.mubr.msk.f32.mxu0 %vm5910_vm4, %v6075_v40 }
 0xa6b   : > { %v8475_v47 = vpop.eup %8474  ;;  %v6048_v39 = vpop.xlane.xlu1 %6047  ;;  %8038 = vmatmul.mubr.msk.f32.vlgmr.msra.gmra.mrb[90].mxu0 %vm5910_vm4, %v6076_v13  ;;  %v6078_v33 = vmul.f32 %v8473_v11, %v10019_v51 }
 0xa6c   : > { %8484 = vrcp.f32 %v6048_v39  ;;  %8230 = vmatpush3.bf16.msra.mxu0 %v9941_v59  ;;  %v6045_v53 = vpop.xlane.xlu0 %6044  ;;  %v6077_v21 = vmul.f32 %v8475_v47, %v10021_v29 }
 0xa6d   : > { %8236 = vmatprep.subr.bf16.mxu0 %v9945_v17  ;;  %8486 = vrcp.f32 %v6045_v53 }
 0xa6e   : > { %v8477_v63 = vpop.eup %8476  ;;  %8044 = vmatprep.mubr.msk.f32.mxu1 %vm5910_vm4, %v6077_v21 }
 0xa6f   : > { %v8479_v59 = vpop.eup %8478  ;;  %v6054_v5 = vpop.xlane.xlu1 %6053  ;;  %8045 = vmatmul.mubr.msk.f32.vlgmr.msra.gmra.mrb[106].mxu1 %vm5910_vm4, %v6078_v33  ;;  %v6080_v12 = vmul.f32 %v8477_v63, %v10029_v62  ;;  %v6737_v62 = vld [vmem:[%s10232_s9 + $0x10] sm:$0xff] }
 0xa70   : > { %8488 = vrcp.f32 %v6054_v5  ;;  %8234 = vmatpush3.bf16.msra.mxu1 %v9943_v45  ;;  %v6051_v51 = vpop.xlane.xlu0 %6050  ;;  %v6079_v29 = vmul.f32 %v8479_v59, %v10031_v42  ;;  %v8247_v60 = vpack.c.bf16 %v6738_v4, %v6737_v62 }
 0xa71   : > { %8240 = vmatprep.subr.bf16.mxu1 %v9947_v27  ;;  %8490 = vrcp.f32 %v6051_v51 }
 0xa72   : > { %v8481_v57 = vpop.eup %8480  ;;  %8051 = vmatprep.mubr.msk.f32.mxu0 %vm5910_vm4, %v6079_v29 }
 0xa73   : > { %v8483_v58 = vpop.eup %8482  ;;  %8052 = vmatmul.mubr.msk.f32.vlgmr.msra.gmra.mrb[92].mxu0 %vm5910_vm4, %v6080_v12  ;;  %v6082_v45 = vmul.f32 %v8481_v57, %v10037_v38 }
 0xa74   : > { %8238 = vmatpush3.bf16.msra.mxu0 %v9945_v17  ;;  %v6081_v55 = vmul.f32 %v8483_v58, %v10039_v2 }
 0xa75   : > { %8244 = vmatprep.subr.bf16.mxu0 %v8243_v61 }
 0xa76   : > { %v8485_v14 = vpop.eup %8484  ;;  %8058 = vmatprep.mubr.msk.f32.mxu1 %vm5910_vm4, %v6081_v55 }
 0xa77   : > { %v8487_v42 = vpop.eup %8486  ;;  %8059 = vmatmul.mubr.msk.f32.vlgmr.msra.gmra.mrb[108].mxu1 %vm5910_vm4, %v6082_v45  ;;  %v6084_v9 = vmul.f32 %v8485_v14, %v10045_v52 }
 0xa78   : > { %8242 = vmatpush3.bf16.msra.mxu1 %v9947_v27  ;;  %v6083_v17 = vmul.f32 %v8487_v42, %v10047_v15 }
 0xa7a   : > { %v8489_v49 = vpop.eup %8488  ;;  %8065 = vmatprep.mubr.msk.f32.mxu0 %vm5910_vm4, %v6083_v17 }
 0xa7b   : > { %v8491_v38 = vpop.eup %8490  ;;  %8066 = vmatmul.mubr.msk.f32.vlgmr.msra.gmra.mrb[94].mxu0 %vm5910_vm4, %v6084_v9  ;;  %v6086_v54 = vmul.f32 %v8489_v49, %v10053_v18 }
 0xa7c   : > { %v6085_v2 = vmul.f32 %v8491_v38, %v10055_v22  ;;  %8246 = vmatpush3.bf16.msra.mxu0 %v8243_v61 }
 0xa7d   : > { %8248 = vmatprep.subr.bf16.mxu0 %v8247_v60 }
 0xa7e   : > { %8072 = vmatprep.mubr.msk.f32.mxu1 %vm5910_vm4, %v6085_v2 }
 0xa7f   : > { %8073 = vmatmul.mubr.msk.f32.vlgmr.msra.gmra.mrb[110].mxu1 %vm5910_vm4, %v6086_v54 }
 0xa80   : > { %8250 = vmatpush3.bf16.msra.mxu0 %v8247_v60 }
 0xb36   : > { %v8025_v27 = vpop.f32.mrb[88].mxu0 }
 0xb37   : > { %v6159_v31 = vpop.f32.mrb[89].mxu0 }
 0xb38   : > { %8083 = vmatprep.mubr.msk.f32.mxu0 %vm673_vm0, %v6159_v31 }
 0xb39   : > { %8084 = vmatmul.mubr.msk.f32.vlgmr.msra.gmra.mrb[96].mxu0 %vm673_vm0, %v8025_v27 }
 0xb3a   : > { %v8032_v52 = vpop.f32.mrb[104].mxu1 }
 0xb3b   : > { %v6240_v15 = vpop.f32.mrb[105].mxu1 }
 0xb3c   : > { %8086 = vmatprep.mubr.msk.f32.mxu0 %vm673_vm0, %v6240_v15 }
 0xb3d   : > { %8087 = vmatmul.mubr.msk.f32.gmra.mrb[98].mxu0 %vm673_vm0, %v8032_v52 }
 0xb3e   : > { %v8039_v46 = vpop.f32.mrb[90].mxu0 }
 0xb3f   : > { %v6321_v8 = vpop.f32.mrb[91].mxu0 }
 0xb40   : > { %8089 = vmatprep.mubr.msk.f32.mxu0 %vm673_vm0, %v6321_v8 }
 0xb41   : > { %8090 = vmatmul.mubr.msk.f32.gmra.mrb[100].mxu0 %vm673_vm0, %v8039_v46 }
 0xb42   : > { %v8046_v18 = vpop.f32.mrb[106].mxu1 }
 0xb43   : > { %v6402_v22 = vpop.f32.mrb[107].mxu1 }
 0xb44   : > { %8092 = vmatprep.mubr.msk.f32.mxu0 %vm673_vm0, %v6402_v22 }
 0xb45   : > { %8093 = vmatmul.mubr.msk.f32.gmra.mrb[102].mxu0 %vm673_vm0, %v8046_v18 }
 0xb46   : > { %v8053_v23 = vpop.f32.mrb[92].mxu0 }
 0xb47   : > { %v6483_v6 = vpop.f32.mrb[93].mxu0 }
 0xb48   : > { %8095 = vmatprep.mubr.msk.f32.mxu0 %vm673_vm0, %v6483_v6 }
 0xb49   : > { %8096 = vmatmul.mubr.msk.f32.gmra.mrb[104].mxu0 %vm673_vm0, %v8053_v23 }
 0xb4a   : > { %v8060_v19 = vpop.f32.mrb[108].mxu1 }
 0xb4b   : > { %v6564_v3 = vpop.f32.mrb[109].mxu1 }
 0xb4c   : > { %8098 = vmatprep.mubr.msk.f32.mxu0 %vm673_vm0, %v6564_v3 }
 0xb4d   : > { %8099 = vmatmul.mubr.msk.f32.gmra.mrb[106].mxu0 %vm673_vm0, %v8060_v19 }
 0xb4e   : > { %v8067_v50 = vpop.f32.mrb[94].mxu0 }
 0xb4f   : > { %v6645_v10 = vpop.f32.mrb[95].mxu0 }
 0xb50   : > { %8101 = vmatprep.mubr.msk.f32.mxu0 %vm673_vm0, %v6645_v10 }
 0xb51   : > { %8102 = vmatmul.mubr.msk.f32.gmra.mrb[108].mxu0 %vm673_vm0, %v8067_v50 }
 0xb52   : > { %v8074_v34 = vpop.f32.mrb[110].mxu1 }
 0xb53   : > { %v6726_v25 = vpop.f32.mrb[111].mxu1 }
 0xb54   : > { %8104 = vmatprep.mubr.msk.f32.mxu0 %vm673_vm0, %v6726_v25 }
 0xb55   : > { %8105 = vmatmul.mubr.msk.f32.gmra.mrb[110].mxu0 %vm673_vm0, %v8074_v34 }
 0xc0c   : > { %v8085_v41 = vpop.f32.mrb[96].mxu0 }
 0xc0d   : > { %v6866_v36 = vadd.f32 %v8085_v41, %v7267_v32  ;;  %v6860_v16 = vpop.f32.mrb[97].mxu0 }
 0xc0e   : > { %v6861_v26 = vadd.f32 %v7267_v32, %v6860_v16 }
 0xc0f   : > { %6940 = vst.msk [vmem:[%s10137_s13 + $0x8] sm:$0xff] %vm673_vm0, %v6866_v36 }
 0xc10   : > { %6939 = vst.msk [vmem:[%s10137_s13] sm:$0xff] %vm673_vm0, %v6861_v26  ;;  %v8088_v24 = vpop.f32.mrb[98].mxu0 }
 0xc11   : > { %v6876_v7 = vadd.f32 %v8088_v24, %v7267_v32  ;;  %v6870_v20 = vpop.f32.mrb[99].mxu0 }
 0xc12   : > { %v6871_v56 = vadd.f32 %v7267_v32, %v6870_v20 }
 0xc13   : > { %6942 = vst.msk [vmem:[%s10137_s13 + $0x18] sm:$0xff] %vm673_vm0, %v6876_v7 }
 0xc14   : > { %6941 = vst.msk [vmem:[%s10137_s13 + $0x10] sm:$0xff] %vm673_vm0, %v6871_v56  ;;  %v8091_v37 = vpop.f32.mrb[100].mxu0 }
 0xc15   : > { %v6886_v43 = vadd.f32 %v8091_v37, %v7267_v32  ;;  %v6880_v1 = vpop.f32.mrb[101].mxu0 }
 0xc16   : > { %v6881_v30 = vadd.f32 %v7267_v32, %v6880_v1 }
 0xc17   : > { %6944 = vst.msk [vmem:[%s10137_s13 + $0x28] sm:$0xff] %vm673_vm0, %v6886_v43 }
 0xc18   : > { %6943 = vst.msk [vmem:[%s10137_s13 + $0x20] sm:$0xff] %vm673_vm0, %v6881_v30  ;;  %v8094_v35 = vpop.f32.mrb[102].mxu0 }
 0xc19   : > { %v6896_v0 = vadd.f32 %v8094_v35, %v7267_v32  ;;  %v6890_v28 = vpop.f32.mrb[103].mxu0 }
 0xc1a   : > { %v6891_v40 = vadd.f32 %v7267_v32, %v6890_v28 }
 0xc1b   : > { %6946 = vst.msk [vmem:[%s10137_s13 + $0x38] sm:$0xff] %vm673_vm0, %v6896_v0 }
 0xc1c   : > { %6945 = vst.msk [vmem:[%s10137_s13 + $0x30] sm:$0xff] %vm673_vm0, %v6891_v40  ;;  %v8097_v13 = vpop.f32.mrb[104].mxu0 }
 0xc1d   : > { %v6906_v11 = vadd.f32 %v8097_v13, %v7267_v32  ;;  %v6900_v47 = vpop.f32.mrb[105].mxu0 }
 0xc1e   : > { %v6901_v39 = vadd.f32 %v7267_v32, %v6900_v47 }
 0xc1f   : > { %6948 = vst.msk [vmem:[%s10137_s13 + $0x48] sm:$0xff] %vm673_vm0, %v6906_v11 }
 0xc20   : > { %6947 = vst.msk [vmem:[%s10137_s13 + $0x40] sm:$0xff] %vm673_vm0, %v6901_v39  ;;  %v8100_v53 = vpop.f32.mrb[106].mxu0 }
 0xc21   : > { %v6916_v21 = vadd.f32 %v8100_v53, %v7267_v32  ;;  %v6910_v33 = vpop.f32.mrb[107].mxu0 }
 0xc22   : > { %v6911_v63 = vadd.f32 %v7267_v32, %v6910_v33 }
 0xc23   : > { %6950 = vst.msk [vmem:[%s10137_s13 + $0x58] sm:$0xff] %vm673_vm0, %v6916_v21 }
 0xc24   : > { %6949 = vst.msk [vmem:[%s10137_s13 + $0x50] sm:$0xff] %vm673_vm0, %v6911_v63  ;;  %v8103_v44 = vpop.f32.mrb[108].mxu0 }
 0xc25   : > { %v6926_v48 = vadd.f32 %v8103_v44, %v7267_v32  ;;  %v6920_v59 = vpop.f32.mrb[109].mxu0 }
 0xc26   : > { %v6921_v5 = vadd.f32 %v7267_v32, %v6920_v59 }
 0xc27   : > { %6952 = vst.msk [vmem:[%s10137_s13 + $0x68] sm:$0xff] %vm673_vm0, %v6926_v48 }
 0xc28   : > { %6951 = vst.msk [vmem:[%s10137_s13 + $0x60] sm:$0xff] %vm673_vm0, %v6921_v5  ;;  %v8106_v51 = vpop.f32.mrb[110].mxu0 }
 0xc29   : > { %v6936_v29 = vadd.f32 %v8106_v51, %v7267_v32  ;;  %v6930_v12 = vpop.f32.mrb[111].mxu0 }
 0xc2a   : > { %v6931_v61 = vadd.f32 %v7267_v32, %v6930_v12 }
 0xc2b   : > { %6954 = vst.msk [vmem:[%s10137_s13 + $0x78] sm:$0xff] %vm673_vm0, %v6936_v29 }
 0xc2c   : > { %6953 = vst.msk [vmem:[%s10137_s13 + $0x70] sm:$0xff] %vm673_vm0, %v6931_v61 }
 0xc2d   : > { %8505 = shalt.err (!%p8502_p3)
}
 0xc2e   : > { %s8506_s25 = scalar_lea.hbm %s10172_s24, 2048  ;;  %s8510_s22 = scalar_lea.hbm %s10234_s11, 4096 }
 0xc2f   : > { %p8507_p4 = scmp.ne.s32.totalorder %s10172_s24, %s8506_s25  ;;  %p8511_p9 = scmp.lt.u32.totalorder %s10172_s24, %s10234_s11 }
 0xc30   : > { %p8512_p10 = scmp.lt.u32.totalorder %s8510_s22, %s8506_s25  ;;  %p8514_p12 = scmp.lt.u32.totalorder %s8506_s25, %s10172_s24 }
 0xc31   : > { %p8508_p7 = pnand %p8507_p4, %p8661_p5 }
 0xc32   : > { %p8513_p11 = por %p8512_p10, %p8511_p9 }
 0xc33   : > { %p8509_p8 = pneg %p8508_p7 }
 0xc34   : > { %p8515_p13 = por %p8514_p12, %p8513_p11 }
 0xc36   : > { %p8516_p0 = pnand %p8515_p13, %p8509_p8 }
 0xc38   : > { %8519 = shalt.err (!%p8516_p0)
}
 0xc39   : > { %s8561_s29 = smov 128   ;;  %s8562_s14 = smov 8  }
 0xc3a   : > { %8255 = dma.vmem_to_hbm [thread:$0]  (%p8661_p5), %s10174_s15, 2048, %s10172_s24, %s10182_s21, %s8561_s29, %s8561_s29, %s8562_s14  }
 0xc3b PF: > { %p8261_p1 = scmp.ge.s32.totalorder %s8554_s20, 2  ;;  %s6984_s13 = sand.u32 1, %s8542_s17  }
 0xc3c   : > { %s6985_s25 = scalar_lea.sflag [#allocation3], %s6984_s13 }
 0xc3d   : > { %p8258_p2 = pnand %p8261_p1, %p8665_p6 }
 0xc3f   : > { %8537 = dma.done.wait (!%p8258_p2), %s6985_s25, 2048  }
 0xc40   : > { %8539 = vsyncadd (!%p8258_p2), %s6985_s25, 4294965248  ;;  %p21_p3 = scmp.ge.s32.totalorder %s8648_s23, 4   ;;  %s10239_s17 = smov %s8546_s18 }
 0xc41   : > { %s10240_s18 = smov %s8550_s19  ;;  %s10241_s19 = smov %s8659_s26 }
 0xc42   : > { %s10242_s20 = smov %s8648_s23  ;;  %23 = sbr.rel (!%p21_p3) target bundleno = 3 (0x3), region = 103 }
 0xc49   :  { %6990 = vsyncpa [#allocation3], 1 }
 0xc4a   :  { %6992 = vsyncpa [#allocation3 + $0x1], 1 }

</bundles_post_ra>
